<compile_context>
chip_gen: v7x
topology: tpu7x:2x2x1
jax: 0.10.0
libtpu: 0.0.40
codegen_flags: <defaults>
</compile_context>

<pallas_src>
import functools
import math

import jax
import jax.numpy as jnp
from jax.experimental import pallas as pl
from jax.experimental.pallas import tpu as pltpu

F32 = jnp.float32
BF16 = jnp.bfloat16


def _enc_layer_names(pre):
    return [pre + s for s in (
        "_wqkv3", "_bqkv3", "_wo", "_bo",
        "_ln1_g", "_ln1_b",
        "_ff1_w", "_ff1_b", "_ff2_w", "_ff2_b",
        "_ln2_g", "_ln2_b")]


PARAM_NAMES = tuple(
    ["lin_w", "lin_b", "head_e", "head_et"]
    + _enc_layer_names("enc")
    + _enc_layer_names("trsf")
    + ["out_w", "out_b"]
)


def _tensorcores_per_chip():
    """Best-effort TC count (v7x: 2). Falls back to 1 (correct on v5e/v6e)."""
    try:
        info = pltpu.get_tpu_info()
    except Exception:
        return 1
    for attr in ("num_cores", "num_tensorcores", "tensorcore_count", "cores_per_chip"):
        v = getattr(info, attr, None)
        if isinstance(v, int) and 1 <= v <= 2:
            return v
    return 1


_NUM_TC = _tensorcores_per_chip()


# ------------------------------ fused kernel -------------------------------

def _calf_kernel(x_ref, *refs, names, num_heads, tokens_per_batch):
    n = len(names)
    p = dict(zip(names, refs[:n]))
    y_ref = refs[n]

    T, L = x_ref.shape                       # T = BB * M rows (batch folded into rows)
    M = tokens_per_batch
    BB = T // M
    D = p["lin_w"].shape[1]
    DP = p["enc_wqkv3"].shape[1] // 3        # D padded to a lane-tile multiple (128)
    H = num_heads
    dh = D // H
    scale = 1.0 / math.sqrt(dh)
    eps = 1e-5

    e_mat = p["head_e"][...]                 # (DP, H) 0/1 head indicator, bf16
    et_mat = p["head_et"][...]               # (H, DP)

    # ---- helpers (weights read from VMEM-resident refs; bf16 MXU, f32 accumulate) ----
    def mm(x, w_name, b_name=None, relu=False):
        y = jnp.dot(x.astype(BF16), p[w_name][...], preferred_element_type=F32)
        if b_name is not None:
            y = y + p[b_name][...]
        return jnp.maximum(y, 0.0) if relu else y

    def layer_norm(x, g, b):
        mu = jnp.mean(x, axis=-1, keepdims=True)
        xc = x - mu
        var = jnp.mean(xc * xc, axis=-1, keepdims=True)
        return xc * jax.lax.rsqrt(var + eps) * p[g][...] + p[b][...]

    def self_attention(h, pre):
        # ONE full-width QKV matmul; Q/K/V sections start at 128-lane boundaries so the
        # static slices below are tile-aligned (pad lanes >= D are exactly zero).
        qkv = mm(h, pre + "_wqkv3", pre + "_bqkv3")            # (T, 3*DP)
        q = qkv[:, 0:DP].reshape(BB, M, DP)
        k = qkv[:, DP:2 * DP].reshape(BB, M, DP)
        v = qkv[:, 2 * DP:3 * DP].reshape(BB, M, DP)

        # Per-head scores without per-head matmuls: elementwise Q*K (VPU) reduced within
        # each head's dh lanes by a single matmul against the 0/1 head-indicator E.
        prod = q[:, :, None, :] * k[:, None, :, :]             # (BB, M, M, DP)
        s = jnp.dot(prod.reshape(BB * M * M, DP).astype(BF16), e_mat,
                    preferred_element_type=F32) * scale        # (BB*M*M, H)
        s = s.reshape(BB, M, M, H)
        s = s - jnp.max(s, axis=2, keepdims=True)              # softmax over keys (axis 2)
        ex = jnp.exp(s)
        pr = ex * pl.reciprocal(jnp.sum(ex, axis=2, keepdims=True), approx=True)

        # Expand probabilities back to DP lanes (one matmul) and do the PV contraction on
        # the VPU (sublane reduce over the key axis).
        pf = jnp.dot(pr.reshape(BB * M * M, H).astype(BF16), et_mat,
                     preferred_element_type=F32).reshape(BB, M, M, DP)
        o = jnp.sum(pf * v[:, None, :, :], axis=2)             # (BB, M, DP)

        # Output projection: ONE (T, DP) x (DP, D) matmul (head-sum is the contraction).
        return mm(o.reshape(T, DP), pre + "_wo", pre + "_bo")  # (T, D)

    def encoder_layer(h, pre):
        # PyTorch nn.TransformerEncoderLayer defaults: post-LN, ReLU FFN.
        # TODO(synk): dropout (p=0.1, train mode) omitted -> eval semantics.
        a = self_attention(h, pre)
        h1 = layer_norm(h + a, pre + "_ln1_g", pre + "_ln1_b")
        f = mm(h1, pre + "_ff1_w", pre + "_ff1_b", relu=True)  # 2048-wide, lane dense
        f = mm(f, pre + "_ff2_w", pre + "_ff2_b")
        return layer_norm(h1 + f, pre + "_ln2_g", pre + "_ln2_b")

    # ---- instance norm over L (biased var, eps=1e-5); the (b l m -> b m l) rearrange was
    #      folded into the host-side row layout, so stats are plain per-row lane reductions ----
    xv = x_ref[...]                                            # (T, L) f32
    mu = jnp.mean(xv, axis=-1, keepdims=True)                  # (T, 1)
    xc = xv - mu
    var = jnp.mean(xc * xc, axis=-1, keepdims=True)
    inv_sd = jax.lax.rsqrt(var + eps)                          # EUP, not a vector divide
    sd = jnp.sqrt(var + eps)
    tok = xc * inv_sd                                          # (T, L)

    h = mm(tok, "lin_w", "lin_b")                              # Linear(L -> D), (T, D)

    # ---- Encoder_PCA transformer layer (outputs_time1).  The cross-attention branch
    #      (outputs_text1) is dead in the 'llm_to_trsf' path and is not computed. ----
    x_time = encoder_layer(h, "enc")

    # ---- Encoder_TRSF ----
    out_time = encoder_layer(x_time, "trsf")                   # (T, D)

    # ---- out_layer (sequence length == M, so "[:, -M:, :]" is all tokens) + de-norm ----
    y = mm(out_time, "out_w", "out_b")                         # (T, P)
    y_ref[...] = y * sd + mu                                   # * stdev + means


# ------------------------------ host wrapper -------------------------------

@functools.partial(jax.jit, static_argnums=(2,))
def calf_forward(x, params, num_heads):
    """'llm_to_trsf' long_term_forecast branch of Model.forward — one fused pallas_call."""
    B, L, M = x.shape
    P = params["out_w"].shape[1]

    # v7x: one grid step per TensorCore with B/#TC batch elements folded into rows.
    # v5e / v6e (single TC): one grid step with the whole batch folded into rows.
    G = _NUM_TC if (_NUM_TC >= 2 and B % _NUM_TC == 0) else 1
    rows = (B * M) // G

    flat = [params[name] for name in PARAM_NAMES]
    # Layout plumbing only: fold revin's (b l m -> b m l) rearrange into the row layout.
    x_rows = jnp.transpose(x, (0, 2, 1)).reshape(B * M, L)      # rows = (batch, channel)

    def resident(a):
        # Full-array block with a constant index map -> fetched once, VMEM-resident.
        return pl.BlockSpec(a.shape, lambda g, _nd=a.ndim: (0,) * _nd)

    y_rows = pl.pallas_call(
        functools.partial(_calf_kernel, names=PARAM_NAMES,
                          num_heads=num_heads, tokens_per_batch=M),
        grid=(G,),
        in_specs=[pl.BlockSpec((rows, L), lambda g: (g, 0))]
                 + [resident(a) for a in flat],
        out_specs=pl.BlockSpec((rows, P), lambda g: (g, 0)),
        out_shape=jax.ShapeDtypeStruct((B * M, P), jnp.float32),
        compiler_params=pltpu.CompilerParams(
            dimension_semantics=("parallel",),
            vmem_limit_bytes=32 * 1024 * 1024),
    )(x_rows, *flat)

    # (b m l -> b l m) rearrange of the forecast.
    outputs_time = jnp.transpose(y_rows.reshape(B, M, P), (0, 2, 1))   # (B, P, M)
    return {"outputs_text": None, "outputs_time": outputs_time,
            "intermidiate_time": None, "intermidiate_text": None}


# ------------------------------- param init --------------------------------

def init_params(key, L, D, FF, P, H):
    dh = D // H
    DP = ((D + 127) // 128) * 128            # pad D to a 128-lane tile for Q/K/V sections
    keys = iter(jax.random.split(key, 64))

    def w(shape, scale=0.02):                # matmul weights stored bf16 (MXU operands)
        return (jax.random.normal(next(keys), shape, F32) * scale).astype(BF16)

    def zeros(shape):
        return jnp.zeros(shape, F32)

    def ones(shape):
        return jnp.ones(shape, F32)

    def qkv_weight():
        # Fused [Q | K | V] with each D-wide section zero-padded to DP columns so the
        # in-kernel slices land on 128-lane tile boundaries.
        blocks = []
        for _ in range(3):
            wi = jax.random.normal(next(keys), (D, D), F32) * 0.02
            blocks.append(jnp.pad(wi, ((0, 0), (0, DP - D))))
        return jnp.concatenate(blocks, axis=1).astype(BF16)     # (D, 3*DP)

    def out_proj_weight():
        wi = jax.random.normal(next(keys), (D, D), F32) * 0.02
        return jnp.pad(wi, ((0, DP - D), (0, 0))).astype(BF16)  # (DP, D), pad rows zero

    def enc_layer(pre):
        return {
            pre + "_wqkv3": qkv_weight(), pre + "_bqkv3": zeros((1, 3 * DP)),
            pre + "_wo": out_proj_weight(), pre + "_bo": zeros((1, D)),
            pre + "_ln1_g": ones((1, D)), pre + "_ln1_b": zeros((1, D)),
            pre + "_ff1_w": w((D, FF)), pre + "_ff1_b": zeros((1, FF)),
            pre + "_ff2_w": w((FF, D)), pre + "_ff2_b": zeros((1, D)),
            pre + "_ln2_g": ones((1, D)), pre + "_ln2_b": zeros((1, D)),
        }

    # 0/1 head-indicator matrix: E[d, h] = 1 iff feature d (< D) belongs to head h.
    d_idx = jnp.arange(DP)[:, None]
    h_idx = jnp.arange(H)[None, :]
    e_mat = jnp.where((d_idx < D) & (d_idx // dh == h_idx), 1.0, 0.0).astype(BF16)

    params = {"lin_w": w((L, D)), "lin_b": zeros((1, D)),
              "head_e": e_mat, "head_et": jnp.transpose(e_mat)}
    params.update(enc_layer("enc"))
    params.update(enc_layer("trsf"))
    params.update({"out_w": w((D, P)), "out_b": zeros((1, P))})
    return params


# ---------------------------------- main ------------------------------------

if __name__ == "__main__":
    B, L, M = 2, 16, 8            # batch, seq_len, enc_in
    D, H, FF = 96, 12, 2048       # d_model, nhead (module default 12), dim_feedforward (default)
    P = 8                         # pred_len

    key = jax.random.PRNGKey(0)
    kx, kp = jax.random.split(key)
    x = jax.random.normal(kx, (B, L, M), jnp.float32)
    params = init_params(kp, L, D, FF, P, H)

    out = calf_forward(x, params, H)
    jax.block_until_ready(out["outputs_time"])
    assert out["outputs_time"].shape == (B, P, M)
    assert bool(jnp.all(jnp.isfinite(out["outputs_time"])))
    print("KERNEL_OK")
</pallas_src>

<mosaic_0001>
module attributes {stable_mosaic.version = 11 : i64} {
  func.func @_calf_kernel(%arg0: i32, %arg1: memref<16x16xf32, #tpu.memory_space<vmem>>, %arg2: memref<16x96xbf16, #tpu.memory_space<vmem>>, %arg3: memref<1x96xf32, #tpu.memory_space<vmem>>, %arg4: memref<128x12xbf16, #tpu.memory_space<vmem>>, %arg5: memref<12x128xbf16, #tpu.memory_space<vmem>>, %arg6: memref<96x384xbf16, #tpu.memory_space<vmem>>, %arg7: memref<1x384xf32, #tpu.memory_space<vmem>>, %arg8: memref<128x96xbf16, #tpu.memory_space<vmem>>, %arg9: memref<1x96xf32, #tpu.memory_space<vmem>>, %arg10: memref<1x96xf32, #tpu.memory_space<vmem>>, %arg11: memref<1x96xf32, #tpu.memory_space<vmem>>, %arg12: memref<96x2048xbf16, #tpu.memory_space<vmem>>, %arg13: memref<1x2048xf32, #tpu.memory_space<vmem>>, %arg14: memref<2048x96xbf16, #tpu.memory_space<vmem>>, %arg15: memref<1x96xf32, #tpu.memory_space<vmem>>, %arg16: memref<1x96xf32, #tpu.memory_space<vmem>>, %arg17: memref<1x96xf32, #tpu.memory_space<vmem>>, %arg18: memref<96x384xbf16, #tpu.memory_space<vmem>>, %arg19: memref<1x384xf32, #tpu.memory_space<vmem>>, %arg20: memref<128x96xbf16, #tpu.memory_space<vmem>>, %arg21: memref<1x96xf32, #tpu.memory_space<vmem>>, %arg22: memref<1x96xf32, #tpu.memory_space<vmem>>, %arg23: memref<1x96xf32, #tpu.memory_space<vmem>>, %arg24: memref<96x2048xbf16, #tpu.memory_space<vmem>>, %arg25: memref<1x2048xf32, #tpu.memory_space<vmem>>, %arg26: memref<2048x96xbf16, #tpu.memory_space<vmem>>, %arg27: memref<1x96xf32, #tpu.memory_space<vmem>>, %arg28: memref<1x96xf32, #tpu.memory_space<vmem>>, %arg29: memref<1x96xf32, #tpu.memory_space<vmem>>, %arg30: memref<96x8xbf16, #tpu.memory_space<vmem>>, %arg31: memref<1x8xf32, #tpu.memory_space<vmem>>, %arg32: memref<16x8xf32, #tpu.memory_space<vmem>>) attributes {dimension_semantics = [#tpu.dimension_semantics<parallel>], iteration_bounds = array<i64: 1>, scalar_prefetch = 0 : i64, scratch_operands = 0 : i64, tpu.core_type = #tpu.core_type<tc>, window_params = [{transform_indices = @transform_0, window_bounds = array<i64: 16, 16>}, {pipeline_mode = #tpu.pipeline_mode<synchronous>, transform_indices = @transform_1, window_bounds = array<i64: 16, 96>}, {pipeline_mode = #tpu.pipeline_mode<synchronous>, transform_indices = @transform_2, window_bounds = array<i64: 1, 96>}, {pipeline_mode = #tpu.pipeline_mode<synchronous>, transform_indices = @transform_3, window_bounds = array<i64: 128, 12>}, {pipeline_mode = #tpu.pipeline_mode<synchronous>, transform_indices = @transform_4, window_bounds = array<i64: 12, 128>}, {pipeline_mode = #tpu.pipeline_mode<synchronous>, transform_indices = @transform_5, window_bounds = array<i64: 96, 384>}, {pipeline_mode = #tpu.pipeline_mode<synchronous>, transform_indices = @transform_6, window_bounds = array<i64: 1, 384>}, {pipeline_mode = #tpu.pipeline_mode<synchronous>, transform_indices = @transform_7, window_bounds = array<i64: 128, 96>}, {pipeline_mode = #tpu.pipeline_mode<synchronous>, transform_indices = @transform_8, window_bounds = array<i64: 1, 96>}, {pipeline_mode = #tpu.pipeline_mode<synchronous>, transform_indices = @transform_9, window_bounds = array<i64: 1, 96>}, {pipeline_mode = #tpu.pipeline_mode<synchronous>, transform_indices = @transform_10, window_bounds = array<i64: 1, 96>}, {pipeline_mode = #tpu.pipeline_mode<synchronous>, transform_indices = @transform_11, window_bounds = array<i64: 96, 2048>}, {pipeline_mode = #tpu.pipeline_mode<synchronous>, transform_indices = @transform_12, window_bounds = array<i64: 1, 2048>}, {pipeline_mode = #tpu.pipeline_mode<synchronous>, transform_indices = @transform_13, window_bounds = array<i64: 2048, 96>}, {pipeline_mode = #tpu.pipeline_mode<synchronous>, transform_indices = @transform_14, window_bounds = array<i64: 1, 96>}, {pipeline_mode = #tpu.pipeline_mode<synchronous>, transform_indices = @transform_15, window_bounds = array<i64: 1, 96>}, {pipeline_mode = #tpu.pipeline_mode<synchronous>, transform_indices = @transform_16, window_bounds = array<i64: 1, 96>}, {pipeline_mode = #tpu.pipeline_mode<synchronous>, transform_indices = @transform_17, window_bounds = array<i64: 96, 384>}, {pipeline_mode = #tpu.pipeline_mode<synchronous>, transform_indices = @transform_18, window_bounds = array<i64: 1, 384>}, {pipeline_mode = #tpu.pipeline_mode<synchronous>, transform_indices = @transform_19, window_bounds = array<i64: 128, 96>}, {pipeline_mode = #tpu.pipeline_mode<synchronous>, transform_indices = @transform_20, window_bounds = array<i64: 1, 96>}, {pipeline_mode = #tpu.pipeline_mode<synchronous>, transform_indices = @transform_21, window_bounds = array<i64: 1, 96>}, {pipeline_mode = #tpu.pipeline_mode<synchronous>, transform_indices = @transform_22, window_bounds = array<i64: 1, 96>}, {pipeline_mode = #tpu.pipeline_mode<synchronous>, transform_indices = @transform_23, window_bounds = array<i64: 96, 2048>}, {pipeline_mode = #tpu.pipeline_mode<synchronous>, transform_indices = @transform_24, window_bounds = array<i64: 1, 2048>}, {pipeline_mode = #tpu.pipeline_mode<synchronous>, transform_indices = @transform_25, window_bounds = array<i64: 2048, 96>}, {pipeline_mode = #tpu.pipeline_mode<synchronous>, transform_indices = @transform_26, window_bounds = array<i64: 1, 96>}, {pipeline_mode = #tpu.pipeline_mode<synchronous>, transform_indices = @transform_27, window_bounds = array<i64: 1, 96>}, {pipeline_mode = #tpu.pipeline_mode<synchronous>, transform_indices = @transform_28, window_bounds = array<i64: 1, 96>}, {pipeline_mode = #tpu.pipeline_mode<synchronous>, transform_indices = @transform_29, window_bounds = array<i64: 96, 8>}, {pipeline_mode = #tpu.pipeline_mode<synchronous>, transform_indices = @transform_30, window_bounds = array<i64: 1, 8>}, {transform_indices = @transform_31, window_bounds = array<i64: 16, 8>}]} {
    %c0 = arith.constant 0 : index
    %c0_0 = arith.constant 0 : index
    %0 = vector.load %arg4[%c0, %c0_0] : memref<128x12xbf16, #tpu.memory_space<vmem>>, vector<128x12xbf16>
    %c0_1 = arith.constant 0 : index
    %c0_2 = arith.constant 0 : index
    %1 = vector.load %arg5[%c0_1, %c0_2] : memref<12x128xbf16, #tpu.memory_space<vmem>>, vector<12x128xbf16>
    %c0_3 = arith.constant 0 : index
    %c0_4 = arith.constant 0 : index
    %2 = vector.load %arg1[%c0_3, %c0_4] : memref<16x16xf32, #tpu.memory_space<vmem>>, vector<16x16xf32>
    %cst = arith.constant dense<0.000000e+00> : vector<16xf32>
    %3 = vector.multi_reduction <add>, %2, %cst [1] : vector<16x16xf32> to vector<16xf32>
    %4 = vector.shape_cast %3 : vector<16xf32> to vector<16x1xf32>
    %cst_5 = arith.constant 1.600000e+01 : f32
    %5 = vector.broadcast %cst_5 : f32 to vector<16x1xf32>
    %6 = arith.divf %4, %5 : vector<16x1xf32>
    %7 = vector.broadcast %6 : vector<16x1xf32> to vector<16x16xf32>
    %8 = arith.subf %2, %7 : vector<16x16xf32>
    %9 = arith.mulf %8, %8 : vector<16x16xf32>
    %cst_6 = arith.constant dense<0.000000e+00> : vector<16xf32>
    %10 = vector.multi_reduction <add>, %9, %cst_6 [1] : vector<16x16xf32> to vector<16xf32>
    %11 = vector.shape_cast %10 : vector<16xf32> to vector<16x1xf32>
    %cst_7 = arith.constant 1.600000e+01 : f32
    %12 = vector.broadcast %cst_7 : f32 to vector<16x1xf32>
    %13 = arith.divf %11, %12 : vector<16x1xf32>
    %cst_8 = arith.constant 9.99999974E-6 : f32
    %14 = vector.broadcast %cst_8 : f32 to vector<16x1xf32>
    %15 = arith.addf %13, %14 : vector<16x1xf32>
    %16 = math.rsqrt %15 : vector<16x1xf32>
    %cst_9 = arith.constant 9.99999974E-6 : f32
    %17 = vector.broadcast %cst_9 : f32 to vector<16x1xf32>
    %18 = arith.addf %13, %17 : vector<16x1xf32>
    %19 = math.sqrt %18 : vector<16x1xf32>
    %20 = vector.broadcast %16 : vector<16x1xf32> to vector<16x16xf32>
    %21 = arith.mulf %8, %20 : vector<16x16xf32>
    %22 = arith.truncf %21 : vector<16x16xf32> to vector<16x16xbf16>
    %c0_10 = arith.constant 0 : index
    %c0_11 = arith.constant 0 : index
    %23 = vector.load %arg2[%c0_10, %c0_11] : memref<16x96xbf16, #tpu.memory_space<vmem>>, vector<16x96xbf16>
    %cst_12 = arith.constant dense<0.000000e+00> : vector<16x96xf32>
    %24 = tpu.matmul %22, %23, %cst_12 {dimension_numbers = #tpu.dot_dimension_numbers<[1], [0], [0], [1], [0, 0, 1, 1], [], []>} : vector<16x16xbf16>, vector<16x96xbf16>, vector<16x96xf32> -> vector<16x96xf32>
    %c0_13 = arith.constant 0 : index
    %c0_14 = arith.constant 0 : index
    %25 = vector.load %arg3[%c0_13, %c0_14] : memref<1x96xf32, #tpu.memory_space<vmem>>, vector<1x96xf32>
    %26 = vector.broadcast %25 : vector<1x96xf32> to vector<16x96xf32>
    %27 = arith.addf %24, %26 : vector<16x96xf32>
    %28 = arith.truncf %27 : vector<16x96xf32> to vector<16x96xbf16>
    %c0_15 = arith.constant 0 : index
    %c0_16 = arith.constant 0 : index
    %29 = vector.load %arg6[%c0_15, %c0_16] : memref<96x384xbf16, #tpu.memory_space<vmem>>, vector<96x384xbf16>
    %cst_17 = arith.constant dense<0.000000e+00> : vector<16x384xf32>
    %30 = tpu.matmul %28, %29, %cst_17 {dimension_numbers = #tpu.dot_dimension_numbers<[1], [0], [0], [1], [0, 0, 1, 1], [], []>} : vector<16x96xbf16>, vector<96x384xbf16>, vector<16x384xf32> -> vector<16x384xf32>
    %c0_18 = arith.constant 0 : index
    %c0_19 = arith.constant 0 : index
    %31 = vector.load %arg7[%c0_18, %c0_19] : memref<1x384xf32, #tpu.memory_space<vmem>>, vector<1x384xf32>
    %32 = vector.broadcast %31 : vector<1x384xf32> to vector<16x384xf32>
    %33 = arith.addf %30, %32 : vector<16x384xf32>
    %34 = vector.extract_strided_slice %33 {offsets = [0, 0], sizes = [16, 128], strides = [1, 1]} : vector<16x384xf32> to vector<16x128xf32>
    %35 = vector.shape_cast %34 : vector<16x128xf32> to vector<2x8x128xf32>
    %36 = vector.extract_strided_slice %33 {offsets = [0, 128], sizes = [16, 128], strides = [1, 1]} : vector<16x384xf32> to vector<16x128xf32>
    %37 = vector.shape_cast %36 : vector<16x128xf32> to vector<2x8x128xf32>
    %38 = vector.extract_strided_slice %33 {offsets = [0, 256], sizes = [16, 128], strides = [1, 1]} : vector<16x384xf32> to vector<16x128xf32>
    %39 = vector.shape_cast %38 : vector<16x128xf32> to vector<2x8x128xf32>
    %40 = vector.shape_cast %35 : vector<2x8x128xf32> to vector<2x8x1x128xf32>
    %41 = vector.shape_cast %37 : vector<2x8x128xf32> to vector<2x1x8x128xf32>
    %42 = vector.broadcast %40 : vector<2x8x1x128xf32> to vector<2x8x8x128xf32>
    %43 = vector.broadcast %41 : vector<2x1x8x128xf32> to vector<2x8x8x128xf32>
    %44 = arith.mulf %42, %43 : vector<2x8x8x128xf32>
    %45 = vector.shape_cast %44 : vector<2x8x8x128xf32> to vector<128x128xf32>
    %46 = arith.truncf %45 : vector<128x128xf32> to vector<128x128xbf16>
    %cst_20 = arith.constant dense<0.000000e+00> : vector<128x12xf32>
    %47 = tpu.matmul %46, %0, %cst_20 {dimension_numbers = #tpu.dot_dimension_numbers<[1], [0], [0], [1], [0, 0, 1, 1], [], []>} : vector<128x128xbf16>, vector<128x12xbf16>, vector<128x12xf32> -> vector<128x12xf32>
    %cst_21 = arith.constant 0.353553385 : f32
    %48 = vector.broadcast %cst_21 : f32 to vector<128x12xf32>
    %49 = arith.mulf %47, %48 : vector<128x12xf32>
    %50 = vector.shape_cast %49 : vector<128x12xf32> to vector<2x8x8x12xf32>
    %cst_22 = arith.constant dense<0xFF800000> : vector<2x8x12xf32>
    %51 = vector.multi_reduction <maximumf>, %50, %cst_22 [2] : vector<2x8x8x12xf32> to vector<2x8x12xf32>
    %52 = vector.shape_cast %51 : vector<2x8x12xf32> to vector<2x8x1x12xf32>
    %53 = vector.broadcast %52 : vector<2x8x1x12xf32> to vector<2x8x8x12xf32>
    %54 = arith.subf %50, %53 : vector<2x8x8x12xf32>
    %55 = math.exp %54 : vector<2x8x8x12xf32>
    %cst_23 = arith.constant dense<0.000000e+00> : vector<2x8x12xf32>
    %56 = vector.multi_reduction <add>, %55, %cst_23 [2] : vector<2x8x8x12xf32> to vector<2x8x12xf32>
    %57 = vector.shape_cast %56 : vector<2x8x12xf32> to vector<2x8x1x12xf32>
    %58 = tpu.reciprocal %57 {approx = true} : vector<2x8x1x12xf32> -> vector<2x8x1x12xf32>
    %59 = vector.broadcast %58 : vector<2x8x1x12xf32> to vector<2x8x8x12xf32>
    %60 = arith.mulf %55, %59 : vector<2x8x8x12xf32>
    %61 = vector.shape_cast %60 : vector<2x8x8x12xf32> to vector<128x12xf32>
    %62 = arith.truncf %61 : vector<128x12xf32> to vector<128x12xbf16>
    %cst_24 = arith.constant dense<0.000000e+00> : vector<128x128xf32>
    %63 = tpu.matmul %62, %1, %cst_24 {dimension_numbers = #tpu.dot_dimension_numbers<[1], [0], [0], [1], [0, 0, 1, 1], [], []>} : vector<128x12xbf16>, vector<12x128xbf16>, vector<128x128xf32> -> vector<128x128xf32>
    %64 = vector.shape_cast %63 : vector<128x128xf32> to vector<2x8x8x128xf32>
    %65 = vector.shape_cast %39 : vector<2x8x128xf32> to vector<2x1x8x128xf32>
    %66 = vector.broadcast %65 : vector<2x1x8x128xf32> to vector<2x8x8x128xf32>
    %67 = arith.mulf %64, %66 : vector<2x8x8x128xf32>
    %cst_25 = arith.constant dense<0.000000e+00> : vector<2x8x128xf32>
    %68 = vector.multi_reduction <add>, %67, %cst_25 [2] : vector<2x8x8x128xf32> to vector<2x8x128xf32>
    %69 = vector.shape_cast %68 : vector<2x8x128xf32> to vector<16x128xf32>
    %70 = arith.truncf %69 : vector<16x128xf32> to vector<16x128xbf16>
    %c0_26 = arith.constant 0 : index
    %c0_27 = arith.constant 0 : index
    %71 = vector.load %arg8[%c0_26, %c0_27] : memref<128x96xbf16, #tpu.memory_space<vmem>>, vector<128x96xbf16>
    %cst_28 = arith.constant dense<0.000000e+00> : vector<16x96xf32>
    %72 = tpu.matmul %70, %71, %cst_28 {dimension_numbers = #tpu.dot_dimension_numbers<[1], [0], [0], [1], [0, 0, 1, 1], [], []>} : vector<16x128xbf16>, vector<128x96xbf16>, vector<16x96xf32> -> vector<16x96xf32>
    %c0_29 = arith.constant 0 : index
    %c0_30 = arith.constant 0 : index
    %73 = vector.load %arg9[%c0_29, %c0_30] : memref<1x96xf32, #tpu.memory_space<vmem>>, vector<1x96xf32>
    %74 = vector.broadcast %73 : vector<1x96xf32> to vector<16x96xf32>
    %75 = arith.addf %72, %74 : vector<16x96xf32>
    %76 = arith.addf %27, %75 : vector<16x96xf32>
    %cst_31 = arith.constant dense<0.000000e+00> : vector<16xf32>
    %77 = vector.multi_reduction <add>, %76, %cst_31 [1] : vector<16x96xf32> to vector<16xf32>
    %78 = vector.shape_cast %77 : vector<16xf32> to vector<16x1xf32>
    %cst_32 = arith.constant 9.600000e+01 : f32
    %79 = vector.broadcast %cst_32 : f32 to vector<16x1xf32>
    %80 = arith.divf %78, %79 : vector<16x1xf32>
    %81 = vector.broadcast %80 : vector<16x1xf32> to vector<16x96xf32>
    %82 = arith.subf %76, %81 : vector<16x96xf32>
    %83 = arith.mulf %82, %82 : vector<16x96xf32>
    %cst_33 = arith.constant dense<0.000000e+00> : vector<16xf32>
    %84 = vector.multi_reduction <add>, %83, %cst_33 [1] : vector<16x96xf32> to vector<16xf32>
    %85 = vector.shape_cast %84 : vector<16xf32> to vector<16x1xf32>
    %cst_34 = arith.constant 9.600000e+01 : f32
    %86 = vector.broadcast %cst_34 : f32 to vector<16x1xf32>
    %87 = arith.divf %85, %86 : vector<16x1xf32>
    %cst_35 = arith.constant 9.99999974E-6 : f32
    %88 = vector.broadcast %cst_35 : f32 to vector<16x1xf32>
    %89 = arith.addf %87, %88 : vector<16x1xf32>
    %90 = math.rsqrt %89 : vector<16x1xf32>
    %91 = vector.broadcast %90 : vector<16x1xf32> to vector<16x96xf32>
    %92 = arith.mulf %82, %91 : vector<16x96xf32>
    %c0_36 = arith.constant 0 : index
    %c0_37 = arith.constant 0 : index
    %93 = vector.load %arg10[%c0_36, %c0_37] : memref<1x96xf32, #tpu.memory_space<vmem>>, vector<1x96xf32>
    %94 = vector.broadcast %93 : vector<1x96xf32> to vector<16x96xf32>
    %95 = arith.mulf %92, %94 : vector<16x96xf32>
    %c0_38 = arith.constant 0 : index
    %c0_39 = arith.constant 0 : index
    %96 = vector.load %arg11[%c0_38, %c0_39] : memref<1x96xf32, #tpu.memory_space<vmem>>, vector<1x96xf32>
    %97 = vector.broadcast %96 : vector<1x96xf32> to vector<16x96xf32>
    %98 = arith.addf %95, %97 : vector<16x96xf32>
    %99 = arith.truncf %98 : vector<16x96xf32> to vector<16x96xbf16>
    %c0_40 = arith.constant 0 : index
    %c0_41 = arith.constant 0 : index
    %100 = vector.load %arg12[%c0_40, %c0_41] : memref<96x2048xbf16, #tpu.memory_space<vmem>>, vector<96x2048xbf16>
    %cst_42 = arith.constant dense<0.000000e+00> : vector<16x2048xf32>
    %101 = tpu.matmul %99, %100, %cst_42 {dimension_numbers = #tpu.dot_dimension_numbers<[1], [0], [0], [1], [0, 0, 1, 1], [], []>} : vector<16x96xbf16>, vector<96x2048xbf16>, vector<16x2048xf32> -> vector<16x2048xf32>
    %c0_43 = arith.constant 0 : index
    %c0_44 = arith.constant 0 : index
    %102 = vector.load %arg13[%c0_43, %c0_44] : memref<1x2048xf32, #tpu.memory_space<vmem>>, vector<1x2048xf32>
    %103 = vector.broadcast %102 : vector<1x2048xf32> to vector<16x2048xf32>
    %104 = arith.addf %101, %103 : vector<16x2048xf32>
    %cst_45 = arith.constant 0.000000e+00 : f32
    %105 = vector.broadcast %cst_45 : f32 to vector<16x2048xf32>
    %106 = arith.maximumf %104, %105 : vector<16x2048xf32>
    %107 = arith.truncf %106 : vector<16x2048xf32> to vector<16x2048xbf16>
    %c0_46 = arith.constant 0 : index
    %c0_47 = arith.constant 0 : index
    %108 = vector.load %arg14[%c0_46, %c0_47] : memref<2048x96xbf16, #tpu.memory_space<vmem>>, vector<2048x96xbf16>
    %cst_48 = arith.constant dense<0.000000e+00> : vector<16x96xf32>
    %109 = tpu.matmul %107, %108, %cst_48 {dimension_numbers = #tpu.dot_dimension_numbers<[1], [0], [0], [1], [0, 0, 1, 1], [], []>} : vector<16x2048xbf16>, vector<2048x96xbf16>, vector<16x96xf32> -> vector<16x96xf32>
    %c0_49 = arith.constant 0 : index
    %c0_50 = arith.constant 0 : index
    %110 = vector.load %arg15[%c0_49, %c0_50] : memref<1x96xf32, #tpu.memory_space<vmem>>, vector<1x96xf32>
    %111 = vector.broadcast %110 : vector<1x96xf32> to vector<16x96xf32>
    %112 = arith.addf %109, %111 : vector<16x96xf32>
    %113 = arith.addf %98, %112 : vector<16x96xf32>
    %cst_51 = arith.constant dense<0.000000e+00> : vector<16xf32>
    %114 = vector.multi_reduction <add>, %113, %cst_51 [1] : vector<16x96xf32> to vector<16xf32>
    %115 = vector.shape_cast %114 : vector<16xf32> to vector<16x1xf32>
    %cst_52 = arith.constant 9.600000e+01 : f32
    %116 = vector.broadcast %cst_52 : f32 to vector<16x1xf32>
    %117 = arith.divf %115, %116 : vector<16x1xf32>
    %118 = vector.broadcast %117 : vector<16x1xf32> to vector<16x96xf32>
    %119 = arith.subf %113, %118 : vector<16x96xf32>
    %120 = arith.mulf %119, %119 : vector<16x96xf32>
    %cst_53 = arith.constant dense<0.000000e+00> : vector<16xf32>
    %121 = vector.multi_reduction <add>, %120, %cst_53 [1] : vector<16x96xf32> to vector<16xf32>
    %122 = vector.shape_cast %121 : vector<16xf32> to vector<16x1xf32>
    %cst_54 = arith.constant 9.600000e+01 : f32
    %123 = vector.broadcast %cst_54 : f32 to vector<16x1xf32>
    %124 = arith.divf %122, %123 : vector<16x1xf32>
    %cst_55 = arith.constant 9.99999974E-6 : f32
    %125 = vector.broadcast %cst_55 : f32 to vector<16x1xf32>
    %126 = arith.addf %124, %125 : vector<16x1xf32>
    %127 = math.rsqrt %126 : vector<16x1xf32>
    %128 = vector.broadcast %127 : vector<16x1xf32> to vector<16x96xf32>
    %129 = arith.mulf %119, %128 : vector<16x96xf32>
    %c0_56 = arith.constant 0 : index
    %c0_57 = arith.constant 0 : index
    %130 = vector.load %arg16[%c0_56, %c0_57] : memref<1x96xf32, #tpu.memory_space<vmem>>, vector<1x96xf32>
    %131 = vector.broadcast %130 : vector<1x96xf32> to vector<16x96xf32>
    %132 = arith.mulf %129, %131 : vector<16x96xf32>
    %c0_58 = arith.constant 0 : index
    %c0_59 = arith.constant 0 : index
    %133 = vector.load %arg17[%c0_58, %c0_59] : memref<1x96xf32, #tpu.memory_space<vmem>>, vector<1x96xf32>
    %134 = vector.broadcast %133 : vector<1x96xf32> to vector<16x96xf32>
    %135 = arith.addf %132, %134 : vector<16x96xf32>
    %136 = arith.truncf %135 : vector<16x96xf32> to vector<16x96xbf16>
    %c0_60 = arith.constant 0 : index
    %c0_61 = arith.constant 0 : index
    %137 = vector.load %arg18[%c0_60, %c0_61] : memref<96x384xbf16, #tpu.memory_space<vmem>>, vector<96x384xbf16>
    %cst_62 = arith.constant dense<0.000000e+00> : vector<16x384xf32>
    %138 = tpu.matmul %136, %137, %cst_62 {dimension_numbers = #tpu.dot_dimension_numbers<[1], [0], [0], [1], [0, 0, 1, 1], [], []>} : vector<16x96xbf16>, vector<96x384xbf16>, vector<16x384xf32> -> vector<16x384xf32>
    %c0_63 = arith.constant 0 : index
    %c0_64 = arith.constant 0 : index
    %139 = vector.load %arg19[%c0_63, %c0_64] : memref<1x384xf32, #tpu.memory_space<vmem>>, vector<1x384xf32>
    %140 = vector.broadcast %139 : vector<1x384xf32> to vector<16x384xf32>
    %141 = arith.addf %138, %140 : vector<16x384xf32>
    %142 = vector.extract_strided_slice %141 {offsets = [0, 0], sizes = [16, 128], strides = [1, 1]} : vector<16x384xf32> to vector<16x128xf32>
    %143 = vector.shape_cast %142 : vector<16x128xf32> to vector<2x8x128xf32>
    %144 = vector.extract_strided_slice %141 {offsets = [0, 128], sizes = [16, 128], strides = [1, 1]} : vector<16x384xf32> to vector<16x128xf32>
    %145 = vector.shape_cast %144 : vector<16x128xf32> to vector<2x8x128xf32>
    %146 = vector.extract_strided_slice %141 {offsets = [0, 256], sizes = [16, 128], strides = [1, 1]} : vector<16x384xf32> to vector<16x128xf32>
    %147 = vector.shape_cast %146 : vector<16x128xf32> to vector<2x8x128xf32>
    %148 = vector.shape_cast %143 : vector<2x8x128xf32> to vector<2x8x1x128xf32>
    %149 = vector.shape_cast %145 : vector<2x8x128xf32> to vector<2x1x8x128xf32>
    %150 = vector.broadcast %148 : vector<2x8x1x128xf32> to vector<2x8x8x128xf32>
    %151 = vector.broadcast %149 : vector<2x1x8x128xf32> to vector<2x8x8x128xf32>
    %152 = arith.mulf %150, %151 : vector<2x8x8x128xf32>
    %153 = vector.shape_cast %152 : vector<2x8x8x128xf32> to vector<128x128xf32>
    %154 = arith.truncf %153 : vector<128x128xf32> to vector<128x128xbf16>
    %cst_65 = arith.constant dense<0.000000e+00> : vector<128x12xf32>
    %155 = tpu.matmul %154, %0, %cst_65 {dimension_numbers = #tpu.dot_dimension_numbers<[1], [0], [0], [1], [0, 0, 1, 1], [], []>} : vector<128x128xbf16>, vector<128x12xbf16>, vector<128x12xf32> -> vector<128x12xf32>
    %cst_66 = arith.constant 0.353553385 : f32
    %156 = vector.broadcast %cst_66 : f32 to vector<128x12xf32>
    %157 = arith.mulf %155, %156 : vector<128x12xf32>
    %158 = vector.shape_cast %157 : vector<128x12xf32> to vector<2x8x8x12xf32>
    %cst_67 = arith.constant dense<0xFF800000> : vector<2x8x12xf32>
    %159 = vector.multi_reduction <maximumf>, %158, %cst_67 [2] : vector<2x8x8x12xf32> to vector<2x8x12xf32>
    %160 = vector.shape_cast %159 : vector<2x8x12xf32> to vector<2x8x1x12xf32>
    %161 = vector.broadcast %160 : vector<2x8x1x12xf32> to vector<2x8x8x12xf32>
    %162 = arith.subf %158, %161 : vector<2x8x8x12xf32>
    %163 = math.exp %162 : vector<2x8x8x12xf32>
    %cst_68 = arith.constant dense<0.000000e+00> : vector<2x8x12xf32>
    %164 = vector.multi_reduction <add>, %163, %cst_68 [2] : vector<2x8x8x12xf32> to vector<2x8x12xf32>
    %165 = vector.shape_cast %164 : vector<2x8x12xf32> to vector<2x8x1x12xf32>
    %166 = tpu.reciprocal %165 {approx = true} : vector<2x8x1x12xf32> -> vector<2x8x1x12xf32>
    %167 = vector.broadcast %166 : vector<2x8x1x12xf32> to vector<2x8x8x12xf32>
    %168 = arith.mulf %163, %167 : vector<2x8x8x12xf32>
    %169 = vector.shape_cast %168 : vector<2x8x8x12xf32> to vector<128x12xf32>
    %170 = arith.truncf %169 : vector<128x12xf32> to vector<128x12xbf16>
    %cst_69 = arith.constant dense<0.000000e+00> : vector<128x128xf32>
    %171 = tpu.matmul %170, %1, %cst_69 {dimension_numbers = #tpu.dot_dimension_numbers<[1], [0], [0], [1], [0, 0, 1, 1], [], []>} : vector<128x12xbf16>, vector<12x128xbf16>, vector<128x128xf32> -> vector<128x128xf32>
    %172 = vector.shape_cast %171 : vector<128x128xf32> to vector<2x8x8x128xf32>
    %173 = vector.shape_cast %147 : vector<2x8x128xf32> to vector<2x1x8x128xf32>
    %174 = vector.broadcast %173 : vector<2x1x8x128xf32> to vector<2x8x8x128xf32>
    %175 = arith.mulf %172, %174 : vector<2x8x8x128xf32>
    %cst_70 = arith.constant dense<0.000000e+00> : vector<2x8x128xf32>
    %176 = vector.multi_reduction <add>, %175, %cst_70 [2] : vector<2x8x8x128xf32> to vector<2x8x128xf32>
    %177 = vector.shape_cast %176 : vector<2x8x128xf32> to vector<16x128xf32>
    %178 = arith.truncf %177 : vector<16x128xf32> to vector<16x128xbf16>
    %c0_71 = arith.constant 0 : index
    %c0_72 = arith.constant 0 : index
    %179 = vector.load %arg20[%c0_71, %c0_72] : memref<128x96xbf16, #tpu.memory_space<vmem>>, vector<128x96xbf16>
    %cst_73 = arith.constant dense<0.000000e+00> : vector<16x96xf32>
    %180 = tpu.matmul %178, %179, %cst_73 {dimension_numbers = #tpu.dot_dimension_numbers<[1], [0], [0], [1], [0, 0, 1, 1], [], []>} : vector<16x128xbf16>, vector<128x96xbf16>, vector<16x96xf32> -> vector<16x96xf32>
    %c0_74 = arith.constant 0 : index
    %c0_75 = arith.constant 0 : index
    %181 = vector.load %arg21[%c0_74, %c0_75] : memref<1x96xf32, #tpu.memory_space<vmem>>, vector<1x96xf32>
    %182 = vector.broadcast %181 : vector<1x96xf32> to vector<16x96xf32>
    %183 = arith.addf %180, %182 : vector<16x96xf32>
    %184 = arith.addf %135, %183 : vector<16x96xf32>
    %cst_76 = arith.constant dense<0.000000e+00> : vector<16xf32>
    %185 = vector.multi_reduction <add>, %184, %cst_76 [1] : vector<16x96xf32> to vector<16xf32>
    %186 = vector.shape_cast %185 : vector<16xf32> to vector<16x1xf32>
    %cst_77 = arith.constant 9.600000e+01 : f32
    %187 = vector.broadcast %cst_77 : f32 to vector<16x1xf32>
    %188 = arith.divf %186, %187 : vector<16x1xf32>
    %189 = vector.broadcast %188 : vector<16x1xf32> to vector<16x96xf32>
    %190 = arith.subf %184, %189 : vector<16x96xf32>
    %191 = arith.mulf %190, %190 : vector<16x96xf32>
    %cst_78 = arith.constant dense<0.000000e+00> : vector<16xf32>
    %192 = vector.multi_reduction <add>, %191, %cst_78 [1] : vector<16x96xf32> to vector<16xf32>
    %193 = vector.shape_cast %192 : vector<16xf32> to vector<16x1xf32>
    %cst_79 = arith.constant 9.600000e+01 : f32
    %194 = vector.broadcast %cst_79 : f32 to vector<16x1xf32>
    %195 = arith.divf %193, %194 : vector<16x1xf32>
    %cst_80 = arith.constant 9.99999974E-6 : f32
    %196 = vector.broadcast %cst_80 : f32 to vector<16x1xf32>
    %197 = arith.addf %195, %196 : vector<16x1xf32>
    %198 = math.rsqrt %197 : vector<16x1xf32>
    %199 = vector.broadcast %198 : vector<16x1xf32> to vector<16x96xf32>
    %200 = arith.mulf %190, %199 : vector<16x96xf32>
    %c0_81 = arith.constant 0 : index
    %c0_82 = arith.constant 0 : index
    %201 = vector.load %arg22[%c0_81, %c0_82] : memref<1x96xf32, #tpu.memory_space<vmem>>, vector<1x96xf32>
    %202 = vector.broadcast %201 : vector<1x96xf32> to vector<16x96xf32>
    %203 = arith.mulf %200, %202 : vector<16x96xf32>
    %c0_83 = arith.constant 0 : index
    %c0_84 = arith.constant 0 : index
    %204 = vector.load %arg23[%c0_83, %c0_84] : memref<1x96xf32, #tpu.memory_space<vmem>>, vector<1x96xf32>
    %205 = vector.broadcast %204 : vector<1x96xf32> to vector<16x96xf32>
    %206 = arith.addf %203, %205 : vector<16x96xf32>
    %207 = arith.truncf %206 : vector<16x96xf32> to vector<16x96xbf16>
    %c0_85 = arith.constant 0 : index
    %c0_86 = arith.constant 0 : index
    %208 = vector.load %arg24[%c0_85, %c0_86] : memref<96x2048xbf16, #tpu.memory_space<vmem>>, vector<96x2048xbf16>
    %cst_87 = arith.constant dense<0.000000e+00> : vector<16x2048xf32>
    %209 = tpu.matmul %207, %208, %cst_87 {dimension_numbers = #tpu.dot_dimension_numbers<[1], [0], [0], [1], [0, 0, 1, 1], [], []>} : vector<16x96xbf16>, vector<96x2048xbf16>, vector<16x2048xf32> -> vector<16x2048xf32>
    %c0_88 = arith.constant 0 : index
    %c0_89 = arith.constant 0 : index
    %210 = vector.load %arg25[%c0_88, %c0_89] : memref<1x2048xf32, #tpu.memory_space<vmem>>, vector<1x2048xf32>
    %211 = vector.broadcast %210 : vector<1x2048xf32> to vector<16x2048xf32>
    %212 = arith.addf %209, %211 : vector<16x2048xf32>
    %cst_90 = arith.constant 0.000000e+00 : f32
    %213 = vector.broadcast %cst_90 : f32 to vector<16x2048xf32>
    %214 = arith.maximumf %212, %213 : vector<16x2048xf32>
    %215 = arith.truncf %214 : vector<16x2048xf32> to vector<16x2048xbf16>
    %c0_91 = arith.constant 0 : index
    %c0_92 = arith.constant 0 : index
    %216 = vector.load %arg26[%c0_91, %c0_92] : memref<2048x96xbf16, #tpu.memory_space<vmem>>, vector<2048x96xbf16>
    %cst_93 = arith.constant dense<0.000000e+00> : vector<16x96xf32>
    %217 = tpu.matmul %215, %216, %cst_93 {dimension_numbers = #tpu.dot_dimension_numbers<[1], [0], [0], [1], [0, 0, 1, 1], [], []>} : vector<16x2048xbf16>, vector<2048x96xbf16>, vector<16x96xf32> -> vector<16x96xf32>
    %c0_94 = arith.constant 0 : index
    %c0_95 = arith.constant 0 : index
    %218 = vector.load %arg27[%c0_94, %c0_95] : memref<1x96xf32, #tpu.memory_space<vmem>>, vector<1x96xf32>
    %219 = vector.broadcast %218 : vector<1x96xf32> to vector<16x96xf32>
    %220 = arith.addf %217, %219 : vector<16x96xf32>
    %221 = arith.addf %206, %220 : vector<16x96xf32>
    %cst_96 = arith.constant dense<0.000000e+00> : vector<16xf32>
    %222 = vector.multi_reduction <add>, %221, %cst_96 [1] : vector<16x96xf32> to vector<16xf32>
    %223 = vector.shape_cast %222 : vector<16xf32> to vector<16x1xf32>
    %cst_97 = arith.constant 9.600000e+01 : f32
    %224 = vector.broadcast %cst_97 : f32 to vector<16x1xf32>
    %225 = arith.divf %223, %224 : vector<16x1xf32>
    %226 = vector.broadcast %225 : vector<16x1xf32> to vector<16x96xf32>
    %227 = arith.subf %221, %226 : vector<16x96xf32>
    %228 = arith.mulf %227, %227 : vector<16x96xf32>
    %cst_98 = arith.constant dense<0.000000e+00> : vector<16xf32>
    %229 = vector.multi_reduction <add>, %228, %cst_98 [1] : vector<16x96xf32> to vector<16xf32>
    %230 = vector.shape_cast %229 : vector<16xf32> to vector<16x1xf32>
    %cst_99 = arith.constant 9.600000e+01 : f32
    %231 = vector.broadcast %cst_99 : f32 to vector<16x1xf32>
    %232 = arith.divf %230, %231 : vector<16x1xf32>
    %cst_100 = arith.constant 9.99999974E-6 : f32
    %233 = vector.broadcast %cst_100 : f32 to vector<16x1xf32>
    %234 = arith.addf %232, %233 : vector<16x1xf32>
    %235 = math.rsqrt %234 : vector<16x1xf32>
    %236 = vector.broadcast %235 : vector<16x1xf32> to vector<16x96xf32>
    %237 = arith.mulf %227, %236 : vector<16x96xf32>
    %c0_101 = arith.constant 0 : index
    %c0_102 = arith.constant 0 : index
    %238 = vector.load %arg28[%c0_101, %c0_102] : memref<1x96xf32, #tpu.memory_space<vmem>>, vector<1x96xf32>
    %239 = vector.broadcast %238 : vector<1x96xf32> to vector<16x96xf32>
    %240 = arith.mulf %237, %239 : vector<16x96xf32>
    %c0_103 = arith.constant 0 : index
    %c0_104 = arith.constant 0 : index
    %241 = vector.load %arg29[%c0_103, %c0_104] : memref<1x96xf32, #tpu.memory_space<vmem>>, vector<1x96xf32>
    %242 = vector.broadcast %241 : vector<1x96xf32> to vector<16x96xf32>
    %243 = arith.addf %240, %242 : vector<16x96xf32>
    %244 = arith.truncf %243 : vector<16x96xf32> to vector<16x96xbf16>
    %c0_105 = arith.constant 0 : index
    %c0_106 = arith.constant 0 : index
    %245 = vector.load %arg30[%c0_105, %c0_106] : memref<96x8xbf16, #tpu.memory_space<vmem>>, vector<96x8xbf16>
    %cst_107 = arith.constant dense<0.000000e+00> : vector<16x8xf32>
    %246 = tpu.matmul %244, %245, %cst_107 {dimension_numbers = #tpu.dot_dimension_numbers<[1], [0], [0], [1], [0, 0, 1, 1], [], []>} : vector<16x96xbf16>, vector<96x8xbf16>, vector<16x8xf32> -> vector<16x8xf32>
    %c0_108 = arith.constant 0 : index
    %c0_109 = arith.constant 0 : index
    %247 = vector.load %arg31[%c0_108, %c0_109] : memref<1x8xf32, #tpu.memory_space<vmem>>, vector<1x8xf32>
    %248 = vector.broadcast %247 : vector<1x8xf32> to vector<16x8xf32>
    %249 = arith.addf %246, %248 : vector<16x8xf32>
    %250 = vector.broadcast %19 : vector<16x1xf32> to vector<16x8xf32>
    %251 = arith.mulf %249, %250 : vector<16x8xf32>
    %252 = vector.broadcast %6 : vector<16x1xf32> to vector<16x8xf32>
    %253 = arith.addf %251, %252 : vector<16x8xf32>
    %c0_110 = arith.constant 0 : index
    %c0_111 = arith.constant 0 : index
    %254 = vector.load %arg32[%c0_110, %c0_111] : memref<16x8xf32, #tpu.memory_space<vmem>>, vector<16x8xf32>
    tpu.vector_store %arg32[%c0_110, %c0_111], %253 {strides = array<i32>} : memref<16x8xf32, #tpu.memory_space<vmem>>, vector<16x8xf32>,
    return
  }
  func.func @transform_0(%arg0: i32) -> (i32, i32) {
    %c0_i32 = arith.constant 0 : i32
    %c0_i32_0 = arith.constant 0 : i32
    return %arg0, %c0_i32 : i32, i32
  }
  func.func @transform_1(%arg0: i32) -> (i32, i32) {
    %c0_i32 = arith.constant 0 : i32
    %c0_i32_0 = arith.constant 0 : i32
    %c0_i32_1 = arith.constant 0 : i32
    return %c0_i32, %c0_i32_0 : i32, i32
  }
  func.func @transform_2(%arg0: i32) -> (i32, i32) {
    %c0_i32 = arith.constant 0 : i32
    %c0_i32_0 = arith.constant 0 : i32
    %c0_i32_1 = arith.constant 0 : i32
    return %c0_i32, %c0_i32_0 : i32, i32
  }
  func.func @transform_3(%arg0: i32) -> (i32, i32) {
    %c0_i32 = arith.constant 0 : i32
    %c0_i32_0 = arith.constant 0 : i32
    %c0_i32_1 = arith.constant 0 : i32
    return %c0_i32, %c0_i32_0 : i32, i32
  }
  func.func @transform_4(%arg0: i32) -> (i32, i32) {
    %c0_i32 = arith.constant 0 : i32
    %c0_i32_0 = arith.constant 0 : i32
    %c0_i32_1 = arith.constant 0 : i32
    return %c0_i32, %c0_i32_0 : i32, i32
  }
  func.func @transform_5(%arg0: i32) -> (i32, i32) {
    %c0_i32 = arith.constant 0 : i32
    %c0_i32_0 = arith.constant 0 : i32
    %c0_i32_1 = arith.constant 0 : i32
    return %c0_i32, %c0_i32_0 : i32, i32
  }
  func.func @transform_6(%arg0: i32) -> (i32, i32) {
    %c0_i32 = arith.constant 0 : i32
    %c0_i32_0 = arith.constant 0 : i32
    %c0_i32_1 = arith.constant 0 : i32
    return %c0_i32, %c0_i32_0 : i32, i32
  }
  func.func @transform_7(%arg0: i32) -> (i32, i32) {
    %c0_i32 = arith.constant 0 : i32
    %c0_i32_0 = arith.constant 0 : i32
    %c0_i32_1 = arith.constant 0 : i32
    return %c0_i32, %c0_i32_0 : i32, i32
  }
  func.func @transform_8(%arg0: i32) -> (i32, i32) {
    %c0_i32 = arith.constant 0 : i32
    %c0_i32_0 = arith.constant 0 : i32
    %c0_i32_1 = arith.constant 0 : i32
    return %c0_i32, %c0_i32_0 : i32, i32
  }
  func.func @transform_9(%arg0: i32) -> (i32, i32) {
    %c0_i32 = arith.constant 0 : i32
    %c0_i32_0 = arith.constant 0 : i32
    %c0_i32_1 = arith.constant 0 : i32
    return %c0_i32, %c0_i32_0 : i32, i32
  }
  func.func @transform_10(%arg0: i32) -> (i32, i32) {
    %c0_i32 = arith.constant 0 : i32
    %c0_i32_0 = arith.constant 0 : i32
    %c0_i32_1 = arith.constant 0 : i32
    return %c0_i32, %c0_i32_0 : i32, i32
  }
  func.func @transform_11(%arg0: i32) -> (i32, i32) {
    %c0_i32 = arith.constant 0 : i32
    %c0_i32_0 = arith.constant 0 : i32
    %c0_i32_1 = arith.constant 0 : i32
    return %c0_i32, %c0_i32_0 : i32, i32
  }
  func.func @transform_12(%arg0: i32) -> (i32, i32) {
    %c0_i32 = arith.constant 0 : i32
    %c0_i32_0 = arith.constant 0 : i32
    %c0_i32_1 = arith.constant 0 : i32
    return %c0_i32, %c0_i32_0 : i32, i32
  }
  func.func @transform_13(%arg0: i32) -> (i32, i32) {
    %c0_i32 = arith.constant 0 : i32
    %c0_i32_0 = arith.constant 0 : i32
    %c0_i32_1 = arith.constant 0 : i32
    return %c0_i32, %c0_i32_0 : i32, i32
  }
  func.func @transform_14(%arg0: i32) -> (i32, i32) {
    %c0_i32 = arith.constant 0 : i32
    %c0_i32_0 = arith.constant 0 : i32
    %c0_i32_1 = arith.constant 0 : i32
    return %c0_i32, %c0_i32_0 : i32, i32
  }
  func.func @transform_15(%arg0: i32) -> (i32, i32) {
    %c0_i32 = arith.constant 0 : i32
    %c0_i32_0 = arith.constant 0 : i32
    %c0_i32_1 = arith.constant 0 : i32
    return %c0_i32, %c0_i32_0 : i32, i32
  }
  func.func @transform_16(%arg0: i32) -> (i32, i32) {
    %c0_i32 = arith.constant 0 : i32
    %c0_i32_0 = arith.constant 0 : i32
    %c0_i32_1 = arith.constant 0 : i32
    return %c0_i32, %c0_i32_0 : i32, i32
  }
  func.func @transform_17(%arg0: i32) -> (i32, i32) {
    %c0_i32 = arith.constant 0 : i32
    %c0_i32_0 = arith.constant 0 : i32
    %c0_i32_1 = arith.constant 0 : i32
    return %c0_i32, %c0_i32_0 : i32, i32
  }
  func.func @transform_18(%arg0: i32) -> (i32, i32) {
    %c0_i32 = arith.constant 0 : i32
    %c0_i32_0 = arith.constant 0 : i32
    %c0_i32_1 = arith.constant 0 : i32
    return %c0_i32, %c0_i32_0 : i32, i32
  }
  func.func @transform_19(%arg0: i32) -> (i32, i32) {
    %c0_i32 = arith.constant 0 : i32
    %c0_i32_0 = arith.constant 0 : i32
    %c0_i32_1 = arith.constant 0 : i32
    return %c0_i32, %c0_i32_0 : i32, i32
  }
  func.func @transform_20(%arg0: i32) -> (i32, i32) {
    %c0_i32 = arith.constant 0 : i32
    %c0_i32_0 = arith.constant 0 : i32
    %c0_i32_1 = arith.constant 0 : i32
    return %c0_i32, %c0_i32_0 : i32, i32
  }
  func.func @transform_21(%arg0: i32) -> (i32, i32) {
    %c0_i32 = arith.constant 0 : i32
    %c0_i32_0 = arith.constant 0 : i32
    %c0_i32_1 = arith.constant 0 : i32
    return %c0_i32, %c0_i32_0 : i32, i32
  }
  func.func @transform_22(%arg0: i32) -> (i32, i32) {
    %c0_i32 = arith.constant 0 : i32
    %c0_i32_0 = arith.constant 0 : i32
    %c0_i32_1 = arith.constant 0 : i32
    return %c0_i32, %c0_i32_0 : i32, i32
  }
  func.func @transform_23(%arg0: i32) -> (i32, i32) {
    %c0_i32 = arith.constant 0 : i32
    %c0_i32_0 = arith.constant 0 : i32
    %c0_i32_1 = arith.constant 0 : i32
    return %c0_i32, %c0_i32_0 : i32, i32
  }
  func.func @transform_24(%arg0: i32) -> (i32, i32) {
    %c0_i32 = arith.constant 0 : i32
    %c0_i32_0 = arith.constant 0 : i32
    %c0_i32_1 = arith.constant 0 : i32
    return %c0_i32, %c0_i32_0 : i32, i32
  }
  func.func @transform_25(%arg0: i32) -> (i32, i32) {
    %c0_i32 = arith.constant 0 : i32
    %c0_i32_0 = arith.constant 0 : i32
    %c0_i32_1 = arith.constant 0 : i32
    return %c0_i32, %c0_i32_0 : i32, i32
  }
  func.func @transform_26(%arg0: i32) -> (i32, i32) {
    %c0_i32 = arith.constant 0 : i32
    %c0_i32_0 = arith.constant 0 : i32
    %c0_i32_1 = arith.constant 0 : i32
    return %c0_i32, %c0_i32_0 : i32, i32
  }
  func.func @transform_27(%arg0: i32) -> (i32, i32) {
    %c0_i32 = arith.constant 0 : i32
    %c0_i32_0 = arith.constant 0 : i32
    %c0_i32_1 = arith.constant 0 : i32
    return %c0_i32, %c0_i32_0 : i32, i32
  }
  func.func @transform_28(%arg0: i32) -> (i32, i32) {
    %c0_i32 = arith.constant 0 : i32
    %c0_i32_0 = arith.constant 0 : i32
    %c0_i32_1 = arith.constant 0 : i32
    return %c0_i32, %c0_i32_0 : i32, i32
  }
  func.func @transform_29(%arg0: i32) -> (i32, i32) {
    %c0_i32 = arith.constant 0 : i32
    %c0_i32_0 = arith.constant 0 : i32
    %c0_i32_1 = arith.constant 0 : i32
    return %c0_i32, %c0_i32_0 : i32, i32
  }
  func.func @transform_30(%arg0: i32) -> (i32, i32) {
    %c0_i32 = arith.constant 0 : i32
    %c0_i32_0 = arith.constant 0 : i32
    %c0_i32_1 = arith.constant 0 : i32
    return %c0_i32, %c0_i32_0 : i32, i32
  }
  func.func @transform_31(%arg0: i32) -> (i32, i32) {
    %c0_i32 = arith.constant 0 : i32
    %c0_i32_0 = arith.constant 0 : i32
    return %arg0, %c0_i32 : i32, i32
  }
}

</mosaic_0001>

<bundles_post_ra>
// kernel: calf_forward.1
= control target key start
LH: loop header
LB: loop body
LE: loop exit
PB: predicated region body
PF: predicated region fallthrough
CT: control target
= control target key end

     0   :  { %vm151_vm0 = vcmask 130048   ;;  %v9739_v14 = vmov 0.0   ;;  %s9740_s6 = smov 1   ;;  %vm9741_vm1 = vmmov 0   ;;  %s9742_s10 = smov 5   ;;  %v9743_v53 = vmov 0   ;;  %s11162_s0 = inlined_call_operand.smem [shape: u32[32], index: -1, kind: input, shape index: {}] }
   0x1   :  { %s1_s5 = sld [smem:[%s11162_s0]]   ;;  %9013 = vmatprep.subr.bf16.mxu0 %v9739_v14  ;;  %9015 = vmatprep.mubr.msk.bf16.mxu0 %vm9741_vm1, %v9739_v14  ;;  %s9744_s14 = smov 3   ;;  %vm391_vm6 = vcmask 785408   ;;  %vm1186_vm7 = vcmask 1045504   ;;  %vm844_vm8 = vcmask 97280   ;;  %vm1470_vm9 = vcmask 1041409  }
   0x2   :  { %s7971_s9 = sld [smem:[%s11162_s0 + %s9740_s6]]   ;;  %427 = vmatprep.mubr.bf16.mxu1 %v9743_v53  ;;  %s9745_s18 = smov 2   ;;  %vm1472_vm10 = vcmask 1042434   ;;  %vm1474_vm11 = vcmask 1043459   ;;  %vm1476_vm12 = vcmask 1044484   ;;  %vm1478_vm13 = vcmask 1045509  }
   0x3   :  { %s9802_s13 = sld [smem:[%s11162_s0 + %s9742_s10]]   ;;  %s9746_s22 = smov 6   ;;  %vm1480_vm14 = vcmask 1046534   ;;  %vm1482_vm15 = vcmask 1047559  }
   0x4   :  { %s9838_s17 = sld [smem:[%s11162_s0 + %s9744_s14]]   ;;  %s9748_s26 = smov 4  }
   0x5   :  { %s7972_s21 = sld [smem:[%s11162_s0 + %s9745_s18]]   ;;  %s9749_s30 = smov 7  }
   0x6   :  { %s9862_s25 = sld [smem:[%s11162_s0 + %s9746_s22]]   ;;  %s9750_s4 = smov 8  }
   0x7   :  { %v149_v0 = vld [vmem:[%s1_s5] sm:$0xff]  ;;  %v150_v1 = vld [vmem:[%s1_s5 + $0x8] sm:$0xff]  ;;  %s9914_s29 = sld [smem:[%s11162_s0 + %s9748_s26]]   ;;  %s9751_s8 = smov 11  }
   0x8   :  { %v152_v2 = vsel %vm151_vm0, %v149_v0, 0.0  ;;  %v155_v3 = vsel %vm151_vm0, %v150_v1, 0.0  ;;  %v9244_v15 = vld [vmem:[%s7971_s9] sm:$0xff]   ;;  %s7977_s3 = sld [smem:[%s11162_s0 + %s9749_s30]]   ;;  %s9752_s12 = smov 13  }
   0x9   :  { %153 = vadd.xlane.f32.xlu0 %v152_v2  ;;  %9014 = vmatpush3.bf16.msra.mxu0 %v9244_v15  ;;  %v9245_v16 = vld [vmem:[%s9802_s13 + $0x4] ss:$12 sps:$4 sm:$0xff]   ;;  %v9247_v17 = vld [vmem:[%s9802_s13] ss:$12 sps:$4 sm:$0xff]   ;;  %v9249_v18 = vld [vmem:[%s9802_s13 + $0x1c] ss:$12 sps:$4 sm:$0xff]   ;;  %s7978_s7 = sld [smem:[%s11162_s0 + %s9750_s4]]  }
   0xa   :  { %9019 = vmatprep.subr.bf16.mxu0 %v9739_v14  ;;  %395 = vmatprep.subr.bf16.mxu1 %v9245_v16  ;;  %v9251_v19 = vld [vmem:[%s9802_s13 + $0x18] ss:$12 sps:$4 sm:$0xff]   ;;  %v9253_v20 = vld [vmem:[%s9802_s13 + $0x34] ss:$12 sps:$4 sm:$0xff]   ;;  %v9255_v21 = vld [vmem:[%s9802_s13 + $0x30] ss:$12 sps:$4 sm:$0xff]   ;;  %s10131_s11 = sld [smem:[%s11162_s0 + %s9751_s8]]  }
   0xb   :  { %396 = vmatpush1.bf16.msra.mxu1 %v9247_v17  ;;  %v9257_v22 = vld [vmem:[%s9802_s13 + $0x4c] ss:$12 sps:$4 sm:$0xff]   ;;  %v9259_v23 = vld [vmem:[%s9802_s13 + $0x48] ss:$12 sps:$4 sm:$0xff]   ;;  %v9261_v24 = vld [vmem:[%s9802_s13 + $0x64] ss:$12 sps:$4 sm:$0xff]   ;;  %s10174_s15 = sld [smem:[%s11162_s0 + %s9752_s12]]  }
   0xc   :  { %397 = vmatprep.subr.bf16.mxu1 %v9249_v18  ;;  %v9248_v40 = vld [vmem:[%s9802_s13 + $0x8] ss:$12 sps:$4 sm:$0xff]   ;;  %v9252_v45 = vld [vmem:[%s9802_s13 + $0x20] ss:$12 sps:$4 sm:$0xff]   ;;  %v9256_v46 = vld [vmem:[%s9802_s13 + $0x38] ss:$12 sps:$4 sm:$0xff]  }
   0xd   :  { %156 = vadd.xlane.f32.xlu0 %v155_v3  ;;  %v9260_v47 = vld [vmem:[%s9802_s13 + $0x50] ss:$12 sps:$4 sm:$0xff]   ;;  %v9263_v48 = vld [vmem:[%s9802_s13 + $0x60] ss:$12 sps:$4 sm:$0xff]   ;;  %v9264_v49 = vld [vmem:[%s9802_s13 + $0x68] ss:$12 sps:$4 sm:$0xff]  }
   0xe   :  { %v9265_v50 = vld [vmem:[%s9802_s13 + $0x7c] ss:$12 sps:$4 sm:$0xff]   ;;  %v9267_v51 = vld [vmem:[%s9802_s13 + $0x78] ss:$12 sps:$4 sm:$0xff]   ;;  %v9268_v52 = vld [vmem:[%s9802_s13 + $0x80] ss:$12 sps:$4 sm:$0xff]  }
   0xf   :  { %398 = vmatpush1.bf16.msra.mxu1 %v9251_v19  ;;  %v9269_v54 = vld [vmem:[%s9838_s17] sm:$0xff]   ;;  %v9270_v63 = vld [vmem:[%s9838_s17 + $0x8] sm:$0xff]   ;;  %s9753_s16 = smov 9   ;;  %s9756_s30 = smov 14  }
  0x10   :  { %399 = vmatprep.subr.bf16.mxu1 %v9253_v20  ;;  %v8002_v55 = vld [vmem:[%s7972_s21] ss:$0 sm:$0xff]  ;;  %v9274_v3 = vld [vmem:[%s9838_s17 + $0x28] sm:$0xff]   ;;  %s7979_s20 = sld [smem:[%s11162_s0 + %s9753_s16]]   ;;  %s9754_s21 = smov 10  }
  0x11   :  { %v9273_v2 = vld [vmem:[%s9838_s17 + $0x20] sm:$0xff]   ;;  %s7980_s24 = sld [smem:[%s11162_s0 + %s9754_s21]]   ;;  %s9757_s4 = smov 17  }
  0x12   :  { %s9758_s8 = smov 15   ;;  %s9759_s12 = smov 16  }
  0x13   :  { %400 = vmatpush1.bf16.msra.mxu1 %v9255_v21  ;;  %s9762_s23 = smov 20   ;;  %s9763_s27 = smov 23  }
  0x14   :  { %401 = vmatprep.subr.bf16.mxu1 %v9257_v22  ;;  %s7990_s26 = sld [smem:[%s11162_s0 + %s9762_s23]]   ;;  %s9764_s2 = smov 25  }
  0x15   :  { %s10797_s1 = sld [smem:[%s11162_s0 + %s9763_s27]]   ;;  %s9765_s6 = smov 21  }
  0x16   :  { %s10840_s5 = sld [smem:[%s11162_s0 + %s9764_s2]]   ;;  %s9766_s10 = smov 22  }
  0x17   :  { %402 = vmatpush1.bf16.msra.mxu1 %v9259_v23  ;;  %s7991_s9 = sld [smem:[%s11162_s0 + %s9765_s6]]   ;;  %s9767_s14 = smov 24  }
  0x18   :  { %403 = vmatprep.subr.bf16.mxu1 %v9261_v24  ;;  %s7992_s13 = sld [smem:[%s11162_s0 + %s9766_s10]]   ;;  %s9768_s18 = smov 26  }
  0x19   :  { %s10985_s16 = sld [smem:[%s11162_s0 + %s9767_s14]]   ;;  %s9769_s21 = smov 29  }
  0x1b   :  { %404 = vmatpush1.bf16.msra.mxu1 %v9263_v48 }
  0x1c   :  { %405 = vmatprep.subr.bf16.mxu1 %v9265_v50 }
  0x1f   :  { %406 = vmatpush1.bf16.msra.mxu1 %v9267_v51 }
  0x20   :  { %9035 = vmatprep.subr.bf16.mxu1 %v9269_v54 }
  0x96   :  { %v154_v4 = vpop.xlane.xlu0 %153 }
  0x97   :  { %v9784_v5 = vmul.f32 0.0625, %v154_v4  ;;  %v9275_v4 = vld [vmem:[%s9838_s17 + $0x30] sm:$0xff]  }
  0x99   :  { %v161_v6 = vsub.f32 %v149_v0, %v9784_v5  ;;  %v9271_v0 = vld [vmem:[%s9838_s17 + $0x10] sm:$0xff]  }
  0x9a   :  { %v157_v7 = vpop.xlane.xlu0 %156 }
  0x9b   :  { %v9787_v8 = vmul.f32 0.0625, %v157_v7  ;;  %v163_v9 = vmul.f32 %v161_v6, %v161_v6  ;;  %v280_v7 = vlaneseq }
  0x9d   :  { %v162_v10 = vsub.f32 %v150_v1, %v9787_v8  ;;  %v165_v11 = vsel %vm151_vm0, %v163_v9, 0.0  ;;  %v9272_v1 = vld [vmem:[%s9838_s17 + $0x18] sm:$0xff]   ;;  %v9864_v9 = vshrl.u32 %v280_v7, 7 }
  0x9e   :  { %166 = vadd.xlane.f32.xlu1 %v165_v11 }
  0x9f   :  { %v164_v12 = vmul.f32 %v162_v10, %v162_v10  ;;  %v9872_v17 = vsub.s32 1, %v9864_v9 }
  0xa1   :  { %v168_v13 = vsel %vm151_vm0, %v164_v12, 0.0  ;;  %v9867_v12 = vsub.s32 0, %v9864_v9 }
  0xa2   :  { %169 = vadd.xlane.f32.xlu1 %v168_v13  ;;  %v278_v13 = vld [vmem:[%s9862_s25] sm:$0x7] }
  0xa3   :  { %v283_v16 = vrot.slane %v278_v13, %v9867_v12  ;;  %v287_v24 = vrot.slane %v278_v13, %v9872_v17 }
 0x12b   :  { %v167_v25 = vpop.xlane.xlu1 %166 }
 0x12c   :  { %v171_v26 = vmul.f32 0.0625, %v167_v25 }
 0x12e   :  { %v173_v27 = vadd.f32 1e-05, %v171_v26 }
 0x12f   :  { %v170_v28 = vpop.xlane.xlu1 %169 }
 0x130   :  { %9580 = vrsqrt.f32 %v173_v27  ;;  %v172_v29 = vmul.f32 0.0625, %v170_v28  ;;  %vm179_vm2 = vcmp.eq.f32.partialorder %v173_v27, inf  ;;  %v182_v33 = vand.u32 2147483648, %v173_v27 }
 0x131   :  { %vm181_vm3 = vcmp.eq.f32.partialorder %v173_v27, 0.0 }
 0x132   :  { %v174_v30 = vadd.f32 1e-05, %v172_v29 }
 0x134   :  { %9582 = vrsqrt.f32 %v174_v30  ;;  %vm186_vm4 = vcmp.eq.f32.partialorder %v174_v30, inf  ;;  %v189_v41 = vand.u32 2147483648, %v174_v30  ;;  %vm188_vm5 = vcmp.eq.f32.partialorder %v174_v30, 0.0 }
 0x13a   :  { %v9581_v31 = vpop.eup %9580 }
 0x13b   :  { %v178_v32 = vmul.f32 %v9581_v31, %v173_v27  ;;  %v191_v37 = vmul.f32 %v9581_v31, %v161_v6  ;;  %v9276_v6 = vld [vmem:[%s9838_s17 + $0x38] sm:$0xff]  }
 0x13d   :  { %v180_v34 = vsel %vm179_vm2, %v173_v27, %v178_v32 }
 0x13e   :  { %v9583_v35 = vpop.eup %9582  ;;  %v9813_v36 = vsel %vm181_vm3, %v182_v33, %v180_v34 }
 0x13f   :  { %v192_v38 = vmul.f32 %v9583_v35, %v162_v10  ;;  %v185_v39 = vmul.f32 %v9583_v35, %v174_v30  ;;  %v9747_v10 = vmov 1966171168  }
 0x140   :  { %v483_v11 = vunpack.c.l.s4 %v9747_v10 }
 0x141   :  { %v193_v42 = vpack.c.bf16 %v192_v38, %v191_v37  ;;  %v187_v43 = vsel %vm186_vm4, %v174_v30, %v185_v39 }
 0x142   :  { %v9816_v44 = vsel %vm188_vm5, %v189_v41, %v187_v43  ;;  %v484_v15 = vunpack.c.0.s8 %v483_v11 }
 0x143   :  { %9016 = vmatmul.mubr.msk.bf16.vlgmr.msra.gmra.mrb[0].mxu0 %vm151_vm0, %v193_v42  ;;  %vm7964_vm0 = vcmask 64512  }
 0x144   :  { %9020 = vmatpush3.bf16.msra.mxu0 %v9248_v40  ;;  %9031 = vmatprep.mubr.msk.bf16.mxu0 %vm9741_vm1, %v9739_v14  ;;  %v9875_v18 = vsub.s32 %v484_v15, %v9864_v9 }
 0x145   :  { %9021 = vmatprep.subr.bf16.mxu0 %v9739_v14 }
 0x148   :  { %9022 = vmatpush3.bf16.msra.mxu0 %v9252_v45 }
 0x149   :  { %9023 = vmatprep.subr.bf16.mxu0 %v9739_v14 }
 0x14c   :  { %9024 = vmatpush3.bf16.msra.mxu0 %v9256_v46 }
 0x14d   :  { %9025 = vmatprep.subr.bf16.mxu0 %v9739_v14 }
 0x150   :  { %9026 = vmatpush3.bf16.msra.mxu0 %v9260_v47 }
 0x151   :  { %9027 = vmatprep.subr.bf16.mxu0 %v9739_v14 }
 0x154   :  { %9028 = vmatpush3.bf16.msra.mxu0 %v9264_v49 }
 0x155   :  { %9029 = vmatprep.subr.bf16.mxu0 %v9739_v14 }
 0x158   :  { %9030 = vmatpush3.bf16.msra.mxu0 %v9268_v52 }
 0x216   :  { %v246_v56 = vpop.f32.mrb[0].mxu0 }
 0x217   :  { %v9017_v57 = vpop.f32.mrb[1].mxu0  ;;  %v9844_v59 = vadd.f32 %v8002_v55, %v246_v56 }
 0x218   :  { %v249_v58 = vpop.f32.mrb[2].mxu0 }
 0x219   :  { %v9846_v60 = vadd.f32 %v8002_v55, %v249_v58  ;;  %v9018_v61 = vpop.f32.mrb[3].mxu0 }
 0x21b   :  { %v253_v62 = vpack.c.bf16 %v9846_v60, %v9844_v59 }
 0x21d   :  { %8023 = vmatmul.mubr.msk.bf16.vlgmr.msra.gmra.mrb[0].mxu1 %vm391_vm6, %v253_v62  ;;  %9032 = vmatmul.mubr.msk.bf16.vlgmr.msra.gmra.mrb[4].mxu0 %vm391_vm6, %v253_v62 }
 0x21e   :  { %9036 = vmatpush3.bf16.msra.mxu1 %v9269_v54 }
 0x21f   :  { %9037 = vmatprep.subr.bf16.mxu1 %v9270_v63 }
 0x222   :  { %9038 = vmatpush3.bf16.msra.mxu1 %v9270_v63 }
 0x223   :  { %9039 = vmatprep.subr.bf16.mxu1 %v9271_v0 }
 0x226   :  { %9040 = vmatpush3.bf16.msra.mxu1 %v9271_v0 }
 0x227   :  { %9041 = vmatprep.subr.bf16.mxu1 %v9272_v1 }
 0x22a   :  { %9042 = vmatpush3.bf16.msra.mxu1 %v9272_v1 }
 0x22b   :  { %9043 = vmatprep.subr.bf16.mxu1 %v9273_v2 }
 0x22e   :  { %9044 = vmatpush3.bf16.msra.mxu1 %v9273_v2 }
 0x22f   :  { %9045 = vmatprep.subr.bf16.mxu1 %v9274_v3 }
 0x232   :  { %9046 = vmatpush3.bf16.msra.mxu1 %v9274_v3 }
 0x233   :  { %9047 = vmatprep.subr.bf16.mxu1 %v9275_v4 }
 0x236   :  { %9048 = vmatpush3.bf16.msra.mxu1 %v9275_v4 }
 0x237   :  { %9049 = vmatprep.subr.bf16.mxu1 %v9276_v6 }
 0x23a   :  { %9050 = vmatpush3.bf16.msra.mxu1 %v9276_v6 }
 0x2f0   :  { %v429_v19 = vpop.f32.mrb[0].mxu1  ;;  %v9877_v20 = vpop.f32.mrb[4].mxu0 }
 0x2f1   :  { %v430_v21 = vadd.f32 %v429_v19, %v283_v16  ;;  %v431_v22 = vpop.f32.mrb[1].mxu1  ;;  %v9033_v23 = vpop.f32.mrb[5].mxu0 }
 0x2f2   :  { %v433_v25 = vpop.f32.mrb[2].mxu1  ;;  %v9880_v26 = vpop.f32.mrb[6].mxu0  ;;  %v432_v37 = vadd.f32 %v431_v22, %v287_v24 }
 0x2f3   :  { %v481_v27 = vcombine.high %v430_v21, %v430_v21  ;;  %v488_v28 = vrot.slane %v430_v21, %v9875_v18  ;;  %v434_v29 = vadd.f32 %v433_v25, %v283_v16  ;;  %v435_v30 = vpop.f32.mrb[3].mxu1  ;;  %v9034_v31 = vpop.f32.mrb[7].mxu0 }
 0x2f4   :  { %v436_v39 = vadd.f32 %v435_v30, %v287_v24 }
 0x2f5   :  { %v495_v32 = vrot.slane %v481_v27, %v9875_v18  ;;  %v496_v33 = vcombine.high %v488_v28, %v488_v28  ;;  %v504_v34 = vrot.slane %v488_v28, %v9875_v18  ;;  %v530_v35 = vcombine.high %v434_v29, %v434_v29 }
 0x2f6   :  { %v537_v38 = vrot.slane %v434_v29, %v9875_v18 }
 0x2f7   :  { %v497_v40 = vcombine.high %v495_v32, %v495_v32  ;;  %v511_v41 = vrot.slane %v495_v32, %v9875_v18  ;;  %v518_v42 = vrot.slane %v496_v33, %v9875_v18  ;;  %v526_v43 = vcombine.high %v504_v34, %v504_v34 }
 0x2f8   :  { %v582_v45 = vrot.slane %v504_v34, %v9867_v12  ;;  %v544_v46 = vrot.slane %v530_v35, %v9875_v18  ;;  %v545_v47 = vcombine.high %v537_v38, %v537_v38  ;;  %v553_v48 = vrot.slane %v537_v38, %v9875_v18 }
 0x2f9   :  { %v525_v49 = vrot.slane %v497_v40, %v9875_v18  ;;  %v527_v50 = vcombine.high %v511_v41, %v511_v41  ;;  %v528_v51 = vcombine.high %v518_v42, %v518_v42  ;;  %v590_v52 = vrot.slane %v526_v43, %v9867_v12 }
 0x2fa   :  { %v546_v54 = vcombine.high %v544_v46, %v544_v46  ;;  %v560_v55 = vrot.slane %v544_v46, %v9875_v18  ;;  %v567_v56 = vrot.slane %v545_v47, %v9875_v18  ;;  %v575_v57 = vcombine.high %v553_v48, %v553_v48 }
 0x2fb   :  { %v594_v58 = vrot.slane %v528_v51, %v9867_v12  ;;  %v614_v61 = vrot.slane %v553_v48, %v9867_v12  ;;  %v586_v62 = vrot.slane %v518_v42, %v9867_v12  ;;  %v659_v63 = vmul.f32 %v582_v45, %v432_v37 }
 0x2fc   :  { %v574_v0 = vrot.slane %v546_v54, %v9875_v18  ;;  %v576_v1 = vcombine.high %v560_v55, %v560_v55  ;;  %v577_v2 = vcombine.high %v567_v56, %v567_v56  ;;  %v661_v3 = vmul.f32 %v590_v52, %v432_v37 }
 0x2fd   :  { %v660_v4 = vmul.f32 %v586_v62, %v432_v37  ;;  %v662_v6 = vmul.f32 %v594_v58, %v432_v37  ;;  %v598_v7 = vrot.slane %v511_v41, %v9867_v12  ;;  %v602_v10 = vrot.slane %v525_v49, %v9867_v12 }
 0x2fe   :  { %v529_v11 = vcombine.high %v525_v49, %v525_v49  ;;  %v606_v13 = vrot.slane %v527_v50, %v9867_v12  ;;  %v618_v15 = vrot.slane %v567_v56, %v9867_v12  ;;  %v667_v16 = vmul.f32 %v614_v61, %v436_v39 }
 0x2ff   :  { %v675_v19 = vpack.c.bf16 %v660_v4, %v659_v63  ;;  %v676_v21 = vpack.c.bf16 %v662_v6, %v661_v3  ;;  %v663_v22 = vmul.f32 %v598_v7, %v432_v37  ;;  %v664_v23 = vmul.f32 %v602_v10, %v432_v37 }
 0x300   :  { %v610_v24 = vrot.slane %v529_v11, %v9867_v12  ;;  %v665_v25 = vmul.f32 %v606_v13, %v432_v37  ;;  %v668_v27 = vmul.f32 %v618_v15, %v436_v39  ;;  %v622_v28 = vrot.slane %v575_v57, %v9867_v12 }
 0x301   :  { %9051 = vmatprep.mubr.bf16.mxu1 %v675_v19  ;;  %v677_v29 = vpack.c.bf16 %v664_v23, %v663_v22  ;;  %v626_v30 = vrot.slane %v577_v2, %v9867_v12  ;;  %v630_v31 = vrot.slane %v560_v55, %v9867_v12  ;;  %v634_v32 = vrot.slane %v574_v0, %v9867_v12 }
 0x302   :  { %9052 = vmatmul.mubr.bf16.vlgmr.msra.gmra.mrb[4].mxu1 %v676_v21  ;;  %v666_v33 = vmul.f32 %v610_v24, %v432_v37  ;;  %v679_v34 = vpack.c.bf16 %v668_v27, %v667_v16  ;;  %v669_v35 = vmul.f32 %v622_v28, %v436_v39  ;;  %v578_v38 = vcombine.high %v574_v0, %v574_v0  ;;  %v9277_v37 = vld [vmem:[%s9914_s29] sm:$0x3f]  }
 0x303   :  { %9055 = vmatprep.mubr.bf16.mxu1 %v677_v29  ;;  %v670_v40 = vmul.f32 %v626_v30, %v436_v39  ;;  %v671_v41 = vmul.f32 %v630_v31, %v436_v39  ;;  %v672_v42 = vmul.f32 %v634_v32, %v436_v39  ;;  %v638_v43 = vrot.slane %v576_v1, %v9867_v12 }
 0x304   :  { %v678_v45 = vpack.c.bf16 %v666_v33, %v665_v25  ;;  %v642_v46 = vrot.slane %v578_v38, %v9867_v12  ;;  %9207 = vmatprep.subr.msk.bf16.mxu0 %vm1186_vm7, %v9277_v37 }
 0x305   :  { %v680_v47 = vpack.c.bf16 %v670_v40, %v669_v35  ;;  %v681_v48 = vpack.c.bf16 %v672_v42, %v671_v41  ;;  %v673_v49 = vmul.f32 %v638_v43, %v436_v39 }
 0x306   :  { %v674_v50 = vmul.f32 %v642_v46, %v436_v39  ;;  %v9919_v39 = vsel %vm1186_vm7, %v9277_v37, 0 }
 0x307   :  { %9068 = vmatpush3.bf16.msra.mxu0 %v9919_v39 }
 0x308   :  { %v682_v51 = vpack.c.bf16 %v674_v50, %v673_v49  ;;  %9085 = vmatprep.subr.bf16.mxu0 %v9739_v14 }
 0x30a   :  { %9056 = vmatmul.mubr.bf16.gmra.mrb[8].mxu1 %v678_v45 }
 0x30b   :  { %9059 = vmatprep.mubr.bf16.mxu1 %v679_v34 }
 0x312   :  { %9060 = vmatmul.mubr.bf16.gmra.mrb[12].mxu1 %v680_v47 }
 0x313   :  { %9063 = vmatprep.mubr.bf16.mxu1 %v681_v48 }
 0x31a   :  { %9064 = vmatmul.mubr.bf16.gmra.mrb[16].mxu1 %v682_v51 }
 0x31b   :  { %2325 = vmatprep.mubr.bf16.mxu1 %v9743_v53 }
 0x3d5   :  { %v9053_v52 = vpop.f32.mrb[4].mxu1 }
 0x3d6   :  { %v830_v54 = vmul.f32 0.35355338, %v9053_v52  ;;  %v765_v55 = vpop.f32.mrb[5].mxu1 }
 0x3d7   :  { %v828_v56 = vmul.f32 0.35355338, %v765_v55  ;;  %v9054_v57 = vpop.f32.mrb[6].mxu1 }
 0x3d8   :  { %v859_v58 = vsel %vm844_vm8, %v830_v54, -inf  ;;  %v9924_v61 = vmul.f32 0.35355338, %v9054_v57  ;;  %v768_v62 = vpop.f32.mrb[7].mxu1 }
 0x3d9   :  { %v860_v63 = vrot.slane %v859_v58, 4  ;;  %v845_v0 = vsel %vm844_vm8, %v828_v56, -inf  ;;  %v9927_v1 = vmul.f32 0.35355338, %v768_v62 }
 0x3da   :  { %v846_v2 = vrot.slane %v845_v0, 4  ;;  %v866_v3 = vsel %vm844_vm8, %v9924_v61, -inf }
 0x3db   :  { %v861_v4 = vmax.f32 %v859_v58, %v860_v63  ;;  %v867_v6 = vrot.slane %v866_v3, 4  ;;  %v852_v7 = vsel %vm844_vm8, %v9927_v1, -inf }
 0x3dc   :  { %v847_v10 = vmax.f32 %v845_v0, %v846_v2  ;;  %v853_v11 = vrot.slane %v852_v7, 4 }
 0x3dd   :  { %v862_v13 = vrot.slane %v861_v4, 2  ;;  %v868_v15 = vmax.f32 %v866_v3, %v867_v6  ;;  %v9057_v16 = vpop.f32.mrb[8].mxu1 }
 0x3de   :  { %v848_v19 = vrot.slane %v847_v10, 2  ;;  %v854_v21 = vmax.f32 %v852_v7, %v853_v11  ;;  %v9933_v22 = vmul.f32 0.35355338, %v9057_v16  ;;  %v781_v23 = vpop.f32.mrb[9].mxu1 }
 0x3df   :  { %v863_v24 = vmax.f32 %v861_v4, %v862_v13  ;;  %v869_v25 = vrot.slane %v868_v15, 2  ;;  %v9935_v27 = vmul.f32 0.35355338, %v781_v23  ;;  %v9058_v28 = vpop.f32.mrb[10].mxu1 }
 0x3e0   :  { %v849_v29 = vmax.f32 %v847_v10, %v848_v19  ;;  %v855_v30 = vrot.slane %v854_v21, 2  ;;  %v887_v31 = vsel %vm844_vm8, %v9933_v22, -inf  ;;  %v9939_v32 = vmul.f32 0.35355338, %v9058_v28  ;;  %v784_v33 = vpop.f32.mrb[11].mxu1 }
 0x3e1   :  { %v864_v34 = vrot.slane %v863_v24, 1  ;;  %v870_v35 = vmax.f32 %v868_v15, %v869_v25  ;;  %v888_v38 = vrot.slane %v887_v31, 4  ;;  %v873_v40 = vsel %vm844_vm8, %v9935_v27, -inf }
 0x3e2   :  { %v850_v41 = vrot.slane %v849_v29, 1  ;;  %v856_v42 = vmax.f32 %v854_v21, %v855_v30  ;;  %v874_v43 = vrot.slane %v873_v40, 4  ;;  %v894_v45 = vsel %vm844_vm8, %v9939_v32, -inf }
 0x3e3   :  { %v865_v46 = vmax.f32 %v863_v24, %v864_v34  ;;  %v871_v47 = vrot.slane %v870_v35, 1  ;;  %v889_v48 = vmax.f32 %v887_v31, %v888_v38  ;;  %v895_v49 = vrot.slane %v894_v45, 4 }
 0x3e4   :  { %v851_v50 = vmax.f32 %v849_v29, %v850_v41  ;;  %v857_v51 = vrot.slane %v856_v42, 1  ;;  %v875_v37 = vmax.f32 %v873_v40, %v874_v43  ;;  %v9945_v52 = vmul.f32 0.35355338, %v784_v33 }
 0x3e5   :  { %v959_v55 = vsub.f32 %v830_v54, %v865_v46  ;;  %v872_v57 = vmax.f32 %v870_v35, %v871_v47  ;;  %v890_v58 = vrot.slane %v889_v48, 2  ;;  %v896_v62 = vmax.f32 %v894_v45, %v895_v49  ;;  %v9061_v63 = vpop.f32.mrb[12].mxu1 }
 0x3e6   :  { %v957_v0 = vsub.f32 %v828_v56, %v851_v50  ;;  %v858_v2 = vmax.f32 %v856_v42, %v857_v51  ;;  %v876_v3 = vrot.slane %v875_v37, 2  ;;  %v880_v4 = vsel %vm844_vm8, %v9945_v52, -inf  ;;  %v797_v6 = vpop.f32.mrb[13].mxu1 }
 0x3e7   :  { %v977_v7 = vmul.f32 1.442695, %v959_v55  ;;  %v960_v10 = vsub.f32 %v9924_v61, %v872_v57  ;;  %v891_v11 = vmax.f32 %v889_v48, %v890_v58  ;;  %v897_v13 = vrot.slane %v896_v62, 2  ;;  %v9062_v15 = vpop.f32.mrb[14].mxu1 }
 0x3e8   :  { %v973_v16 = vmul.f32 1.442695, %v957_v0  ;;  %v958_v54 = vsub.f32 %v9927_v1, %v858_v2  ;;  %v877_v19 = vmax.f32 %v875_v37, %v876_v3  ;;  %v881_v21 = vrot.slane %v880_v4, 4  ;;  %v800_v23 = vpop.f32.mrb[15].mxu1 }
 0x3e9   :  { %9584 = vpow2.f32 %v977_v7  ;;  %v979_v56 = vmul.f32 1.442695, %v960_v10  ;;  %v892_v24 = vrot.slane %v891_v11, 1  ;;  %v898_v25 = vmax.f32 %v896_v62, %v897_v13 }
 0x3ea   :  { %9586 = vpow2.f32 %v973_v16  ;;  %v975_v28 = vmul.f32 1.442695, %v958_v54  ;;  %v878_v29 = vrot.slane %v877_v19, 1  ;;  %v882_v30 = vmax.f32 %v880_v4, %v881_v21 }
 0x3eb   :  { %9588 = vpow2.f32 %v979_v56  ;;  %v893_v31 = vmax.f32 %v891_v11, %v892_v24  ;;  %v899_v61 = vrot.slane %v898_v25, 1  ;;  %v9951_v33 = vmul.f32 0.35355338, %v9061_v63 }
 0x3ec   :  { %9590 = vpow2.f32 %v975_v28  ;;  %v879_v34 = vmax.f32 %v877_v19, %v878_v29  ;;  %v883_v35 = vrot.slane %v882_v30, 2  ;;  %v9953_v1 = vmul.f32 0.35355338, %v797_v6 }
 0x3ed   :  { %v963_v38 = vsub.f32 %v9933_v22, %v893_v31  ;;  %v900_v40 = vmax.f32 %v898_v25, %v899_v61  ;;  %v915_v41 = vsel %vm844_vm8, %v9951_v33, -inf  ;;  %v9958_v42 = vmul.f32 0.35355338, %v9062_v15  ;;  %v9065_v43 = vpop.f32.mrb[16].mxu1 }
 0x3ee   :  { %v961_v45 = vsub.f32 %v9935_v27, %v879_v34  ;;  %v884_v46 = vmax.f32 %v882_v30, %v883_v35  ;;  %v916_v47 = vrot.slane %v915_v41, 4  ;;  %v901_v48 = vsel %vm844_vm8, %v9953_v1, -inf  ;;  %v9963_v49 = vpop.f32.mrb[17].mxu1 }
 0x3ef   :  { %v985_v50 = vmul.f32 1.442695, %v963_v38  ;;  %v964_v51 = vsub.f32 %v9939_v32, %v900_v40  ;;  %v902_v22 = vrot.slane %v901_v48, 4  ;;  %v922_v37 = vsel %vm844_vm8, %v9958_v42, -inf  ;;  %v9968_v55 = vpop.f32.mrb[18].mxu1 }
 0x3f0   :  { %v981_v57 = vmul.f32 1.442695, %v961_v45  ;;  %v885_v58 = vrot.slane %v884_v46, 1  ;;  %v917_v62 = vmax.f32 %v915_v41, %v916_v47  ;;  %v923_v27 = vrot.slane %v922_v37, 4  ;;  %v9970_v63 = vpop.f32.mrb[19].mxu1 }
 0x3f1   :  { %9592 = vpow2.f32 %v985_v50  ;;  %v987_v0 = vmul.f32 1.442695, %v964_v51  ;;  %v903_v2 = vmax.f32 %v901_v48, %v902_v22  ;;  %v9972_v3 = vmul.f32 0.35355338, %v800_v23 }
 0x3f2   :  { %9594 = vpow2.f32 %v981_v57  ;;  %v886_v4 = vmax.f32 %v884_v46, %v885_v58  ;;  %v918_v32 = vrot.slane %v917_v62, 2  ;;  %v924_v6 = vmax.f32 %v922_v37, %v923_v27 }
 0x3f3   :  { %v9974_v7 = vpop.eup %9584  ;;  %9596 = vpow2.f32 %v987_v0  ;;  %v904_v10 = vrot.slane %v903_v2, 2  ;;  %v908_v11 = vsel %vm844_vm8, %v9972_v3, -inf  ;;  %v9978_v13 = vmul.f32 0.35355338, %v9065_v43 }
 0x3f4   :  { %v9980_v15 = vpop.eup %9586  ;;  %v1019_v16 = vsel %vm844_vm8, %v9974_v7, 0.0  ;;  %v962_v54 = vsub.f32 %v9945_v52, %v886_v4  ;;  %v919_v19 = vmax.f32 %v917_v62, %v918_v32  ;;  %v925_v21 = vrot.slane %v924_v6, 2 }
 0x3f5   :  { %v9985_v23 = vpop.eup %9588  ;;  %v1020_v56 = vrot.slane %v1019_v16, 4  ;;  %v1005_v24 = vsel %vm844_vm8, %v9980_v15, 0.0  ;;  %v905_v25 = vmax.f32 %v903_v2, %v904_v10  ;;  %v909_v28 = vrot.slane %v908_v11, 4 }
 0x3f6   :  { %v9989_v29 = vpop.eup %9590  ;;  %v1006_v30 = vrot.slane %v1005_v24, 4  ;;  %v1026_v31 = vsel %vm844_vm8, %v9985_v23, 0.0  ;;  %v983_v61 = vmul.f32 1.442695, %v962_v54  ;;  %v920_v34 = vrot.slane %v919_v19, 1 }
 0x3f7   :  { %v1021_v35 = vadd.f32 %v1020_v56, %v1019_v16  ;;  %v1027_v52 = vrot.slane %v1026_v31, 4  ;;  %v1012_v38 = vsel %vm844_vm8, %v9989_v29, 0.0  ;;  %v906_v40 = vrot.slane %v905_v25, 1 }
 0x3f8   :  { %v1007_v41 = vadd.f32 %v1006_v30, %v1005_v24  ;;  %v1013_v43 = vrot.slane %v1012_v38, 4  ;;  %9598 = vpow2.f32 %v983_v61  ;;  %v921_v45 = vmax.f32 %v919_v19, %v920_v34 }
 0x3f9   :  { %v1022_v46 = vrot.slane %v1021_v35, 2  ;;  %v1028_v47 = vadd.f32 %v1027_v52, %v1026_v31  ;;  %v907_v48 = vmax.f32 %v905_v25, %v906_v40  ;;  %v926_v50 = vmax.f32 %v924_v6, %v925_v21 }
 0x3fa   :  { %v1008_v51 = vrot.slane %v1007_v41, 2  ;;  %v1014_v22 = vadd.f32 %v1013_v43, %v1012_v38  ;;  %v967_v37 = vsub.f32 %v9951_v33, %v921_v45  ;;  %v910_v57 = vmax.f32 %v908_v11, %v909_v28 }
 0x3fb   :  { %v9996_v58 = vpop.eup %9592  ;;  %v1023_v62 = vadd.f32 %v1022_v46, %v1021_v35  ;;  %v1029_v27 = vrot.slane %v1028_v47, 2  ;;  %v965_v0 = vsub.f32 %v9953_v1, %v907_v48  ;;  %v927_v2 = vrot.slane %v926_v50, 1 }
 0x3fc   :  { %v9999_v4 = vpop.eup %9594  ;;  %v1009_v32 = vadd.f32 %v1008_v51, %v1007_v41  ;;  %v1015_v10 = vrot.slane %v1014_v22, 2  ;;  %v1047_v16 = vsel %vm844_vm8, %v9996_v58, 0.0  ;;  %v993_v6 = vmul.f32 1.442695, %v967_v37 }
 0x3fd   :  { %v10003_v54 = vpop.eup %9596  ;;  %v1024_v19 = vrot.slane %v1023_v62, 1  ;;  %v1030_v33 = vadd.f32 %v1029_v27, %v1028_v47  ;;  %v1048_v11 = vrot.slane %v1047_v16, 4  ;;  %v1033_v21 = vsel %vm844_vm8, %v9999_v4, 0.0 }
 0x3fe   :  { %v1010_v56 = vrot.slane %v1009_v32, 1  ;;  %v1016_v24 = vadd.f32 %v1015_v10, %v1014_v22  ;;  %v1034_v1 = vrot.slane %v1033_v21, 4  ;;  %v1054_v25 = vsel %vm844_vm8, %v10003_v54, 0.0 }
 0x3ff   :  { %v1025_v28 = vadd.f32 %v1024_v19, %v1023_v62  ;;  %v1031_v30 = vrot.slane %v1030_v33, 1  ;;  %v1049_v31 = vadd.f32 %v1048_v11, %v1047_v16  ;;  %v1055_v61 = vrot.slane %v1054_v25, 4 }
 0x400   :  { %v1011_v34 = vadd.f32 %v1010_v56, %v1009_v32  ;;  %v1017_v35 = vrot.slane %v1016_v24, 1  ;;  %v1035_v52 = vadd.f32 %v1034_v1, %v1033_v21  ;;  %9600 = vpow2.f32 %v993_v6 }
 0x401   :  { %9602 = vrcp.f32 %v1025_v28  ;;  %v1032_v38 = vadd.f32 %v1031_v30, %v1030_v33  ;;  %v1050_v40 = vrot.slane %v1049_v31, 2  ;;  %v1056_v41 = vadd.f32 %v1055_v61, %v1054_v25 }
 0x402   :  { %v10009_v43 = vpop.eup %9598  ;;  %9604 = vrcp.f32 %v1011_v34  ;;  %v1018_v45 = vadd.f32 %v1017_v35, %v1016_v24  ;;  %v1036_v46 = vrot.slane %v1035_v52, 2  ;;  %v989_v47 = vmul.f32 1.442695, %v965_v0 }
 0x403   :  { %9606 = vrcp.f32 %v1032_v38  ;;  %v1051_v48 = vadd.f32 %v1050_v40, %v1049_v31  ;;  %v1057_v51 = vrot.slane %v1056_v41, 2  ;;  %v1040_v22 = vsel %vm844_vm8, %v10009_v43, 0.0 }
 0x404   :  { %9608 = vrcp.f32 %v1018_v45  ;;  %v1037_v37 = vadd.f32 %v1036_v46, %v1035_v52  ;;  %v1041_v62 = vrot.slane %v1040_v22, 4  ;;  %v928_v27 = vmax.f32 %v926_v50, %v927_v2 }
 0x405   :  { %v1052_v32 = vrot.slane %v1051_v48, 1  ;;  %v1058_v10 = vadd.f32 %v1057_v51, %v1056_v41  ;;  %9610 = vpow2.f32 %v989_v47  ;;  %v911_v16 = vrot.slane %v910_v57, 2 }
 0x406   :  { %v1038_v6 = vrot.slane %v1037_v37, 1  ;;  %v1042_v19 = vadd.f32 %v1041_v62, %v1040_v22  ;;  %v968_v33 = vsub.f32 %v9958_v42, %v928_v27  ;;  %v943_v0 = vsel %vm844_vm8, %v9978_v13, -inf }
 0x407   :  { %v1053_v11 = vadd.f32 %v1052_v32, %v1051_v48  ;;  %v1059_v21 = vrot.slane %v1058_v10, 1  ;;  %v912_v56 = vmax.f32 %v910_v57, %v911_v16  ;;  %v944_v24 = vrot.slane %v943_v0, 4 }
 0x408   :  { %v1039_v1 = vadd.f32 %v1038_v6, %v1037_v37  ;;  %v1043_v25 = vrot.slane %v1042_v19, 2  ;;  %v995_v28 = vmul.f32 1.442695, %v968_v33  ;;  %v10017_v50 = vmul.f32 0.35355338, %v9963_v49 }
 0x409   :  { %9612 = vrcp.f32 %v1053_v11  ;;  %v1060_v2 = vadd.f32 %v1059_v21, %v1058_v10  ;;  %v913_v30 = vrot.slane %v912_v56, 1  ;;  %v945_v31 = vmax.f32 %v943_v0, %v944_v24 }
 0x40a   :  { %v10019_v61 = vpop.eup %9600  ;;  %9614 = vrcp.f32 %v1039_v1  ;;  %v1044_v42 = vadd.f32 %v1043_v25, %v1042_v19  ;;  %v929_v34 = vsel %vm844_vm8, %v10017_v50, -inf  ;;  %v10024_v57 = vmul.f32 0.35355338, %v9968_v55 }
 0x40b   :  { %v9603_v35 = vpop.eup %9602  ;;  %9616 = vrcp.f32 %v1060_v2  ;;  %v1075_v49 = vsel %vm844_vm8, %v10019_v61, 0.0  ;;  %v914_v52 = vmax.f32 %v912_v56, %v913_v30  ;;  %v946_v38 = vrot.slane %v945_v31, 2 }
 0x40c   :  { %v9605_v40 = vpop.eup %9604  ;;  %v1045_v41 = vrot.slane %v1044_v42, 1  ;;  %v1076_v45 = vrot.slane %v1075_v49, 4  ;;  %9618 = vpow2.f32 %v995_v28  ;;  %v930_v46 = vrot.slane %v929_v34, 4 }
 0x40d   :  { %v9607_v47 = vpop.eup %9606  ;;  %v966_v48 = vsub.f32 %v9972_v3, %v914_v52  ;;  %v947_v51 = vmax.f32 %v945_v31, %v946_v38  ;;  %v950_v55 = vsel %vm844_vm8, %v10024_v57, -inf  ;;  %v10032_v22 = vmul.f32 0.35355338, %v9970_v63 }
 0x40e   :  { %v9609_v37 = vpop.eup %9608  ;;  %v1046_v62 = vadd.f32 %v1045_v41, %v1044_v42  ;;  %v1077_v27 = vadd.f32 %v1076_v45, %v1075_v49  ;;  %v931_v32 = vmax.f32 %v929_v34, %v930_v46  ;;  %v951_v10 = vrot.slane %v950_v55, 4 }
 0x40f   :  { %v10034_v16 = vpop.eup %9610  ;;  %v991_v6 = vmul.f32 1.442695, %v966_v48  ;;  %v948_v19 = vrot.slane %v947_v51, 1  ;;  %v936_v33 = vsel %vm844_vm8, %v10032_v22, -inf  ;;  %v1133_v25 = vmul.f32 %v9605_v40, %v9980_v15 }
 0x410   :  { %9620 = vrcp.f32 %v1046_v62  ;;  %v1078_v3 = vrot.slane %v1077_v27, 2  ;;  %v1061_v0 = vsel %vm844_vm8, %v10034_v16, 0.0  ;;  %v932_v11 = vrot.slane %v931_v32, 2 }
 0x411   :  { %v1062_v63 = vrot.slane %v1061_v0, 4  ;;  %9622 = vpow2.f32 %v991_v6  ;;  %v949_v21 = vmax.f32 %v947_v51, %v948_v19  ;;  %v952_v56 = vmax.f32 %v950_v55, %v951_v10 }
 0x412   :  { %v933_v24 = vmax.f32 %v931_v32, %v932_v11  ;;  %v937_v1 = vrot.slane %v936_v33, 4  ;;  %v1134_v28 = vmul.f32 %v9609_v37, %v9989_v29  ;;  %v1079_v45 = vadd.f32 %v1078_v3, %v1077_v27 }
 0x413   :  { %v9613_v2 = vpop.eup %9612  ;;  %v1063_v30 = vadd.f32 %v1062_v63, %v1061_v0  ;;  %v971_v31 = vsub.f32 %v9978_v13, %v949_v21  ;;  %v953_v42 = vrot.slane %v952_v56, 2  ;;  %v1136_v51 = vmul.f32 %v9607_v47, %v9985_v23 }
 0x414   :  { %v9615_v34 = vpop.eup %9614  ;;  %v934_v49 = vrot.slane %v933_v24, 1  ;;  %v938_v52 = vmax.f32 %v936_v33, %v937_v1  ;;  %v1149_v38 = vpack.c.bf16 %v1134_v28, %v1133_v25  ;;  %v1135_v29 = vmul.f32 %v9603_v35, %v9974_v7 }
 0x415   :  { %v9617_v41 = vpop.eup %9616  ;;  %v1001_v46 = vmul.f32 1.442695, %v971_v31  ;;  %v954_v48 = vmax.f32 %v952_v56, %v953_v42  ;;  %v1064_v13 = vrot.slane %v1063_v30, 2  ;;  %v1080_v6 = vrot.slane %v1079_v45, 1 }
 0x416   :  { %v10044_v55 = vpop.eup %9618  ;;  %v935_v15 = vmax.f32 %v933_v24, %v934_v49  ;;  %v939_v40 = vrot.slane %v938_v52, 2  ;;  %9069 = vmatprep.mubr.msk.bf16.mxu0 %vm844_vm8, %v1149_v38  ;;  %v1150_v47 = vpack.c.bf16 %v1136_v51, %v1135_v29  ;;  %v1137_v19 = vmul.f32 %v9615_v34, %v9999_v4 }
 0x417   :  { %v1082_v37 = vsel %vm844_vm8, %v10044_v55, 0.0  ;;  %9624 = vpow2.f32 %v1001_v46  ;;  %v955_v62 = vrot.slane %v954_v48, 1  ;;  %v1140_v7 = vmul.f32 %v9617_v41, %v10003_v54 }
 0x418   :  { %v1083_v32 = vrot.slane %v1082_v37, 4  ;;  %v969_v27 = vsub.f32 %v10017_v50, %v935_v15  ;;  %v940_v10 = vmax.f32 %v938_v52, %v939_v40  ;;  %v1065_v63 = vadd.f32 %v1064_v13, %v1063_v30  ;;  %9070 = vmatmul.mubr.msk.bf16.vlgmr.msra.gmra.mrb[8].mxu0 %vm844_vm8, %v1150_v47 }
 0x419   :  { %v956_v23 = vmax.f32 %v954_v48, %v955_v62  ;;  %v1139_v56 = vmul.f32 %v9613_v2, %v9996_v58  ;;  %v1081_v25 = vadd.f32 %v1080_v6, %v1079_v45 }
 0x41a   :  { %v9621_v33 = vpop.eup %9620  ;;  %v1084_v3 = vadd.f32 %v1083_v32, %v1082_v37  ;;  %v997_v0 = vmul.f32 1.442695, %v969_v27  ;;  %v941_v11 = vrot.slane %v940_v10, 1  ;;  %v1066_v34 = vrot.slane %v1065_v63, 1 }
 0x41b   :  { %v10053_v35 = vpop.eup %9622  ;;  %v972_v21 = vsub.f32 %v10024_v57, %v956_v23  ;;  %v1138_v50 = vmul.f32 %v9621_v33, %v10009_v43  ;;  %v1152_v57 = vpack.c.bf16 %v1140_v7, %v1139_v56 }
 0x41c   :  { %v1085_v24 = vrot.slane %v1084_v3, 2  ;;  %v1068_v4 = vsel %vm844_vm8, %v10053_v35, 0.0  ;;  %9626 = vpow2.f32 %v997_v0  ;;  %v942_v1 = vmax.f32 %v940_v10, %v941_v11 }
 0x41d   :  { %v1069_v28 = vrot.slane %v1068_v4, 4  ;;  %v1003_v54 = vmul.f32 1.442695, %v972_v21  ;;  %v1151_v31 = vpack.c.bf16 %v1138_v50, %v1137_v19  ;;  %v1067_v45 = vadd.f32 %v1066_v34, %v1065_v63 }
 0x41e   :  { %v1086_v42 = vadd.f32 %v1085_v24, %v1084_v3  ;;  %v970_v30 = vsub.f32 %v10032_v22, %v942_v1 }
 0x41f   :  { %v1070_v49 = vadd.f32 %v1069_v28, %v1068_v4  ;;  %9628 = vpow2.f32 %v1003_v54  ;;  %9073 = vmatprep.mubr.msk.bf16.mxu0 %vm844_vm8, %v1151_v31 }
 0x420   :  { %v1087_v58 = vrot.slane %v1086_v42, 1  ;;  %v999_v43 = vmul.f32 1.442695, %v970_v30  ;;  %9630 = vrcp.f32 %v1081_v25  ;;  %9074 = vmatmul.mubr.msk.bf16.gmra.mrb[12].mxu0 %vm844_vm8, %v1152_v57 }
 0x421   :  { %v10063_v2 = vpop.eup %9624  ;;  %v1071_v52 = vrot.slane %v1070_v49, 2 }
 0x422   :  { %v1088_v38 = vadd.f32 %v1087_v58, %v1086_v42  ;;  %v1103_v41 = vsel %vm844_vm8, %v10063_v2, 0.0  ;;  %9632 = vpow2.f32 %v999_v43 }
 0x423   :  { %v1072_v46 = vadd.f32 %v1071_v52, %v1070_v49  ;;  %v1104_v22 = vrot.slane %v1103_v41, 4 }
 0x424   :  { %9634 = vrcp.f32 %v1088_v38 }
 0x425   :  { %v1073_v48 = vrot.slane %v1072_v46, 1  ;;  %v1105_v51 = vadd.f32 %v1104_v22, %v1103_v41  ;;  %9636 = vrcp.f32 %v1067_v45 }
 0x426   :  { %v9627_v15 = vpop.eup %9626 }
 0x427   :  { %v1074_v40 = vadd.f32 %v1073_v48, %v1072_v46  ;;  %v1106_v29 = vrot.slane %v1105_v51, 2  ;;  %v1089_v13 = vsel %vm844_vm8, %v9627_v15, 0.0 }
 0x428   :  { %v1090_v37 = vrot.slane %v1089_v13, 4 }
 0x429   :  { %v9629_v62 = vpop.eup %9628  ;;  %9638 = vrcp.f32 %v1074_v40  ;;  %v1107_v32 = vadd.f32 %v1106_v29, %v1105_v51  ;;  %v9278_v29 = vld [vmem:[%s7977_s3] sm:$0xff]  }
 0x42a   :  { %v1091_v27 = vadd.f32 %v1090_v37, %v1089_v13  ;;  %v1110_v10 = vsel %vm844_vm8, %v9629_v62, 0.0  ;;  %v9631_v6 = vpop.eup %9630  ;;  %9086 = vmatpush3.bf16.msra.mxu0 %v9278_v29  ;;  %v9281_v13 = vld [vmem:[%s7977_s3 + $0x18] sm:$0xff]   ;;  %v9282_v37 = vld [vmem:[%s7977_s3 + $0x20] sm:$0xff]  }
 0x42b   :  { %v1111_v23 = vrot.slane %v1110_v10, 4  ;;  %v1108_v33 = vrot.slane %v1107_v32, 1  ;;  %v1143_v50 = vmul.f32 %v9631_v6, %v10019_v61  ;;  %9087 = vmatprep.subr.bf16.mxu0 %v9739_v14  ;;  %v9728_v6 = vld [vmem:[%s9862_s25] sm:$0x7]  ;;  %s9755_s25 = smov 12  }
 0x42c   :  { %v9633_v47 = vpop.eup %9632  ;;  %v1092_v19 = vrot.slane %v1091_v27, 2  ;;  %s10319_s28 = sld [smem:[%s11162_s0 + %s9755_s25]]   ;;  %s9770_s25 = smov 27  }
 0x42d   :  { %v1112_v3 = vadd.f32 %v1111_v23, %v1110_v10  ;;  %v1096_v0 = vsel %vm844_vm8, %v9633_v47, 0.0  ;;  %v1109_v25 = vadd.f32 %v1108_v33, %v1107_v32  ;;  %v9284_v32 = vld [vmem:[%s7977_s3 + $0x30] sm:$0xff]   ;;  %v10093_v10 = vsub.s32 2, %v9864_v9 }
 0x42e   :  { %v9635_v11 = vpop.eup %9634  ;;  %v1093_v7 = vadd.f32 %v1092_v19, %v1091_v27  ;;  %v1097_v63 = vrot.slane %v1096_v0, 4  ;;  %v9285_v27 = vld [vmem:[%s7977_s3 + $0x38] sm:$0xff]  }
 0x42f   :  { %v1113_v21 = vrot.slane %v1112_v3, 2  ;;  %v1144_v56 = vmul.f32 %v9635_v11, %v10044_v55  ;;  %v9637_v1 = vpop.eup %9636  ;;  %9640 = vrcp.f32 %v1109_v25  ;;  %v10097_v23 = vrot.slane %v9728_v6, %v10093_v10 }
 0x430   :  { %v1094_v24 = vrot.slane %v1093_v7, 1  ;;  %v1098_v4 = vadd.f32 %v1097_v63, %v1096_v0  ;;  %v1141_v49 = vmul.f32 %v9637_v1, %v10034_v16 }
 0x431   :  { %v1114_v28 = vadd.f32 %v1113_v21, %v1112_v3  ;;  %v1154_v54 = vpack.c.bf16 %v1144_v56, %v1143_v50 }
 0x432   :  { %v1099_v31 = vrot.slane %v1098_v4, 2  ;;  %v1095_v57 = vadd.f32 %v1094_v24, %v1093_v7 }
 0x433   :  { %v9639_v42 = vpop.eup %9638  ;;  %v1115_v30 = vrot.slane %v1114_v28, 1 }
 0x434   :  { %v1100_v34 = vadd.f32 %v1099_v31, %v1098_v4  ;;  %v1142_v58 = vmul.f32 %v9639_v42, %v10053_v35 }
 0x435   :  { %v1116_v43 = vadd.f32 %v1115_v30, %v1114_v28 }
 0x436   :  { %v1101_v61 = vrot.slane %v1100_v34, 1  ;;  %v1153_v52 = vpack.c.bf16 %v1142_v58, %v1141_v49 }
 0x437   :  { %9642 = vrcp.f32 %v1116_v43 }
 0x438   :  { %9644 = vrcp.f32 %v1095_v57  ;;  %v1102_v55 = vadd.f32 %v1101_v61, %v1100_v34  ;;  %9077 = vmatprep.mubr.msk.bf16.mxu0 %vm844_vm8, %v1153_v52 }
 0x439   :  { %9078 = vmatmul.mubr.msk.bf16.gmra.mrb[16].mxu0 %vm844_vm8, %v1154_v54  ;;  %v9641_v38 = vpop.eup %9640 }
 0x43a   :  { %9646 = vrcp.f32 %v1102_v55  ;;  %v1147_v46 = vmul.f32 %v9641_v38, %v10063_v2  ;;  %v9279_v2 = vld [vmem:[%s7977_s3 + $0x8] sm:$0xff]  }
 0x43b   :  { %9088 = vmatpush3.bf16.msra.mxu0 %v9279_v2 }
 0x43c   :  { %9089 = vmatprep.subr.bf16.mxu0 %v9739_v14 }
 0x441   :  { %v9643_v41 = vpop.eup %9642 }
 0x442   :  { %v9645_v45 = vpop.eup %9644  ;;  %v1148_v16 = vmul.f32 %v9643_v41, %v9629_v62  ;;  %v9283_v62 = vld [vmem:[%s7977_s3 + $0x28] sm:$0xff]  }
 0x443   :  { %v1145_v48 = vmul.f32 %v9645_v45, %v9627_v15  ;;  %v9280_v15 = vld [vmem:[%s7977_s3 + $0x10] sm:$0xff]   ;;  %s7984_s3 = sld [smem:[%s11162_s0 + %s9756_s30]]   ;;  %s9771_s30 = smov 28  }
 0x444   :  { %v9647_v22 = vpop.eup %9646  ;;  %v1156_v35 = vpack.c.bf16 %v1148_v16, %v1147_v46  ;;  %9090 = vmatpush3.bf16.msra.mxu0 %v9280_v15 }
 0x445   :  { %v1146_v51 = vmul.f32 %v9647_v22, %v9633_v47  ;;  %9091 = vmatprep.subr.bf16.mxu0 %v9739_v14  ;;  %v473_v47 = vadd.f32 %v9877_v20, %v10097_v23 }
 0x447   :  { %v1155_v40 = vpack.c.bf16 %v1146_v51, %v1145_v48 }
 0x448   :  { %9092 = vmatpush3.bf16.msra.mxu0 %v9281_v13 }
 0x449   :  { %9081 = vmatprep.mubr.msk.bf16.mxu0 %vm844_vm8, %v1155_v40  ;;  %9093 = vmatprep.subr.bf16.mxu0 %v9739_v14 }
 0x44a   :  { %9082 = vmatmul.mubr.msk.bf16.gmra.mrb[20].mxu0 %vm844_vm8, %v1156_v35 }
 0x44b   :  { %9101 = vmatprep.mubr.msk.bf16.mxu0 %vm9741_vm1, %v9739_v14 }
 0x44c   :  { %9094 = vmatpush3.bf16.msra.mxu0 %v9282_v37 }
 0x44d   :  { %9095 = vmatprep.subr.bf16.mxu0 %v9739_v14 }
 0x450   :  { %9096 = vmatpush3.bf16.msra.mxu0 %v9283_v62 }
 0x451   :  { %9097 = vmatprep.subr.bf16.mxu0 %v9739_v14 }
 0x454   :  { %9098 = vmatpush3.bf16.msra.mxu0 %v9284_v32 }
 0x455   :  { %9099 = vmatprep.subr.bf16.mxu0 %v9739_v14 }
 0x458   :  { %9100 = vmatpush3.bf16.msra.mxu0 %v9285_v27 }
 0x4eb   :  { %v9071_v19 = vpop.f32.mrb[8].mxu0 }
 0x4ec   :  { %v1289_v33 = vmul.f32 %v9071_v19, %v473_v47  ;;  %v1224_v3 = vpop.f32.mrb[9].mxu0 }
 0x4ed   :  { %v1287_v0 = vmul.f32 %v1224_v3, %v473_v47  ;;  %v9072_v11 = vpop.f32.mrb[10].mxu0 }
 0x4ee   :  { %v1315_v7 = vrot.slane %v1289_v33, 4  ;;  %v1290_v63 = vmul.f32 %v9072_v11, %v473_v47  ;;  %v1227_v21 = vpop.f32.mrb[11].mxu0 }
 0x4ef   :  { %v1303_v50 = vrot.slane %v1287_v0, 4  ;;  %v1288_v56 = vmul.f32 %v1227_v21, %v473_v47 }
 0x4f0   :  { %v1316_v24 = vadd.f32 %v1315_v7, %v1289_v33  ;;  %v1321_v4 = vrot.slane %v1290_v63, 4 }
 0x4f1   :  { %v1304_v1 = vadd.f32 %v1303_v50, %v1287_v0  ;;  %v1309_v25 = vrot.slane %v1288_v56, 4 }
 0x4f2   :  { %v1317_v28 = vrot.slane %v1316_v24, 2  ;;  %v1322_v54 = vadd.f32 %v1321_v4, %v1290_v63 }
 0x4f3   :  { %v1305_v31 = vrot.slane %v1304_v1, 2  ;;  %v1310_v42 = vadd.f32 %v1309_v25, %v1288_v56  ;;  %v9075_v30 = vpop.f32.mrb[12].mxu0 }
 0x4f4   :  { %v1318_v20 = vadd.f32 %v1317_v28, %v1316_v24  ;;  %v1323_v57 = vrot.slane %v1322_v54, 2  ;;  %v1293_v34 = vmul.f32 %v9075_v30, %v473_v47  ;;  %v1240_v49 = vpop.f32.mrb[13].mxu0 }
 0x4f5   :  { %v1306_v58 = vadd.f32 %v1305_v31, %v1304_v1  ;;  %v1311_v43 = vrot.slane %v1310_v42, 2  ;;  %v1291_v61 = vmul.f32 %v1240_v49, %v473_v47  ;;  %v9076_v52 = vpop.f32.mrb[14].mxu0 }
 0x4f6   :  { %v1319_v55 = vrot.slane %v1318_v20, 1  ;;  %v1324_v38 = vadd.f32 %v1323_v57, %v1322_v54  ;;  %v1339_v41 = vrot.slane %v1293_v34, 4  ;;  %v1294_v45 = vmul.f32 %v9076_v52, %v473_v47  ;;  %v1243_v46 = vpop.f32.mrb[15].mxu0 }
 0x4f7   :  { %v1307_v16 = vrot.slane %v1306_v58, 1  ;;  %v1312_v22 = vadd.f32 %v1311_v43, %v1310_v42  ;;  %v1327_v35 = vrot.slane %v1291_v61, 4  ;;  %v1292_v48 = vmul.f32 %v1243_v46, %v473_v47 }
 0x4f8   :  { %v1320_v51 = vadd.f32 %v1319_v55, %v1318_v20  ;;  %v1325_v40 = vrot.slane %v1324_v38, 1  ;;  %v1340_v29 = vadd.f32 %v1339_v41, %v1293_v34  ;;  %v1345_v2 = vrot.slane %v1294_v45, 4 }
 0x4f9   :  { %v1308_v15 = vadd.f32 %v1307_v16, %v1306_v58  ;;  %v1313_v13 = vrot.slane %v1312_v22, 1  ;;  %v1328_v37 = vadd.f32 %v1327_v35, %v1291_v61  ;;  %v1333_v62 = vrot.slane %v1292_v48, 4 }
 0x4fa   :  { %v1326_v32 = vadd.f32 %v1325_v40, %v1324_v38  ;;  %v1341_v27 = vrot.slane %v1340_v29, 2  ;;  %v1346_v6 = vadd.f32 %v1345_v2, %v1294_v45  ;;  %v1401_v11 = vpack.c.bf16 %v1320_v51, %v1320_v51 }
 0x4fb   :  { %v1399_v19 = vpack.c.bf16 %v1308_v15, %v1308_v15  ;;  %v1314_v33 = vadd.f32 %v1313_v13, %v1312_v22  ;;  %v1329_v3 = vrot.slane %v1328_v37, 2  ;;  %v1334_v0 = vadd.f32 %v1333_v62, %v1292_v48 }
 0x4fc   :  { %v1342_v7 = vadd.f32 %v1341_v27, %v1340_v29  ;;  %v1347_v63 = vrot.slane %v1346_v6, 2  ;;  %v1402_v21 = vpack.c.bf16 %v1326_v32, %v1326_v32  ;;  %v1456_v31 = vunpack.c.l.b16 %v1401_v11 }
 0x4fd   :  { %v1400_v47 = vpack.c.bf16 %v1314_v33, %v1314_v33  ;;  %v1330_v50 = vadd.f32 %v1329_v3, %v1328_v37  ;;  %v1335_v56 = vrot.slane %v1334_v0, 2  ;;  %v1454_v1 = vunpack.c.l.b16 %v1399_v19 }
 0x4fe   :  { %v1343_v24 = vrot.slane %v1342_v7, 1  ;;  %v1348_v4 = vadd.f32 %v1347_v63, %v1346_v6  ;;  %v1457_v20 = vunpack.c.l.b16 %v1402_v21  ;;  %v476_v35 = vadd.f32 %v9880_v26, %v10097_v23 }
 0x4ff   :  { %v1455_v25 = vunpack.c.l.b16 %v1400_v47  ;;  %v1331_v28 = vrot.slane %v1330_v50, 1  ;;  %v1336_v54 = vadd.f32 %v1335_v56, %v1334_v0 }
 0x500   :  { %v1344_v42 = vadd.f32 %v1343_v24, %v1342_v7  ;;  %v1349_v30 = vrot.slane %v1348_v4, 1 }
 0x501   :  { %v1471_v57 = vsel %vm1470_vm9, %v1455_v25, %v1454_v1  ;;  %v1332_v34 = vadd.f32 %v1331_v28, %v1330_v50  ;;  %v1337_v49 = vrot.slane %v1336_v54, 1 }
 0x502   :  { %v1473_v58 = vsel %vm1472_vm10, %v1456_v31, %v1471_v57  ;;  %v1350_v43 = vadd.f32 %v1349_v30, %v1348_v4  ;;  %v1405_v38 = vpack.c.bf16 %v1344_v42, %v1344_v42 }
 0x503   :  { %v1403_v61 = vpack.c.bf16 %v1332_v34, %v1332_v34  ;;  %v1475_v52 = vsel %vm1474_vm11, %v1457_v20, %v1473_v58  ;;  %v1338_v55 = vadd.f32 %v1337_v49, %v1336_v54 }
 0x504   :  { %v1406_v45 = vpack.c.bf16 %v1350_v43, %v1350_v43  ;;  %v1460_v48 = vunpack.c.l.b16 %v1405_v38 }
 0x505   :  { %v1458_v41 = vunpack.c.l.b16 %v1403_v61  ;;  %v1404_v46 = vpack.c.bf16 %v1338_v55, %v1338_v55 }
 0x506   :  { %v1461_v51 = vunpack.c.l.b16 %v1406_v45 }
 0x507   :  { %v1477_v16 = vsel %vm1476_vm12, %v1458_v41, %v1475_v52  ;;  %v1459_v22 = vunpack.c.l.b16 %v1404_v46 }
 0x509   :  { %v1479_v40 = vsel %vm1478_vm13, %v1459_v22, %v1477_v16 }
 0x50a   :  { %v1481_v2 = vsel %vm1480_vm14, %v1460_v48, %v1479_v40 }
 0x50b   :  { %v10110_v32 = vsel %vm1482_vm15, %v1461_v51, %v1481_v2 }
 0x50c   :  { %v9079_v29 = vpop.f32.mrb[16].mxu0 }
 0x50d   :  { %v1297_v15 = vmul.f32 %v9079_v29, %v476_v35  ;;  %v1256_v13 = vpop.f32.mrb[17].mxu0 }
 0x50e   :  { %v1295_v37 = vmul.f32 %v1256_v13, %v476_v35  ;;  %v9080_v62 = vpop.f32.mrb[18].mxu0 }
 0x50f   :  { %v1363_v27 = vrot.slane %v1297_v15, 4  ;;  %v1298_v6 = vmul.f32 %v9080_v62, %v476_v35  ;;  %v1259_v19 = vpop.f32.mrb[19].mxu0 }
 0x510   :  { %v1351_v33 = vrot.slane %v1295_v37, 4  ;;  %v1296_v26 = vmul.f32 %v1259_v19, %v476_v35 }
 0x511   :  { %v1364_v23 = vadd.f32 %v1363_v27, %v1297_v15  ;;  %v1369_v3 = vrot.slane %v1298_v6, 4 }
 0x512   :  { %v1352_v0 = vadd.f32 %v1351_v33, %v1295_v37  ;;  %v1357_v11 = vrot.slane %v1296_v26, 4 }
 0x513   :  { %v1365_v7 = vrot.slane %v1364_v23, 2  ;;  %v1370_v63 = vadd.f32 %v1369_v3, %v1298_v6 }
 0x514   :  { %v1353_v21 = vrot.slane %v1352_v0, 2  ;;  %v1358_v47 = vadd.f32 %v1357_v11, %v1296_v26 }
 0x515   :  { %v1366_v50 = vadd.f32 %v1365_v7, %v1364_v23  ;;  %v1371_v56 = vrot.slane %v1370_v63, 2 }
 0x516   :  { %v1354_v24 = vadd.f32 %v1353_v21, %v1352_v0  ;;  %v1359_v4 = vrot.slane %v1358_v47, 2 }
 0x517   :  { %v1367_v1 = vrot.slane %v1366_v50, 1  ;;  %v1372_v25 = vadd.f32 %v1371_v56, %v1370_v63 }
 0x518   :  { %v1355_v28 = vrot.slane %v1354_v24, 1  ;;  %v1360_v54 = vadd.f32 %v1359_v4, %v1358_v47 }
 0x519   :  { %v1368_v31 = vadd.f32 %v1367_v1, %v1366_v50  ;;  %v1373_v42 = vrot.slane %v1372_v25, 1 }
 0x51a   :  { %v1356_v30 = vadd.f32 %v1355_v28, %v1354_v24  ;;  %v1361_v20 = vrot.slane %v1360_v54, 1 }
 0x51b   :  { %v1374_v57 = vadd.f32 %v1373_v42, %v1372_v25  ;;  %v1409_v58 = vpack.c.bf16 %v1368_v31, %v1368_v31 }
 0x51c   :  { %v1407_v34 = vpack.c.bf16 %v1356_v30, %v1356_v30  ;;  %v1362_v49 = vadd.f32 %v1361_v20, %v1360_v54 }
 0x51d   :  { %v9083_v43 = vpop.f32.mrb[20].mxu0  ;;  %v1410_v61 = vpack.c.bf16 %v1374_v57, %v1374_v57  ;;  %v1464_v40 = vunpack.c.l.b16 %v1409_v58 }
 0x51e   :  { %v1408_v52 = vpack.c.bf16 %v1362_v49, %v1362_v49  ;;  %v1301_v55 = vmul.f32 %v9083_v43, %v476_v35  ;;  %v1272_v38 = vpop.f32.mrb[21].mxu0  ;;  %v1462_v46 = vunpack.c.l.b16 %v1407_v34 }
 0x51f   :  { %v1299_v41 = vmul.f32 %v1272_v38, %v476_v35  ;;  %v9084_v45 = vpop.f32.mrb[22].mxu0  ;;  %v1465_v15 = vunpack.c.l.b16 %v1410_v61 }
 0x520   :  { %v1463_v16 = vunpack.c.l.b16 %v1408_v52  ;;  %v1387_v22 = vrot.slane %v1301_v55, 4  ;;  %v1302_v48 = vmul.f32 %v9084_v45, %v476_v35  ;;  %v1275_v51 = vpop.f32.mrb[23].mxu0 }
 0x521   :  { %v1375_v29 = vrot.slane %v1299_v41, 4  ;;  %v1300_v2 = vmul.f32 %v1275_v51, %v476_v35 }
 0x522   :  { %v1484_v13 = vsel %vm1470_vm9, %v1463_v16, %v1462_v46  ;;  %v1388_v37 = vadd.f32 %v1387_v22, %v1301_v55  ;;  %v1393_v62 = vrot.slane %v1302_v48, 4 }
 0x523   :  { %v1485_v27 = vsel %vm1472_vm10, %v1464_v40, %v1484_v13  ;;  %v1376_v6 = vadd.f32 %v1375_v29, %v1299_v41  ;;  %v1381_v19 = vrot.slane %v1300_v2, 4  ;;  %v8042_v41 = vld [vmem:[%s7978_s7] ss:$0 sm:$0xff]  ;;  %s10498_s7 = sld [smem:[%s11162_s0 + %s9757_s4]]   ;;  %s9772_s4 = smov 30  }
 0x524   :  { %v1389_v33 = vrot.slane %v1388_v37, 2  ;;  %v1486_v26 = vsel %vm1474_vm11, %v1465_v15, %v1485_v27  ;;  %v1394_v23 = vadd.f32 %v1393_v62, %v1302_v48  ;;  %v1630_v15 = vld [vmem:[%s10131_s11] sm:$0xff] }
 0x525   :  { %v1377_v3 = vrot.slane %v1376_v6, 2  ;;  %v1382_v0 = vadd.f32 %v1381_v19, %v1300_v2  ;;  %v1646_v13 = vld [vmem:[%s10131_s11 + $0x80] sm:$0xff] }
 0x526   :  { %v1390_v11 = vadd.f32 %v1389_v33, %v1388_v37  ;;  %v1395_v7 = vrot.slane %v1394_v23, 2 }
 0x527   :  { %v1378_v63 = vadd.f32 %v1377_v3, %v1376_v6  ;;  %v1383_v21 = vrot.slane %v1382_v0, 2 }
 0x528   :  { %v1391_v35 = vrot.slane %v1390_v11, 1  ;;  %v1396_v47 = vadd.f32 %v1395_v7, %v1394_v23 }
 0x529   :  { %v1379_v50 = vrot.slane %v1378_v63, 1  ;;  %v1384_v56 = vadd.f32 %v1383_v21, %v1382_v0 }
 0x52a   :  { %v1392_v24 = vadd.f32 %v1391_v35, %v1390_v11  ;;  %v1397_v4 = vrot.slane %v1396_v47, 1  ;;  %v1631_v35 = vld [vmem:[%s10131_s11 + $0x8] sm:$0xff] }
 0x52b   :  { %v1380_v1 = vadd.f32 %v1379_v50, %v1378_v63  ;;  %v1385_v25 = vrot.slane %v1384_v56, 1 }
 0x52c   :  { %v1398_v28 = vadd.f32 %v1397_v4, %v1396_v47  ;;  %v1413_v42 = vpack.c.bf16 %v1392_v24, %v1392_v24  ;;  %v1639_v47 = vld [vmem:[%s10131_s11 + $0x48] sm:$0xff] }
 0x52d   :  { %v1411_v54 = vpack.c.bf16 %v1380_v1, %v1380_v1  ;;  %v1386_v31 = vadd.f32 %v1385_v25, %v1384_v56  ;;  %v8056_v50 = vcombine.high %v1631_v35, %v1639_v47  ;;  %v8055_v56 = vcombine.low %v1631_v35, %v1639_v47  ;;  %v1647_v24 = vld [vmem:[%s10131_s11 + $0x88] sm:$0xff] }
 0x52e   :  { %v1414_v20 = vpack.c.bf16 %v1398_v28, %v1398_v28  ;;  %v1468_v58 = vunpack.c.l.b16 %v1413_v42  ;;  %v1655_v4 = vld [vmem:[%s10131_s11 + $0xc8] sm:$0xff]  ;;  %v1662_v28 = vld [vmem:[%s10131_s11 + $0x100] sm:$0xff] }
 0x52f   :  { %v1466_v30 = vunpack.c.l.b16 %v1411_v54  ;;  %v1412_v57 = vpack.c.bf16 %v1386_v31, %v1386_v31  ;;  %2336 = vmatprep.subr.bf16.mxu0 %v8056_v50  ;;  %v8072_v1 = vcombine.high %v1647_v24, %v1655_v4  ;;  %v8071_v25 = vcombine.low %v1647_v24, %v1655_v4  ;;  %v1670_v54 = vld [vmem:[%s10131_s11 + $0x140] sm:$0xff]  ;;  %v1663_v31 = vld [vmem:[%s10131_s11 + $0x108] sm:$0xff] }
 0x530   :  { %v1469_v43 = vunpack.c.l.b16 %v1414_v20  ;;  %v8086_v42 = vcombine.high %v1662_v28, %v1670_v54  ;;  %v8085_v20 = vcombine.low %v1662_v28, %v1670_v54  ;;  %v8051_v24 = vld [vmem:[%s7979_s20] ss:$0 sm:$0xff]  ;;  %s7996_s20 = sld [smem:[%s11162_s0 + %s9768_s18]]  }
 0x531   :  { %v1487_v34 = vsel %vm1476_vm12, %v1466_v30, %v1486_v26  ;;  %v1467_v49 = vunpack.c.l.b16 %v1412_v57  ;;  %v1671_v30 = vld [vmem:[%s10131_s11 + $0x148] sm:$0xff]  ;;  %v8052_v28 = vld [vmem:[%s7980_s24] ss:$0 sm:$0xff]  ;;  %s7999_s24 = sld [smem:[%s11162_s0 + %s9769_s21]]  }
 0x532   :  { %v8087_v57 = vcombine.low %v1663_v31, %v1671_v30 }
 0x533   :  { %v1488_v61 = vsel %vm1478_vm13, %v1467_v49, %v1487_v34  ;;  %v8088_v34 = vcombine.high %v1663_v31, %v1671_v30  ;;  %v1678_v49 = vld [vmem:[%s10131_s11 + $0x180] sm:$0xff]  ;;  %v1656_v30 = vld [vmem:[%s10131_s11 + $0xd0] sm:$0xff] }
 0x534   :  { %v1489_v52 = vsel %vm1480_vm14, %v1468_v58, %v1488_v61  ;;  %v1686_v58 = vld [vmem:[%s10131_s11 + $0x1c0] sm:$0xff] }
 0x535   :  { %v1490_v55 = vsel %vm1482_vm15, %v1469_v43, %v1489_v52  ;;  %v1679_v43 = vld [vmem:[%s10131_s11 + $0x188] sm:$0xff]  ;;  %v8102_v61 = vcombine.high %v1678_v49, %v1686_v58 }
 0x536   :  { %v1491_v38 = vpack.c.b16 %v1490_v55, %v10110_v32  ;;  %v1687_v52 = vld [vmem:[%s10131_s11 + $0x1c8] sm:$0xff]  ;;  %v8101_v55 = vcombine.low %v1678_v49, %v1686_v58 }
 0x538   :  { %9102 = vmatmul.mubr.bf16.vlgmr.msra.gmra.mrb[24].mxu0 %v1491_v38  ;;  %v8103_v38 = vcombine.low %v1679_v43, %v1687_v52 }
 0x539   :  { %2368 = vmatprep.mubr.bf16.mxu0 %v9743_v53  ;;  %2337 = vmatpush1.bf16.msra.mxu0 %v8055_v56 }
 0x53a   :  { %2338 = vmatprep.subr.bf16.mxu0 %v8072_v1 }
 0x53d   :  { %2339 = vmatpush1.bf16.msra.mxu0 %v8071_v25 }
 0x53e   :  { %2340 = vmatprep.subr.bf16.mxu0 %v8088_v34 }
 0x541   :  { %2341 = vmatpush1.bf16.msra.mxu0 %v8087_v57  ;;  %v1657_v57 = vld [vmem:[%s10131_s11 + $0xd8] sm:$0xff] }
 0x60b   :  { %v1575_v45 = vpop.f32.mrb[24].mxu0 }
 0x60c   :  { %v1576_v46 = vadd.f32 %v8042_v41, %v1575_v45  ;;  %v9103_v16 = vpop.f32.mrb[25].mxu0  ;;  %v1694_v45 = vld [vmem:[%s10131_s11 + $0x200] sm:$0xff] }
 0x60d   :  { %v1578_v22 = vpop.f32.mrb[26].mxu0  ;;  %v1695_v16 = vld [vmem:[%s10131_s11 + $0x208] sm:$0xff] }
 0x60e   :  { %v1579_v48 = vadd.f32 %v8042_v41, %v1578_v22  ;;  %v9104_v51 = vpop.f32.mrb[27].mxu0  ;;  %v1582_v40 = vadd.f32 %v1576_v46, %v9844_v59  ;;  %v1638_v59 = vld [vmem:[%s10131_s11 + $0x40] sm:$0xff]  ;;  %v8104_v41 = vcombine.high %v1679_v43, %v1687_v52  ;;  %v1664_v43 = vld [vmem:[%s10131_s11 + $0x110] sm:$0xff]  ;;  %v1673_v52 = vld [vmem:[%s10131_s11 + $0x158] sm:$0xff] }
 0x60f   :  { %v8053_v37 = vcombine.low %v1630_v15, %v1638_v59  ;;  %v8054_v62 = vcombine.high %v1630_v15, %v1638_v59  ;;  %v1702_v46 = vld [vmem:[%s10131_s11 + $0x240] sm:$0xff]  ;;  %v1711_v15 = vld [vmem:[%s10131_s11 + $0x288] sm:$0xff] }
 0x610   :  { %v1584_v29 = vsel %vm391_vm6, %v1582_v40, 0.0  ;;  %v1583_v32 = vadd.f32 %v1579_v48, %v9846_v60  ;;  %v1654_v60 = vld [vmem:[%s10131_s11 + $0xc0] sm:$0xff]  ;;  %2342 = vmatprep.subr.bf16.mxu0 %v8104_v41  ;;  %v8118_v22 = vcombine.high %v1694_v45, %v1702_v46  ;;  %v1703_v48 = vld [vmem:[%s10131_s11 + $0x248] sm:$0xff]  ;;  %v8117_v51 = vcombine.low %v1694_v45, %v1702_v46  ;;  %v1680_v46 = vld [vmem:[%s10131_s11 + $0x190] sm:$0xff] }
 0x611   :  { %1585 = vadd.xlane.f32.xlu0 %v1584_v29  ;;  %v8070_v27 = vcombine.high %v1646_v13, %v1654_v60  ;;  %2293 = vmatprep.subr.bf16.mxu1 %v8054_v62  ;;  %v8069_v6 = vcombine.low %v1646_v13, %v1654_v60  ;;  %v8120_v29 = vcombine.high %v1695_v16, %v1703_v48  ;;  %v1719_v13 = vld [vmem:[%s10131_s11 + $0x2c8] sm:$0xff] }
 0x612   :  { %v1587_v2 = vsel %vm391_vm6, %v1583_v32, 0.0  ;;  %2294 = vmatpush1.bf16.msra.mxu1 %v8053_v37  ;;  %2343 = vmatpush1.bf16.msra.mxu0 %v8103_v38  ;;  %v8135_v62 = vcombine.low %v1711_v15, %v1719_v13  ;;  %v8136_v60 = vcombine.high %v1711_v15, %v1719_v13  ;;  %v1704_v15 = vld [vmem:[%s10131_s11 + $0x250] sm:$0xff]  ;;  %v1705_v13 = vld [vmem:[%s10131_s11 + $0x258] sm:$0xff] }
 0x613   :  { %1588 = vadd.xlane.f32.xlu1 %v1587_v2  ;;  %2295 = vmatprep.subr.bf16.mxu1 %v8070_v27  ;;  %v1718_v2 = vld [vmem:[%s10131_s11 + $0x2c0] sm:$0xff]  ;;  %v1632_v27 = vld [vmem:[%s10131_s11 + $0x10] sm:$0xff] }
 0x614   :  { %2344 = vmatprep.subr.bf16.mxu0 %v8120_v29 }
 0x616   :  { %2296 = vmatpush1.bf16.msra.mxu1 %v8069_v6  ;;  %v1640_v6 = vld [vmem:[%s10131_s11 + $0x50] sm:$0xff] }
 0x617   :  { %2297 = vmatprep.subr.bf16.mxu1 %v8086_v42  ;;  %v1648_v42 = vld [vmem:[%s10131_s11 + $0x90] sm:$0xff] }
 0x618   :  { %v8073_v41 = vcombine.low %v1648_v42, %v1656_v30 }
 0x61a   :  { %2298 = vmatpush1.bf16.msra.mxu1 %v8085_v20  ;;  %v1649_v20 = vld [vmem:[%s10131_s11 + $0x98] sm:$0xff] }
 0x61b   :  { %2299 = vmatprep.subr.bf16.mxu1 %v8102_v61  ;;  %v1665_v61 = vld [vmem:[%s10131_s11 + $0x118] sm:$0xff]  ;;  %v8076_v38 = vcombine.high %v1649_v20, %v1657_v57  ;;  %v8075_v45 = vcombine.low %v1649_v20, %v1657_v57 }
 0x61e   :  { %2300 = vmatpush1.bf16.msra.mxu1 %v8101_v55  ;;  %v8074_v55 = vcombine.high %v1648_v42, %v1656_v30 }
 0x61f   :  { %2301 = vmatprep.subr.bf16.mxu1 %v8118_v22  ;;  %v1681_v22 = vld [vmem:[%s10131_s11 + $0x198] sm:$0xff] }
 0x622   :  { %2302 = vmatpush1.bf16.msra.mxu1 %v8117_v51 }
 0x69e   :  { %v1586_v19 = vpop.xlane.xlu0 %1585 }
 0x69f   :  { %v1591_v33 = vmul.f32 0.010416667, %v1586_v19  ;;  %v1633_v19 = vld [vmem:[%s10131_s11 + $0x18] sm:$0xff] }
 0x6a0   :  { %v1589_v26 = vpop.xlane.xlu1 %1588 }
 0x6a1   :  { %v10137_v23 = vsub.f32 %v1582_v40, %v1591_v33  ;;  %v1592_v3 = vmul.f32 0.010416667, %v1589_v26  ;;  %v8119_v40 = vcombine.low %v1695_v16, %v1703_v48  ;;  %v8058_v33 = vcombine.high %v1632_v27, %v1640_v6  ;;  %v1641_v26 = vld [vmem:[%s10131_s11 + $0x58] sm:$0xff]  ;;  %v1688_v16 = vld [vmem:[%s10131_s11 + $0x1d0] sm:$0xff] }
 0x6a2   :  { %v1689_v48 = vld [vmem:[%s10131_s11 + $0x1d8] sm:$0xff] }
 0x6a3   :  { %v10139_v0 = vsub.f32 %v1583_v32, %v1592_v3  ;;  %v1595_v11 = vmul.f32 %v10137_v23, %v10137_v23  ;;  %v1710_v32 = vld [vmem:[%s10131_s11 + $0x280] sm:$0xff]  ;;  %2345 = vmatpush1.bf16.msra.mxu0 %v8119_v40  ;;  %v8057_v3 = vcombine.low %v1632_v27, %v1640_v6  ;;  %v8092_v40 = vcombine.high %v1665_v61, %v1673_v52  ;;  %v1712_v6 = vld [vmem:[%s10131_s11 + $0x290] sm:$0xff] }
 0x6a4   :  { %v8134_v59 = vcombine.high %v1710_v32, %v1718_v2  ;;  %v8133_v37 = vcombine.low %v1710_v32, %v1718_v2  ;;  %2346 = vmatprep.subr.bf16.mxu0 %v8136_v60  ;;  %v8091_v32 = vcombine.low %v1665_v61, %v1673_v52  ;;  %v1696_v2 = vld [vmem:[%s10131_s11 + $0x210] sm:$0xff]  ;;  %v8105_v60 = vcombine.low %v1680_v46, %v1688_v16  ;;  %v1675_v61 = vld [vmem:[%s10131_s11 + $0x168] sm:$0xff] }
 0x6a5   :  { %v1597_v7 = vsel %vm391_vm6, %v1595_v11, 0.0  ;;  %v1596_v63 = vmul.f32 %v10139_v0, %v10139_v0  ;;  %v8059_v11 = vcombine.low %v1633_v19, %v1641_v26  ;;  %v8107_v27 = vcombine.low %v1681_v22, %v1689_v48 }
 0x6a6   :  { %1598 = vadd.xlane.f32.xlu0 %v1597_v7  ;;  %2303 = vmatprep.subr.bf16.mxu1 %v8134_v59  ;;  %v8060_v7 = vcombine.high %v1633_v19, %v1641_v26  ;;  %v1697_v59 = vld [vmem:[%s10131_s11 + $0x218] sm:$0xff]  ;;  %v1720_v19 = vld [vmem:[%s10131_s11 + $0x2d0] sm:$0xff] }
 0x6a7   :  { %v1600_v21 = vsel %vm391_vm6, %v1596_v63, 0.0  ;;  %2304 = vmatpush1.bf16.msra.mxu1 %v8133_v37  ;;  %2347 = vmatpush1.bf16.msra.mxu0 %v8135_v62  ;;  %v8106_v37 = vcombine.high %v1680_v46, %v1688_v16  ;;  %v8108_v62 = vcombine.high %v1681_v22, %v1689_v48  ;;  %v1721_v26 = vld [vmem:[%s10131_s11 + $0x2d8] sm:$0xff]  ;;  %v1690_v46 = vld [vmem:[%s10131_s11 + $0x1e0] sm:$0xff]  ;;  %v1683_v16 = vld [vmem:[%s10131_s11 + $0x1a8] sm:$0xff] }
 0x6a8   :  { %1601 = vadd.xlane.f32.xlu1 %v1600_v21  ;;  %2379 = vmatprep.subr.bf16.mxu1 %v8058_v33  ;;  %v1713_v33 = vld [vmem:[%s10131_s11 + $0x298] sm:$0xff]  ;;  %v1691_v22 = vld [vmem:[%s10131_s11 + $0x1e8] sm:$0xff] }
 0x6a9   :  { %2422 = vmatprep.subr.bf16.mxu0 %v8060_v7  ;;  %v8121_v7 = vcombine.low %v1696_v2, %v1704_v15 }
 0x733   :  { %v1599_v63 = vpop.xlane.xlu0 %1598 }
 0x734   :  { %v1603_v21 = vmul.f32 0.010416667, %v1599_v63  ;;  %v8123_v63 = vcombine.low %v1697_v59, %v1705_v13 }
 0x735   :  { %v1602_v35 = vpop.xlane.xlu1 %1601 }
 0x736   :  { %v1605_v47 = vadd.f32 1e-05, %v1603_v21  ;;  %v1604_v50 = vmul.f32 0.010416667, %v1602_v35  ;;  %v1634_v21 = vld [vmem:[%s10131_s11 + $0x20] sm:$0xff] }
 0x737   :  { %v1642_v35 = vld [vmem:[%s10131_s11 + $0x60] sm:$0xff] }
 0x738   :  { %9648 = vrsqrt.f32 %v1605_v47  ;;  %v1606_v56 = vadd.f32 1e-05, %v1604_v50  ;;  %v1635_v47 = vld [vmem:[%s10131_s11 + $0x28] sm:$0xff]  ;;  %v8062_v42 = vcombine.high %v1634_v21, %v1642_v35  ;;  %v8061_v20 = vcombine.low %v1634_v21, %v1642_v35  ;;  %v1644_v21 = vld [vmem:[%s10131_s11 + $0x70] sm:$0xff]  ;;  %v1637_v35 = vld [vmem:[%s10131_s11 + $0x38] sm:$0xff] }
 0x739   :  { %v1643_v50 = vld [vmem:[%s10131_s11 + $0x68] sm:$0xff] }
 0x73a   :  { %9650 = vrsqrt.f32 %v1606_v56  ;;  %v8138_v56 = vcombine.high %v1712_v6, %v1720_v19  ;;  %v8064_v30 = vcombine.high %v1635_v47, %v1643_v50  ;;  %v8063_v57 = vcombine.low %v1635_v47, %v1643_v50  ;;  %v1645_v47 = vld [vmem:[%s10131_s11 + $0x78] sm:$0xff] }
 0x742   :  { %v9649_v4 = vpop.eup %9648 }
 0x743   :  { %v1609_v1 = vmul.f32 %v9649_v4, %v10137_v23  ;;  %v1672_v23 = vld [vmem:[%s10131_s11 + $0x150] sm:$0xff]  ;;  %v8137_v4 = vcombine.low %v1712_v6, %v1720_v19  ;;  %v1722_v6 = vld [vmem:[%s10131_s11 + $0x2e0] sm:$0xff]  ;;  %v1715_v19 = vld [vmem:[%s10131_s11 + $0x2a8] sm:$0xff] }
 0x744   :  { %v9651_v25 = vpop.eup %9650  ;;  %v8090_v51 = vcombine.high %v1664_v43, %v1672_v23  ;;  %v8089_v29 = vcombine.low %v1664_v43, %v1672_v23  ;;  %v1674_v43 = vld [vmem:[%s10131_s11 + $0x160] sm:$0xff]  ;;  %v1667_v23 = vld [vmem:[%s10131_s11 + $0x128] sm:$0xff] }
 0x745   :  { %v1618_v54 = vmul.f32 %v8051_v24, %v1609_v1  ;;  %v1610_v31 = vmul.f32 %v9651_v25, %v10139_v0  ;;  %v8139_v1 = vcombine.low %v1713_v33, %v1721_v26  ;;  %v1650_v25 = vld [vmem:[%s10131_s11 + $0xa0] sm:$0xff] }
 0x747   :  { %v1619_v34 = vmul.f32 %v8051_v24, %v1610_v31  ;;  %v10188_v49 = vadd.f32 %v8052_v28, %v1618_v54  ;;  %v8140_v24 = vcombine.high %v1713_v33, %v1721_v26  ;;  %v1651_v54 = vld [vmem:[%s10131_s11 + $0xa8] sm:$0xff] }
 0x748   :  { %v1659_v31 = vld [vmem:[%s10131_s11 + $0xe8] sm:$0xff] }
 0x749   :  { %v10190_v58 = vadd.f32 %v8052_v28, %v1619_v34  ;;  %v1658_v28 = vld [vmem:[%s10131_s11 + $0xe0] sm:$0xff]  ;;  %v1723_v33 = vld [vmem:[%s10131_s11 + $0x2e8] sm:$0xff] }
 0x74a   :  { %v1666_v34 = vld [vmem:[%s10131_s11 + $0x120] sm:$0xff]  ;;  %v8078_v52 = vcombine.high %v1650_v25, %v1658_v28 }
 0x74b   :  { %v10198_v0 = vpack.c.bf16 %v10190_v58, %v10188_v49  ;;  %v8094_v48 = vcombine.high %v1666_v34, %v1674_v43 }
 0x74d   :  { %8149 = vmatmul.mubr.msk.bf16.vlgmr.msra.gmra.mrb[20].mxu1 %vm391_vm6, %v10198_v0  ;;  %8150 = vmatmul.mubr.msk.bf16.vlgmr.msra.gmra.mrb[28].mxu0 %vm391_vm6, %v10198_v0 }
 0x74e   :  { %2380 = vmatpush1.bf16.msra.mxu1 %v8057_v3  ;;  %2423 = vmatpush1.bf16.msra.mxu0 %v8059_v11  ;;  %v8122_v3 = vcombine.high %v1696_v2, %v1704_v15  ;;  %v8124_v11 = vcombine.high %v1697_v59, %v1705_v13  ;;  %v1706_v2 = vld [vmem:[%s10131_s11 + $0x260] sm:$0xff]  ;;  %v1699_v15 = vld [vmem:[%s10131_s11 + $0x228] sm:$0xff] }
 0x74f   :  { %2381 = vmatprep.subr.bf16.mxu1 %v8074_v55  ;;  %2424 = vmatprep.subr.bf16.mxu0 %v8076_v38  ;;  %v8080_v55 = vcombine.high %v1651_v54, %v1659_v31  ;;  %v8077_v38 = vcombine.low %v1650_v25, %v1658_v28  ;;  %v1707_v59 = vld [vmem:[%s10131_s11 + $0x268] sm:$0xff]  ;;  %v1660_v25 = vld [vmem:[%s10131_s11 + $0xf0] sm:$0xff]  ;;  %v1653_v28 = vld [vmem:[%s10131_s11 + $0xb8] sm:$0xff] }
 0x750   :  { %2411 = vmatprep.mubr.bf16.mxu1 %v9743_v53  ;;  %2454 = vmatprep.mubr.bf16.mxu0 %v9743_v53 }
 0x752   :  { %2382 = vmatpush1.bf16.msra.mxu1 %v8073_v41  ;;  %2425 = vmatpush1.bf16.msra.mxu0 %v8075_v45  ;;  %v8079_v41 = vcombine.low %v1651_v54, %v1659_v31  ;;  %v1682_v45 = vld [vmem:[%s10131_s11 + $0x1a0] sm:$0xff]  ;;  %v1661_v54 = vld [vmem:[%s10131_s11 + $0xf8] sm:$0xff] }
 0x753   :  { %2383 = vmatprep.subr.bf16.mxu1 %v8090_v51  ;;  %2426 = vmatprep.subr.bf16.mxu0 %v8092_v40  ;;  %v8096_v51 = vcombine.high %v1667_v23, %v1675_v61  ;;  %v8093_v40 = vcombine.low %v1666_v34, %v1674_v43  ;;  %v8110_v13 = vcombine.high %v1682_v45, %v1690_v46  ;;  %v1668_v43 = vld [vmem:[%s10131_s11 + $0x130] sm:$0xff] }
 0x754   :  { %v8084_v34 = vcombine.high %v1653_v28, %v1661_v54 }
 0x756   :  { %2384 = vmatpush1.bf16.msra.mxu1 %v8089_v29  ;;  %2427 = vmatpush1.bf16.msra.mxu0 %v8091_v32  ;;  %v8095_v29 = vcombine.low %v1667_v23, %v1675_v61  ;;  %v1698_v32 = vld [vmem:[%s10131_s11 + $0x220] sm:$0xff]  ;;  %v1676_v23 = vld [vmem:[%s10131_s11 + $0x170] sm:$0xff]  ;;  %v1669_v61 = vld [vmem:[%s10131_s11 + $0x138] sm:$0xff] }
 0x757   :  { %2385 = vmatprep.subr.bf16.mxu1 %v8106_v37  ;;  %2428 = vmatprep.subr.bf16.mxu0 %v8108_v62  ;;  %v8112_v37 = vcombine.high %v1683_v16, %v1691_v22  ;;  %v8109_v62 = vcombine.low %v1682_v45, %v1690_v46  ;;  %v8126_v26 = vcombine.high %v1698_v32, %v1706_v2  ;;  %v1684_v46 = vld [vmem:[%s10131_s11 + $0x1b0] sm:$0xff] }
 0x75a   :  { %2386 = vmatpush1.bf16.msra.mxu1 %v8105_v60  ;;  %2429 = vmatpush1.bf16.msra.mxu0 %v8107_v27  ;;  %v8111_v60 = vcombine.low %v1683_v16, %v1691_v22  ;;  %v1714_v27 = vld [vmem:[%s10131_s11 + $0x2a0] sm:$0xff]  ;;  %v1692_v16 = vld [vmem:[%s10131_s11 + $0x1f0] sm:$0xff]  ;;  %v1685_v22 = vld [vmem:[%s10131_s11 + $0x1b8] sm:$0xff] }
 0x75b   :  { %2387 = vmatprep.subr.bf16.mxu1 %v8122_v3  ;;  %2430 = vmatprep.subr.bf16.mxu0 %v8124_v11  ;;  %v8128_v3 = vcombine.high %v1699_v15, %v1707_v59  ;;  %v8125_v11 = vcombine.low %v1698_v32, %v1706_v2  ;;  %v8142_v50 = vcombine.high %v1714_v27, %v1722_v6  ;;  %v1700_v2 = vld [vmem:[%s10131_s11 + $0x230] sm:$0xff] }
 0x75e   :  { %2388 = vmatpush1.bf16.msra.mxu1 %v8121_v7  ;;  %2431 = vmatpush1.bf16.msra.mxu0 %v8123_v63  ;;  %v8127_v7 = vcombine.low %v1699_v15, %v1707_v59  ;;  %v1636_v63 = vld [vmem:[%s10131_s11 + $0x30] sm:$0xff]  ;;  %v1701_v59 = vld [vmem:[%s10131_s11 + $0x238] sm:$0xff] }
 0x75f   :  { %2389 = vmatprep.subr.bf16.mxu1 %v8138_v56  ;;  %2432 = vmatprep.subr.bf16.mxu0 %v8140_v24  ;;  %v8144_v56 = vcombine.high %v1715_v19, %v1723_v33  ;;  %v8141_v24 = vcombine.low %v1714_v27, %v1722_v6  ;;  %v8066_v31 = vcombine.high %v1636_v63, %v1644_v21  ;;  %v1708_v15 = vld [vmem:[%s10131_s11 + $0x270] sm:$0xff] }
 0x760   :  { %v1716_v6 = vld [vmem:[%s10131_s11 + $0x2b0] sm:$0xff] }
 0x762   :  { %2390 = vmatpush1.bf16.msra.mxu1 %v8137_v4  ;;  %2433 = vmatpush1.bf16.msra.mxu0 %v8139_v1  ;;  %v8143_v4 = vcombine.low %v1715_v19, %v1723_v33  ;;  %v1652_v1 = vld [vmem:[%s10131_s11 + $0xb0] sm:$0xff]  ;;  %v1717_v33 = vld [vmem:[%s10131_s11 + $0x2b8] sm:$0xff] }
 0x763   :  { %2465 = vmatprep.subr.bf16.mxu1 %v8062_v42  ;;  %2508 = vmatprep.subr.bf16.mxu0 %v8064_v30  ;;  %v8068_v42 = vcombine.high %v1637_v35, %v1645_v47  ;;  %v8065_v30 = vcombine.low %v1636_v63, %v1644_v21  ;;  %v1724_v19 = vld [vmem:[%s10131_s11 + $0x2f0] sm:$0xff] }
 0x764   :  { %v8145_v21 = vcombine.low %v1716_v6, %v1724_v19 }
 0x765   :  { %8151 = vmatmul.mubr.msk.bf16.vlgmr.msra.gmra.mrb[24].mxu1 %vm391_vm6, %v10198_v0  ;;  %8152 = vmatmul.mubr.msk.bf16.vlgmr.msra.gmra.mrb[32].mxu0 %vm391_vm6, %v10198_v0 }
 0x766   :  { %2466 = vmatpush1.bf16.msra.mxu1 %v8061_v20  ;;  %2509 = vmatpush1.bf16.msra.mxu0 %v8063_v57  ;;  %v8067_v20 = vcombine.low %v1637_v35, %v1645_v47  ;;  %v8082_v57 = vcombine.high %v1652_v1, %v1660_v25  ;;  %v9286_v47 = vld [vmem:[%s10174_s15 + $0x40] sm:$0xff]  }
 0x767   :  { %2467 = vmatprep.subr.bf16.mxu1 %v8078_v52  ;;  %2510 = vmatprep.subr.bf16.mxu0 %v8080_v55  ;;  %v1677_v52 = vld [vmem:[%s10131_s11 + $0x178] sm:$0xff]  ;;  %v8081_v55 = vcombine.low %v1652_v1, %v1660_v25  ;;  %v9291_v1 = vld [vmem:[%s10174_s15 + $0xc8] sm:$0xff]  }
 0x768   :  { %2497 = vmatprep.mubr.bf16.mxu1 %v9743_v53  ;;  %2540 = vmatprep.mubr.bf16.mxu0 %v9743_v53  ;;  %v8100_v45 = vcombine.high %v1669_v61, %v1677_v52  ;;  %v9292_v25 = vld [vmem:[%s10174_s15 + $0x8] sm:$0xff]  }
 0x76a   :  { %2468 = vmatpush1.bf16.msra.mxu1 %v8077_v38  ;;  %2511 = vmatpush1.bf16.msra.mxu0 %v8079_v41  ;;  %v8083_v38 = vcombine.low %v1653_v28, %v1661_v54  ;;  %v8098_v41 = vcombine.high %v1668_v43, %v1676_v23  ;;  %v9293_v28 = vld [vmem:[%s10174_s15 + $0x88] sm:$0xff]   ;;  %v9294_v54 = vld [vmem:[%s10174_s15 + $0x50] sm:$0xff]  }
 0x76b   :  { %2469 = vmatprep.subr.bf16.mxu1 %v8094_v48  ;;  %2512 = vmatprep.subr.bf16.mxu0 %v8096_v51  ;;  %v1693_v48 = vld [vmem:[%s10131_s11 + $0x1f8] sm:$0xff]  ;;  %v8097_v51 = vcombine.low %v1668_v43, %v1676_v23  ;;  %v9302_v43 = vld [vmem:[%s10174_s15 + $0x60] sm:$0xff]  }
 0x76c   :  { %v8116_v32 = vcombine.high %v1685_v22, %v1693_v48  ;;  %v9303_v23 = vld [vmem:[%s10174_s15 + $0xe0] sm:$0xff]  }
 0x76e   :  { %2470 = vmatpush1.bf16.msra.mxu1 %v8093_v40  ;;  %2513 = vmatpush1.bf16.msra.mxu0 %v8095_v29  ;;  %v8099_v40 = vcombine.low %v1669_v61, %v1677_v52  ;;  %v8114_v29 = vcombine.high %v1684_v46, %v1692_v16  ;;  %v9304_v61 = vld [vmem:[%s10174_s15 + $0x20] sm:$0xff]  }
 0x76f   :  { %2471 = vmatprep.subr.bf16.mxu1 %v8110_v13  ;;  %2514 = vmatprep.subr.bf16.mxu0 %v8112_v37  ;;  %v1709_v13 = vld [vmem:[%s10131_s11 + $0x278] sm:$0xff]  ;;  %v8113_v37 = vcombine.low %v1684_v46, %v1692_v16  ;;  %v9305_v52 = vld [vmem:[%s10174_s15 + $0xa0] sm:$0xff]   ;;  %v9310_v46 = vld [vmem:[%s10174_s15 + $0x70] sm:$0xff]  }
 0x770   :  { %v8132_v27 = vcombine.high %v1701_v59, %v1709_v13  ;;  %v9311_v16 = vld [vmem:[%s10174_s15 + $0xf0] sm:$0xff]  }
 0x772   :  { %2472 = vmatpush1.bf16.msra.mxu1 %v8109_v62  ;;  %2515 = vmatpush1.bf16.msra.mxu0 %v8111_v60  ;;  %v8115_v62 = vcombine.low %v1685_v22, %v1693_v48  ;;  %v8130_v60 = vcombine.high %v1700_v2, %v1708_v15  ;;  %v9312_v22 = vld [vmem:[%s10174_s15 + $0x30] sm:$0xff]  }
 0x773   :  { %2473 = vmatprep.subr.bf16.mxu1 %v8126_v26  ;;  %2516 = vmatprep.subr.bf16.mxu0 %v8128_v3  ;;  %v1725_v26 = vld [vmem:[%s10131_s11 + $0x2f8] sm:$0xff]  ;;  %v8129_v3 = vcombine.low %v1700_v2, %v1708_v15  ;;  %v9313_v48 = vld [vmem:[%s10174_s15 + $0xb0] sm:$0xff]   ;;  %v9318_v2 = vld [vmem:[%s10174_s15 + $0x140] sm:$0xff]   ;;  %s7985_s11 = sld [smem:[%s11162_s0 + %s9758_s8]]   ;;  %s9773_s8 = smov 31  }
 0x774   :  { %v8148_v63 = vcombine.high %v1717_v33, %v1725_v26  ;;  %v8147_v35 = vcombine.low %v1717_v33, %v1725_v26  ;;  %v9319_v15 = vld [vmem:[%s10174_s15 + $0x1c0] sm:$0xff]  }
 0x776   :  { %2474 = vmatpush1.bf16.msra.mxu1 %v8125_v11  ;;  %2517 = vmatpush1.bf16.msra.mxu0 %v8127_v7  ;;  %v8131_v11 = vcombine.low %v1701_v59, %v1709_v13  ;;  %v8146_v7 = vcombine.high %v1716_v6, %v1724_v19  ;;  %v10322_v59 = vld [vmem:[%s10319_s28] sm:$0xff]  ;;  %v10325_v13 = vsub.s32 3, %v9864_v9 }
 0x777   :  { %2475 = vmatprep.subr.bf16.mxu1 %v8142_v50  ;;  %2518 = vmatprep.subr.bf16.mxu0 %v8144_v56  ;;  %v9287_v50 = vld [vmem:[%s10174_s15 + $0xc0] sm:$0xff]  }
 0x778   :  { %v9288_v56 = vld [vmem:[%s10174_s15] sm:$0xff]  }
 0x77a   :  { %2476 = vmatpush1.bf16.msra.mxu1 %v8141_v24  ;;  %2519 = vmatpush1.bf16.msra.mxu0 %v8143_v4  ;;  %v9289_v24 = vld [vmem:[%s10174_s15 + $0x80] sm:$0xff]   ;;  %v9290_v4 = vld [vmem:[%s10174_s15 + $0x48] sm:$0xff]  }
 0x77b   :  { %2551 = vmatprep.subr.bf16.mxu1 %v8066_v31  ;;  %2594 = vmatprep.subr.bf16.mxu0 %v8068_v42  ;;  %v9295_v31 = vld [vmem:[%s10174_s15 + $0xd0] sm:$0xff]  }
 0x77c   :  { %v9296_v42 = vld [vmem:[%s10174_s15 + $0x10] sm:$0xff]  }
 0x77d   :  { %8153 = vmatmul.mubr.msk.bf16.vlgmr.msra.gmra.mrb[28].mxu1 %vm391_vm6, %v10198_v0  ;;  %8154 = vmatmul.mubr.msk.bf16.vlgmr.msra.gmra.mrb[36].mxu0 %vm391_vm6, %v10198_v0 }
 0x77e   :  { %2552 = vmatpush1.bf16.msra.mxu1 %v8065_v30  ;;  %2595 = vmatpush1.bf16.msra.mxu0 %v8067_v20  ;;  %v9297_v30 = vld [vmem:[%s10174_s15 + $0x90] sm:$0xff]   ;;  %v9299_v20 = vld [vmem:[%s10174_s15 + $0xd8] sm:$0xff]  }
 0x77f   :  { %2553 = vmatprep.subr.bf16.mxu1 %v8082_v57  ;;  %2596 = vmatprep.subr.bf16.mxu0 %v8084_v34  ;;  %v9300_v57 = vld [vmem:[%s10174_s15 + $0x18] sm:$0xff]  }
 0x780   :  { %2583 = vmatprep.mubr.bf16.mxu1 %v9743_v53  ;;  %2626 = vmatprep.mubr.bf16.mxu0 %v9743_v53  ;;  %v9301_v34 = vld [vmem:[%s10174_s15 + $0x98] sm:$0xff]  }
 0x782   :  { %2554 = vmatpush1.bf16.msra.mxu1 %v8081_v55  ;;  %2597 = vmatpush1.bf16.msra.mxu0 %v8083_v38  ;;  %v9306_v55 = vld [vmem:[%s10174_s15 + $0x68] sm:$0xff]  }
 0x783   :  { %2555 = vmatprep.subr.bf16.mxu1 %v8098_v41  ;;  %2598 = vmatprep.subr.bf16.mxu0 %v8100_v45  ;;  %v9307_v38 = vld [vmem:[%s10174_s15 + $0xe8] sm:$0xff]  }
 0x784   :  { %v9308_v41 = vld [vmem:[%s10174_s15 + $0x28] sm:$0xff]  }
 0x785   :  { %v9309_v45 = vld [vmem:[%s10174_s15 + $0xa8] sm:$0xff]  }
 0x786   :  { %2556 = vmatpush1.bf16.msra.mxu1 %v8097_v51  ;;  %2599 = vmatpush1.bf16.msra.mxu0 %v8099_v40  ;;  %v9314_v51 = vld [vmem:[%s10174_s15 + $0x78] sm:$0xff]  }
 0x787   :  { %2557 = vmatprep.subr.bf16.mxu1 %v8114_v29  ;;  %2600 = vmatprep.subr.bf16.mxu0 %v8116_v32  ;;  %v9315_v40 = vld [vmem:[%s10174_s15 + $0xf8] sm:$0xff]  }
 0x788   :  { %v9316_v29 = vld [vmem:[%s10174_s15 + $0x38] sm:$0xff]  }
 0x789   :  { %v9317_v32 = vld [vmem:[%s10174_s15 + $0xb8] sm:$0xff]  }
 0x78a   :  { %2558 = vmatpush1.bf16.msra.mxu1 %v8113_v37  ;;  %2601 = vmatpush1.bf16.msra.mxu0 %v8115_v62  ;;  %v1733_v37 = vrot.slane %v10322_v59, %v9867_v12  ;;  %v1741_v62 = vrot.slane %v10322_v59, %v10093_v10 }
 0x78b   :  { %2559 = vmatprep.subr.bf16.mxu1 %v8130_v60  ;;  %2602 = vmatprep.subr.bf16.mxu0 %v8132_v27  ;;  %v1737_v60 = vrot.slane %v10322_v59, %v9872_v17  ;;  %v1745_v27 = vrot.slane %v10322_v59, %v10325_v13 }
 0x78e   :  { %2560 = vmatpush1.bf16.msra.mxu1 %v8129_v3  ;;  %2603 = vmatpush1.bf16.msra.mxu0 %v8131_v11 }
 0x78f   :  { %2561 = vmatprep.subr.bf16.mxu1 %v8146_v7  ;;  %2604 = vmatprep.subr.bf16.mxu0 %v8148_v63 }
 0x792   :  { %2562 = vmatpush1.bf16.msra.mxu1 %v8145_v21  ;;  %2605 = vmatpush1.bf16.msra.mxu0 %v8147_v35 }
 0x793   :  { %8613 = vmatprep.subr.bf16.mxu1 %v9286_v47  ;;  %8635 = vmatprep.subr.bf16.mxu0 %v9287_v50 }
 0x795   :  { %8155 = vmatmul.mubr.msk.bf16.vlgmr.msra.gmra.mrb[32].mxu1 %vm391_vm6, %v10198_v0  ;;  %8156 = vmatmul.mubr.msk.bf16.vlgmr.msra.gmra.mrb[40].mxu0 %vm391_vm6, %v10198_v0  ;;  %v9298_v0 = vld [vmem:[%s10174_s15 + $0x58] sm:$0xff]  }
 0x796   :  { %8614 = vmatpush3.bf16.msra.mxu1 %v9288_v56  ;;  %8636 = vmatpush3.bf16.msra.mxu0 %v9289_v24 }
 0x797   :  { %8615 = vmatprep.subr.bf16.mxu1 %v9290_v4  ;;  %8637 = vmatprep.subr.bf16.mxu0 %v9291_v1 }
 0x79a   :  { %8616 = vmatpush3.bf16.msra.mxu1 %v9292_v25  ;;  %8638 = vmatpush3.bf16.msra.mxu0 %v9293_v28 }
 0x79b   :  { %8617 = vmatprep.subr.bf16.mxu1 %v9294_v54  ;;  %8639 = vmatprep.subr.bf16.mxu0 %v9295_v31 }
 0x79e   :  { %8618 = vmatpush3.bf16.msra.mxu1 %v9296_v42  ;;  %8640 = vmatpush3.bf16.msra.mxu0 %v9297_v30 }
 0x79f   :  { %8619 = vmatprep.subr.bf16.mxu1 %v9298_v0  ;;  %8641 = vmatprep.subr.bf16.mxu0 %v9299_v20 }
 0x7a2   :  { %8620 = vmatpush3.bf16.msra.mxu1 %v9300_v57  ;;  %8642 = vmatpush3.bf16.msra.mxu0 %v9301_v34 }
 0x7a3   :  { %8621 = vmatprep.subr.bf16.mxu1 %v9302_v43  ;;  %8643 = vmatprep.subr.bf16.mxu0 %v9303_v23 }
 0x7a6   :  { %8622 = vmatpush3.bf16.msra.mxu1 %v9304_v61  ;;  %8644 = vmatpush3.bf16.msra.mxu0 %v9305_v52  ;;  %v9320_v61 = vld [vmem:[%s10174_s15 + $0x100] sm:$0xff]  }
 0x7a7   :  { %8623 = vmatprep.subr.bf16.mxu1 %v9306_v55  ;;  %8645 = vmatprep.subr.bf16.mxu0 %v9307_v38  ;;  %v9321_v52 = vld [vmem:[%s10174_s15 + $0x180] sm:$0xff]   ;;  %v9322_v55 = vld [vmem:[%s10174_s15 + $0x148] sm:$0xff]  }
 0x7a8   :  { %v9323_v38 = vld [vmem:[%s10174_s15 + $0x1c8] sm:$0xff]  }
 0x7aa   :  { %8624 = vmatpush3.bf16.msra.mxu1 %v9308_v41  ;;  %8646 = vmatpush3.bf16.msra.mxu0 %v9309_v45  ;;  %v9324_v41 = vld [vmem:[%s10174_s15 + $0x108] sm:$0xff]  }
 0x7ab   :  { %8625 = vmatprep.subr.bf16.mxu1 %v9310_v46  ;;  %8647 = vmatprep.subr.bf16.mxu0 %v9311_v16  ;;  %v9325_v45 = vld [vmem:[%s10174_s15 + $0x188] sm:$0xff]   ;;  %v9326_v46 = vld [vmem:[%s10174_s15 + $0x150] sm:$0xff]  }
 0x7ac   :  { %v9327_v16 = vld [vmem:[%s10174_s15 + $0x1d0] sm:$0xff]  }
 0x7ae   :  { %8626 = vmatpush3.bf16.msra.mxu1 %v9312_v22  ;;  %8648 = vmatpush3.bf16.msra.mxu0 %v9313_v48  ;;  %v9328_v22 = vld [vmem:[%s10174_s15 + $0x110] sm:$0xff]  }
 0x7af   :  { %8627 = vmatprep.subr.bf16.mxu1 %v9314_v51  ;;  %8649 = vmatprep.subr.bf16.mxu0 %v9315_v40  ;;  %v9329_v48 = vld [vmem:[%s10174_s15 + $0x190] sm:$0xff]   ;;  %v9330_v51 = vld [vmem:[%s10174_s15 + $0x158] sm:$0xff]  }
 0x7b0   :  { %v9331_v40 = vld [vmem:[%s10174_s15 + $0x1d8] sm:$0xff]  }
 0x7b2   :  { %8628 = vmatpush3.bf16.msra.mxu1 %v9316_v29  ;;  %8650 = vmatpush3.bf16.msra.mxu0 %v9317_v32  ;;  %v10348_v29 = vsub.s32 4, %v9864_v9  ;;  %v10351_v32 = vsub.s32 6, %v9864_v9 }
 0x7b3   :  { %8657 = vmatprep.subr.bf16.mxu1 %v9318_v2  ;;  %8679 = vmatprep.subr.bf16.mxu0 %v9319_v15  ;;  %v10354_v2 = vsub.s32 5, %v9864_v9  ;;  %v10357_v15 = vsub.s32 7, %v9864_v9 }
 0x7b5   :  { %v1753_v9 = vrot.slane %v10322_v59, %v10354_v2 }
 0x820   :  { %v2327_v6 = vpop.f32.mrb[20].mxu1  ;;  %v2370_v19 = vpop.f32.mrb[28].mxu0 }
 0x821   :  { %v2328_v33 = vadd.f32 %v2327_v6, %v1733_v37  ;;  %v2371_v26 = vadd.f32 %v2370_v19, %v1741_v62  ;;  %v2329_v3 = vpop.f32.mrb[21].mxu1  ;;  %v2372_v11 = vpop.f32.mrb[29].mxu0  ;;  %v9334_v6 = vld [vmem:[%s10174_s15 + $0x160] sm:$0xff]  }
 0x822   :  { %v2330_v7 = vadd.f32 %v2329_v3, %v1737_v60  ;;  %v2373_v63 = vadd.f32 %v2372_v11, %v1745_v27  ;;  %v2331_v21 = vpop.f32.mrb[22].mxu1  ;;  %v2374_v35 = vpop.f32.mrb[30].mxu0  ;;  %v9335_v19 = vld [vmem:[%s10174_s15 + $0x1e0] sm:$0xff]  }
 0x823   :  { %v2332_v47 = vadd.f32 %v2331_v21, %v1733_v37  ;;  %v2375_v50 = vadd.f32 %v2374_v35, %v1741_v62  ;;  %v2333_v56 = vpop.f32.mrb[23].mxu1  ;;  %v2376_v24 = vpop.f32.mrb[31].mxu0  ;;  %v2637_v25 = vmax.f32 %v2328_v33, 0.0  ;;  %v2639_v28 = vmax.f32 %v2371_v26, 0.0  ;;  %v9332_v37 = vld [vmem:[%s10174_s15 + $0x118] sm:$0xff]   ;;  %v9336_v11 = vld [vmem:[%s10174_s15 + $0x120] sm:$0xff]  }
 0x824   :  { %v2334_v4 = vadd.f32 %v2333_v56, %v1737_v60  ;;  %v2377_v1 = vadd.f32 %v2376_v24, %v1745_v27  ;;  %v2638_v42 = vmax.f32 %v2330_v7, 0.0  ;;  %v2640_v30 = vmax.f32 %v2373_v63, 0.0  ;;  %v9333_v62 = vld [vmem:[%s10174_s15 + $0x198] sm:$0xff]   ;;  %v9337_v7 = vld [vmem:[%s10174_s15 + $0x1a0] sm:$0xff]   ;;  %v9339_v56 = vld [vmem:[%s10174_s15 + $0x1e8] sm:$0xff]  }
 0x825   :  { %v2653_v54 = vmax.f32 %v2332_v47, 0.0  ;;  %v2655_v31 = vmax.f32 %v2375_v50, 0.0  ;;  %v1749_v60 = vrot.slane %v10322_v59, %v10348_v29  ;;  %v1757_v27 = vrot.slane %v10322_v59, %v10351_v32  ;;  %v9338_v50 = vld [vmem:[%s10174_s15 + $0x168] sm:$0xff]  }
 0x826   :  { %v2654_v0 = vmax.f32 %v2334_v4, 0.0  ;;  %v2656_v20 = vmax.f32 %v2377_v1, 0.0  ;;  %v1761_v33 = vrot.slane %v10322_v59, %v10357_v15 }
 0x827   :  { %v2669_v57 = vpack.c.bf16 %v2653_v54, %v2637_v25  ;;  %v2671_v34 = vpack.c.bf16 %v2655_v31, %v2639_v28 }
 0x828   :  { %v2670_v43 = vpack.c.bf16 %v2654_v0, %v2638_v42  ;;  %v2672_v23 = vpack.c.bf16 %v2656_v20, %v2640_v30  ;;  %v9340_v0 = vld [vmem:[%s10174_s15 + $0x128] sm:$0xff]  }
 0x829   :  { %v9341_v20 = vld [vmem:[%s10174_s15 + $0x1a8] sm:$0xff]  }
 0x82a   :  { %3748 = vmatprep.mubr.bf16.mxu1 %v2670_v43  ;;  %3789 = vmatprep.mubr.bf16.mxu0 %v2672_v23 }
 0x82b   :  { %3749 = vmatmul.mubr.bf16.vlgmr.msra.gmra.mrb[36].mxu1 %v2669_v57  ;;  %3790 = vmatmul.mubr.bf16.vlgmr.msra.gmra.mrb[44].mxu0 %v2671_v34 }
 0x82c   :  { %8658 = vmatpush3.bf16.msra.mxu1 %v9320_v61  ;;  %8680 = vmatpush3.bf16.msra.mxu0 %v9321_v52  ;;  %v9342_v61 = vld [vmem:[%s10174_s15 + $0x170] sm:$0xff]  }
 0x82d   :  { %8659 = vmatprep.subr.bf16.mxu1 %v9322_v55  ;;  %8681 = vmatprep.subr.bf16.mxu0 %v9323_v38  ;;  %v9343_v52 = vld [vmem:[%s10174_s15 + $0x1f0] sm:$0xff]  }
 0x830   :  { %8660 = vmatpush3.bf16.msra.mxu1 %v9324_v41  ;;  %8682 = vmatpush3.bf16.msra.mxu0 %v9325_v45 }
 0x831   :  { %8661 = vmatprep.subr.bf16.mxu1 %v9326_v46  ;;  %8683 = vmatprep.subr.bf16.mxu0 %v9327_v16 }
 0x834   :  { %8662 = vmatpush3.bf16.msra.mxu1 %v9328_v22  ;;  %8684 = vmatpush3.bf16.msra.mxu0 %v9329_v48 }
 0x835   :  { %8663 = vmatprep.subr.bf16.mxu1 %v9330_v51  ;;  %8685 = vmatprep.subr.bf16.mxu0 %v9331_v40  ;;  %v9344_v51 = vld [vmem:[%s10174_s15 + $0x130] sm:$0xff]  }
 0x836   :  { %v9345_v40 = vld [vmem:[%s10174_s15 + $0x1b0] sm:$0xff]  }
 0x838   :  { %v2413_v26 = vpop.f32.mrb[24].mxu1  ;;  %v2456_v3 = vpop.f32.mrb[32].mxu0  ;;  %8664 = vmatpush3.bf16.msra.mxu1 %v9332_v37  ;;  %8686 = vmatpush3.bf16.msra.mxu0 %v9333_v62  ;;  %v9346_v37 = vld [vmem:[%s10174_s15 + $0x178] sm:$0xff]  }
 0x839   :  { %v2414_v63 = vadd.f32 %v2413_v26, %v1749_v60  ;;  %v2457_v21 = vadd.f32 %v2456_v3, %v1757_v27  ;;  %v2415_v35 = vpop.f32.mrb[25].mxu1  ;;  %v2458_v47 = vpop.f32.mrb[33].mxu0  ;;  %8665 = vmatprep.subr.bf16.mxu1 %v9334_v6  ;;  %8687 = vmatprep.subr.bf16.mxu0 %v9335_v19  ;;  %v9347_v62 = vld [vmem:[%s10174_s15 + $0x1f8] sm:$0xff]   ;;  %v9350_v6 = vld [vmem:[%s10174_s15 + $0x240] sm:$0xff]   ;;  %v9354_v26 = vld [vmem:[%s10174_s15 + $0x248] sm:$0xff]  }
 0x83a   :  { %v2416_v24 = vadd.f32 %v2415_v35, %v1753_v9  ;;  %v2459_v4 = vadd.f32 %v2458_v47, %v1761_v33  ;;  %v2417_v1 = vpop.f32.mrb[26].mxu1  ;;  %v2460_v59 = vpop.f32.mrb[34].mxu0  ;;  %v9351_v19 = vld [vmem:[%s10174_s15 + $0x2c0] sm:$0xff]   ;;  %v9355_v3 = vld [vmem:[%s10174_s15 + $0x2c8] sm:$0xff]   ;;  %v9358_v47 = vld [vmem:[%s10174_s15 + $0x250] sm:$0xff]  }
 0x83b   :  { %v2418_v25 = vadd.f32 %v2417_v1, %v1749_v60  ;;  %v2461_v28 = vadd.f32 %v2460_v59, %v1757_v27  ;;  %v2419_v54 = vpop.f32.mrb[27].mxu1  ;;  %v2462_v31 = vpop.f32.mrb[35].mxu0  ;;  %v2641_v57 = vmax.f32 %v2414_v63, 0.0  ;;  %v2643_v34 = vmax.f32 %v2457_v21, 0.0  ;;  %v9348_v60 = vld [vmem:[%s10174_s15 + $0x138] sm:$0xff]   ;;  %v9357_v63 = vld [vmem:[%s10174_s15 + $0x288] sm:$0xff]  }
 0x83c   :  { %v2420_v42 = vadd.f32 %v2419_v54, %v1753_v9  ;;  %v2463_v30 = vadd.f32 %v2462_v31, %v1761_v33  ;;  %8666 = vmatpush3.bf16.msra.mxu1 %v9336_v11  ;;  %8688 = vmatpush3.bf16.msra.mxu0 %v9337_v7  ;;  %v2642_v55 = vmax.f32 %v2416_v24, 0.0  ;;  %v2644_v38 = vmax.f32 %v2459_v4, 0.0  ;;  %v9349_v27 = vld [vmem:[%s10174_s15 + $0x1b8] sm:$0xff]   ;;  %v9352_v9 = vld [vmem:[%s10174_s15 + $0x200] sm:$0xff]   ;;  %v10392_v11 = vld [vmem:[%s10319_s28 + $0x8] sm:$0xff]  ;;  %s7997_s28 = sld [smem:[%s11162_s0 + %s9770_s25]]  }
 0x83d   :  { %v2657_v43 = vmax.f32 %v2418_v25, 0.0  ;;  %v2659_v23 = vmax.f32 %v2461_v28, 0.0  ;;  %8667 = vmatprep.subr.bf16.mxu1 %v9338_v50  ;;  %8689 = vmatprep.subr.bf16.mxu0 %v9339_v56  ;;  %v9353_v33 = vld [vmem:[%s10174_s15 + $0x280] sm:$0xff]   ;;  %v9356_v7 = vld [vmem:[%s10174_s15 + $0x208] sm:$0xff]   ;;  %v1765_v21 = vrot.slane %v10392_v11, %v9867_v12  ;;  %v1773_v35 = vrot.slane %v10392_v11, %v10093_v10  ;;  %v9359_v50 = vld [vmem:[%s10174_s15 + $0x2d0] sm:$0xff]  }
 0x83e   :  { %v2658_v41 = vmax.f32 %v2420_v42, 0.0  ;;  %v2660_v45 = vmax.f32 %v2463_v30, 0.0  ;;  %v1769_v56 = vrot.slane %v10392_v11, %v9872_v17  ;;  %v1777_v24 = vrot.slane %v10392_v11, %v10325_v13  ;;  %v9360_v59 = vld [vmem:[%s10174_s15 + $0x210] sm:$0xff]   ;;  %v9362_v30 = vld [vmem:[%s10174_s15 + $0x258] sm:$0xff]  }
 0x83f   :  { %v2673_v46 = vpack.c.bf16 %v2657_v43, %v2641_v57  ;;  %v2675_v16 = vpack.c.bf16 %v2659_v23, %v2643_v34  ;;  %v9361_v25 = vld [vmem:[%s10174_s15 + $0x290] sm:$0xff]  }
 0x840   :  { %v2674_v22 = vpack.c.bf16 %v2658_v41, %v2642_v55  ;;  %v2676_v48 = vpack.c.bf16 %v2660_v45, %v2644_v38  ;;  %8668 = vmatpush3.bf16.msra.mxu1 %v9340_v0  ;;  %8690 = vmatpush3.bf16.msra.mxu0 %v9341_v20  ;;  %v9363_v0 = vld [vmem:[%s10174_s15 + $0x2d8] sm:$0xff]  }
 0x841   :  { %8669 = vmatprep.subr.bf16.mxu1 %v9342_v61  ;;  %8691 = vmatprep.subr.bf16.mxu0 %v9343_v52  ;;  %v9364_v45 = vld [vmem:[%s10174_s15 + $0x218] sm:$0xff]  }
 0x842   :  { %3830 = vmatprep.mubr.bf16.mxu1 %v2674_v22  ;;  %3871 = vmatprep.mubr.bf16.mxu0 %v2676_v48 }
 0x844   :  { %8670 = vmatpush3.bf16.msra.mxu1 %v9344_v51  ;;  %8692 = vmatpush3.bf16.msra.mxu0 %v9345_v40  ;;  %v9366_v40 = vld [vmem:[%s10174_s15 + $0x260] sm:$0xff]  }
 0x845   :  { %8671 = vmatprep.subr.bf16.mxu1 %v9346_v37  ;;  %8693 = vmatprep.subr.bf16.mxu0 %v9347_v62  ;;  %v9367_v37 = vld [vmem:[%s10174_s15 + $0x2e0] sm:$0xff]  }
 0x848   :  { %8672 = vmatpush3.bf16.msra.mxu1 %v9348_v60  ;;  %8694 = vmatpush3.bf16.msra.mxu0 %v9349_v27 }
 0x849   :  { %8701 = vmatprep.subr.bf16.mxu1 %v9350_v6  ;;  %8723 = vmatprep.subr.bf16.mxu0 %v9351_v19 }
 0x84b   :  { %3831 = vmatmul.mubr.bf16.vlgmr.msra.gmra.mrb[40].mxu1 %v2673_v46  ;;  %3872 = vmatmul.mubr.bf16.vlgmr.msra.gmra.mrb[48].mxu0 %v2675_v16  ;;  %v9365_v46 = vld [vmem:[%s10174_s15 + $0x298] sm:$0xff]  }
 0x84c   :  { %8702 = vmatpush3.bf16.msra.mxu1 %v9352_v9  ;;  %8724 = vmatpush3.bf16.msra.mxu0 %v9353_v33 }
 0x84d   :  { %8703 = vmatprep.subr.bf16.mxu1 %v9354_v26  ;;  %8725 = vmatprep.subr.bf16.mxu0 %v9355_v3  ;;  %v9368_v3 = vld [vmem:[%s10174_s15 + $0x220] sm:$0xff]  }
 0x850   :  { %v2499_v4 = vpop.f32.mrb[28].mxu1  ;;  %v2542_v1 = vpop.f32.mrb[36].mxu0  ;;  %8704 = vmatpush3.bf16.msra.mxu1 %v9356_v7  ;;  %8726 = vmatpush3.bf16.msra.mxu0 %v9357_v63  ;;  %v9369_v7 = vld [vmem:[%s10174_s15 + $0x2a0] sm:$0xff]   ;;  %v9370_v63 = vld [vmem:[%s10174_s15 + $0x268] sm:$0xff]  }
 0x851   :  { %v2500_v28 = vadd.f32 %v2499_v4, %v1765_v21  ;;  %v2543_v54 = vadd.f32 %v2542_v1, %v1773_v35  ;;  %v2501_v31 = vpop.f32.mrb[29].mxu1  ;;  %v2544_v42 = vpop.f32.mrb[37].mxu0  ;;  %8705 = vmatprep.subr.bf16.mxu1 %v9358_v47  ;;  %8727 = vmatprep.subr.bf16.mxu0 %v9359_v50  ;;  %v9373_v47 = vld [vmem:[%s10174_s15 + $0x2a8] sm:$0xff]   ;;  %v9374_v50 = vld [vmem:[%s10174_s15 + $0x270] sm:$0xff]   ;;  %v9378_v1 = vld [vmem:[%s10174_s15 + $0x278] sm:$0xff]  }
 0x852   :  { %v2502_v20 = vadd.f32 %v2501_v31, %v1769_v56  ;;  %v2545_v57 = vadd.f32 %v2544_v42, %v1777_v24  ;;  %v2503_v34 = vpop.f32.mrb[30].mxu1  ;;  %v2546_v43 = vpop.f32.mrb[38].mxu0  ;;  %v9377_v4 = vld [vmem:[%s10174_s15 + $0x2b0] sm:$0xff]   ;;  %v1789_v31 = vrot.slane %v10392_v11, %v10351_v32  ;;  %v9382_v42 = vld [vmem:[%s10174_s15 + $0x340] sm:$0xff]  }
 0x853   :  { %v2504_v23 = vadd.f32 %v2503_v34, %v1765_v21  ;;  %v2547_v61 = vadd.f32 %v2546_v43, %v1773_v35  ;;  %v2505_v52 = vpop.f32.mrb[31].mxu1  ;;  %v2548_v55 = vpop.f32.mrb[39].mxu0  ;;  %v2645_v16 = vmax.f32 %v2500_v28, 0.0  ;;  %v2647_v22 = vmax.f32 %v2543_v54, 0.0  ;;  %v9371_v21 = vld [vmem:[%s10174_s15 + $0x2e8] sm:$0xff]   ;;  %v9381_v28 = vld [vmem:[%s10174_s15 + $0x2b8] sm:$0xff]  }
 0x854   :  { %v2506_v38 = vadd.f32 %v2505_v52, %v1769_v56  ;;  %v2549_v41 = vadd.f32 %v2548_v55, %v1777_v24  ;;  %8706 = vmatpush3.bf16.msra.mxu1 %v9360_v59  ;;  %8728 = vmatpush3.bf16.msra.mxu0 %v9361_v25  ;;  %v2646_v62 = vmax.f32 %v2502_v20, 0.0  ;;  %v2648_v60 = vmax.f32 %v2545_v57, 0.0  ;;  %v9372_v35 = vld [vmem:[%s10174_s15 + $0x228] sm:$0xff]   ;;  %v9375_v56 = vld [vmem:[%s10174_s15 + $0x2f0] sm:$0xff]   ;;  %v9379_v59 = vld [vmem:[%s10174_s15 + $0x2f8] sm:$0xff]  }
 0x855   :  { %v2661_v48 = vmax.f32 %v2504_v23, 0.0  ;;  %v2663_v51 = vmax.f32 %v2547_v61, 0.0  ;;  %8707 = vmatprep.subr.bf16.mxu1 %v9362_v30  ;;  %8729 = vmatprep.subr.bf16.mxu0 %v9363_v0  ;;  %v9376_v24 = vld [vmem:[%s10174_s15 + $0x230] sm:$0xff]   ;;  %v9380_v25 = vld [vmem:[%s10174_s15 + $0x238] sm:$0xff]   ;;  %v1781_v54 = vrot.slane %v10392_v11, %v10348_v29  ;;  %v9383_v30 = vld [vmem:[%s10174_s15 + $0x3c0] sm:$0xff]   ;;  %v1785_v0 = vrot.slane %v10392_v11, %v10354_v2 }
 0x856   :  { %v2662_v27 = vmax.f32 %v2506_v38, 0.0  ;;  %v2664_v6 = vmax.f32 %v2549_v41, 0.0  ;;  %v1793_v20 = vrot.slane %v10392_v11, %v10357_v15  ;;  %v9384_v43 = vld [vmem:[%s10174_s15 + $0x300] sm:$0xff]   ;;  %v9386_v41 = vld [vmem:[%s10174_s15 + $0x348] sm:$0xff]  }
 0x857   :  { %v10414_v19 = vpack.c.bf16 %v2661_v48, %v2645_v16  ;;  %v10416_v9 = vpack.c.bf16 %v2663_v51, %v2647_v22  ;;  %v9385_v23 = vld [vmem:[%s10174_s15 + $0x380] sm:$0xff]  }
 0x858   :  { %v2678_v33 = vpack.c.bf16 %v2662_v27, %v2646_v62  ;;  %v2680_v26 = vpack.c.bf16 %v2664_v6, %v2648_v60  ;;  %8708 = vmatpush3.bf16.msra.mxu1 %v9364_v45  ;;  %8730 = vmatpush3.bf16.msra.mxu0 %v9365_v46  ;;  %v9387_v45 = vld [vmem:[%s10174_s15 + $0x3c8] sm:$0xff]  }
 0x859   :  { %8709 = vmatprep.subr.bf16.mxu1 %v9366_v40  ;;  %8731 = vmatprep.subr.bf16.mxu0 %v9367_v37  ;;  %v9388_v27 = vld [vmem:[%s10174_s15 + $0x308] sm:$0xff]  }
 0x85a   :  { %3912 = vmatprep.mubr.bf16.mxu1 %v2678_v33  ;;  %3953 = vmatprep.mubr.bf16.mxu0 %v2680_v26  ;;  %v9389_v6 = vld [vmem:[%s10174_s15 + $0x388] sm:$0xff]  }
 0x85c   :  { %8710 = vmatpush3.bf16.msra.mxu1 %v9368_v3  ;;  %8732 = vmatpush3.bf16.msra.mxu0 %v9369_v7 }
 0x85d   :  { %8711 = vmatprep.subr.bf16.mxu1 %v9370_v63  ;;  %8733 = vmatprep.subr.bf16.mxu0 %v9371_v21  ;;  %v9390_v63 = vld [vmem:[%s10174_s15 + $0x350] sm:$0xff]  }
 0x85e   :  { %v9391_v21 = vld [vmem:[%s10174_s15 + $0x3d0] sm:$0xff]  }
 0x860   :  { %8712 = vmatpush3.bf16.msra.mxu1 %v9372_v35  ;;  %8734 = vmatpush3.bf16.msra.mxu0 %v9373_v47 }
 0x861   :  { %8713 = vmatprep.subr.bf16.mxu1 %v9374_v50  ;;  %8735 = vmatprep.subr.bf16.mxu0 %v9375_v56 }
 0x864   :  { %8714 = vmatpush3.bf16.msra.mxu1 %v9376_v24  ;;  %8736 = vmatpush3.bf16.msra.mxu0 %v9377_v4 }
 0x865   :  { %8715 = vmatprep.subr.bf16.mxu1 %v9378_v1  ;;  %8737 = vmatprep.subr.bf16.mxu0 %v9379_v59  ;;  %v9392_v1 = vld [vmem:[%s10174_s15 + $0x310] sm:$0xff]  }
 0x866   :  { %v9393_v59 = vld [vmem:[%s10174_s15 + $0x390] sm:$0xff]  }
 0x868   :  { %v2585_v57 = vpop.f32.mrb[32].mxu1  ;;  %v2628_v34 = vpop.f32.mrb[40].mxu0  ;;  %8716 = vmatpush3.bf16.msra.mxu1 %v9380_v25  ;;  %8738 = vmatpush3.bf16.msra.mxu0 %v9381_v28  ;;  %v9394_v25 = vld [vmem:[%s10174_s15 + $0x358] sm:$0xff]  }
 0x869   :  { %v2586_v61 = vadd.f32 %v2585_v57, %v1781_v54  ;;  %v2629_v52 = vadd.f32 %v2628_v34, %v1789_v31  ;;  %v2587_v55 = vpop.f32.mrb[33].mxu1  ;;  %v2630_v38 = vpop.f32.mrb[41].mxu0  ;;  %8745 = vmatprep.subr.bf16.mxu1 %v9382_v42  ;;  %8767 = vmatprep.subr.bf16.mxu0 %v9383_v30  ;;  %v9395_v28 = vld [vmem:[%s10174_s15 + $0x3d8] sm:$0xff]   ;;  %v9398_v42 = vld [vmem:[%s10174_s15 + $0x360] sm:$0xff]   ;;  %v9402_v57 = vld [vmem:[%s10174_s15 + $0x368] sm:$0xff]  }
 0x86a   :  { %v2588_v46 = vadd.f32 %v2587_v55, %v1785_v0  ;;  %v2631_v16 = vadd.f32 %v2630_v38, %v1793_v20  ;;  %v2589_v22 = vpop.f32.mrb[34].mxu1  ;;  %v2632_v11 = vpop.f32.mrb[42].mxu0  ;;  %v9399_v30 = vld [vmem:[%s10174_s15 + $0x3e0] sm:$0xff]   ;;  %v9403_v34 = vld [vmem:[%s10174_s15 + $0x3e8] sm:$0xff]   ;;  %v9408_v55 = vld [vmem:[%s10174_s15 + $0x330] sm:$0xff]  }
 0x86b   :  { %v2590_v48 = vadd.f32 %v2589_v22, %v1781_v54  ;;  %v2633_v51 = vadd.f32 %v2632_v11, %v1789_v31  ;;  %v2591_v40 = vpop.f32.mrb[35].mxu1  ;;  %v2634_v37 = vpop.f32.mrb[43].mxu0  ;;  %3913 = vmatmul.mubr.bf16.vlgmr.msra.gmra.mrb[44].mxu1 %v10414_v19  ;;  %3954 = vmatmul.mubr.bf16.vlgmr.msra.gmra.mrb[52].mxu0 %v10416_v9  ;;  %v2649_v33 = vmax.f32 %v2586_v61, 0.0  ;;  %v2651_v26 = vmax.f32 %v2629_v52, 0.0  ;;  %v9396_v54 = vld [vmem:[%s10174_s15 + $0x318] sm:$0xff]   ;;  %v9406_v61 = vld [vmem:[%s10174_s15 + $0x370] sm:$0xff]  }
 0x86c   :  { %v2592_v62 = vadd.f32 %v2591_v40, %v1785_v0  ;;  %v2635_v60 = vadd.f32 %v2634_v37, %v1793_v20  ;;  %8746 = vmatpush3.bf16.msra.mxu1 %v9384_v43  ;;  %8768 = vmatpush3.bf16.msra.mxu0 %v9385_v23  ;;  %v2650_v19 = vmax.f32 %v2588_v46, 0.0  ;;  %v2652_v9 = vmax.f32 %v2631_v16, 0.0  ;;  %v9397_v31 = vld [vmem:[%s10174_s15 + $0x398] sm:$0xff]   ;;  %v9400_v0 = vld [vmem:[%s10174_s15 + $0x320] sm:$0xff]   ;;  %v9404_v43 = vld [vmem:[%s10174_s15 + $0x328] sm:$0xff]  }
 0x86d   :  { %v2665_v3 = vmax.f32 %v2590_v48, 0.0  ;;  %v2667_v7 = vmax.f32 %v2633_v51, 0.0  ;;  %8747 = vmatprep.subr.bf16.mxu1 %v9386_v41  ;;  %8769 = vmatprep.subr.bf16.mxu0 %v9387_v45  ;;  %v9401_v20 = vld [vmem:[%s10174_s15 + $0x3a0] sm:$0xff]   ;;  %v9405_v23 = vld [vmem:[%s10174_s15 + $0x3a8] sm:$0xff]   ;;  %v9407_v52 = vld [vmem:[%s10174_s15 + $0x3f0] sm:$0xff]  }
 0x86e   :  { %v2666_v35 = vmax.f32 %v2592_v62, 0.0  ;;  %v2668_v47 = vmax.f32 %v2635_v60, 0.0  ;;  %v9409_v38 = vld [vmem:[%s10174_s15 + $0x3b0] sm:$0xff]   ;;  %v9410_v41 = vld [vmem:[%s10174_s15 + $0x378] sm:$0xff]   ;;  %v8157_v48 = vld [vmem:[%s7984_s3] ss:$0 sm:$0xff]  ;;  %s7998_s3 = sld [smem:[%s11162_s0 + %s9771_s30]]  }
 0x86f   :  { %v2681_v50 = vpack.c.bf16 %v2665_v3, %v2649_v33  ;;  %v2683_v56 = vpack.c.bf16 %v2667_v7, %v2651_v26  ;;  %v9411_v45 = vld [vmem:[%s10174_s15 + $0x3f8] sm:$0xff]  }
 0x870   :  { %v2682_v24 = vpack.c.bf16 %v2666_v35, %v2650_v19  ;;  %v2684_v4 = vpack.c.bf16 %v2668_v47, %v2652_v9  ;;  %8748 = vmatpush3.bf16.msra.mxu1 %v9388_v27  ;;  %8770 = vmatpush3.bf16.msra.mxu0 %v9389_v6  ;;  %v9412_v46 = vld [vmem:[%s10174_s15 + $0x338] sm:$0xff]  }
 0x871   :  { %8749 = vmatprep.subr.bf16.mxu1 %v9390_v63  ;;  %8771 = vmatprep.subr.bf16.mxu0 %v9391_v21  ;;  %v9413_v16 = vld [vmem:[%s10174_s15 + $0x3b8] sm:$0xff]   ;;  %s9760_s15 = smov 18  }
 0x872   :  { %3994 = vmatprep.mubr.bf16.mxu1 %v2682_v24  ;;  %4035 = vmatprep.mubr.bf16.mxu0 %v2684_v4  ;;  %s10554_s19 = sld [smem:[%s11162_s0 + %s9760_s15]]  }
 0x874   :  { %8750 = vmatpush3.bf16.msra.mxu1 %v9392_v1  ;;  %8772 = vmatpush3.bf16.msra.mxu0 %v9393_v59 }
 0x875   :  { %8751 = vmatprep.subr.bf16.mxu1 %v9394_v25  ;;  %8773 = vmatprep.subr.bf16.mxu0 %v9395_v28 }
 0x878   :  { %8752 = vmatpush3.bf16.msra.mxu1 %v9396_v54  ;;  %8774 = vmatpush3.bf16.msra.mxu0 %v9397_v31 }
 0x879   :  { %8753 = vmatprep.subr.bf16.mxu1 %v9398_v42  ;;  %8775 = vmatprep.subr.bf16.mxu0 %v9399_v30 }
 0x87c   :  { %8754 = vmatpush3.bf16.msra.mxu1 %v9400_v0  ;;  %8776 = vmatpush3.bf16.msra.mxu0 %v9401_v20 }
 0x87d   :  { %8755 = vmatprep.subr.bf16.mxu1 %v9402_v57  ;;  %8777 = vmatprep.subr.bf16.mxu0 %v9403_v34 }
 0x880   :  { %8756 = vmatpush3.bf16.msra.mxu1 %v9404_v43  ;;  %8778 = vmatpush3.bf16.msra.mxu0 %v9405_v23 }
 0x881   :  { %8757 = vmatprep.subr.bf16.mxu1 %v9406_v61  ;;  %8779 = vmatprep.subr.bf16.mxu0 %v9407_v52 }
 0x884   :  { %8758 = vmatpush3.bf16.msra.mxu1 %v9408_v55  ;;  %8780 = vmatpush3.bf16.msra.mxu0 %v9409_v38 }
 0x885   :  { %8759 = vmatprep.subr.bf16.mxu1 %v9410_v41  ;;  %8781 = vmatprep.subr.bf16.mxu0 %v9411_v45 }
 0x888   :  { %8760 = vmatpush3.bf16.msra.mxu1 %v9412_v46  ;;  %8782 = vmatpush3.bf16.msra.mxu0 %v9413_v16 }
 0x889   :  { %9105 = vmatprep.subr.bf16.mxu0 %v9739_v14 }
 0x88b   :  { %3995 = vmatmul.mubr.bf16.vlgmr.msra.gmra.mrb[48].mxu1 %v2681_v50  ;;  %4036 = vmatmul.mubr.bf16.vlgmr.msra.gmra.mrb[56].mxu0 %v2683_v56 }
 0x88c   :  { %4263 = vmatprep.mubr.bf16.mxu1 %v9743_v53  ;;  %9117 = vmatprep.mubr.msk.bf16.mxu0 %vm9741_vm1, %v9739_v14 }
 0x8fe   :  { %v8629_v22 = vpop.f32.mrb[36].mxu1  ;;  %v8651_v11 = vpop.f32.mrb[44].mxu0 }
 0x8ff   :  { %v8630_v51 = vpop.f32.mrb[37].mxu1  ;;  %v8652_v40 = vpop.f32.mrb[45].mxu0 }
 0x900   :  { %v8631_v37 = vadd.f32 %v8630_v51, %v8629_v22  ;;  %v8653_v62 = vadd.f32 %v8652_v40, %v8651_v11  ;;  %v8632_v60 = vpop.f32.mrb[38].mxu1  ;;  %v8654_v27 = vpop.f32.mrb[46].mxu0 }
 0x901   :  { %v8633_v6 = vpop.f32.mrb[39].mxu1  ;;  %v8655_v33 = vpop.f32.mrb[47].mxu0 }
 0x902   :  { %v3751_v26 = vadd.f32 %v8631_v37, %v8157_v48  ;;  %v8634_v3 = vadd.f32 %v8633_v6, %v8632_v60  ;;  %v8656_v7 = vadd.f32 %v8655_v33, %v8654_v27 }
 0x904   :  { %v3792_v63 = vadd.f32 %v8653_v62, %v3751_v26  ;;  %v3754_v21 = vadd.f32 %v8634_v3, %v8157_v48 }
 0x906   :  { %v3795_v19 = vadd.f32 %v8656_v7, %v3754_v21 }
 0x91e   :  { %v8673_v9 = vpop.f32.mrb[40].mxu1  ;;  %v8695_v35 = vpop.f32.mrb[48].mxu0 }
 0x91f   :  { %v8674_v47 = vpop.f32.mrb[41].mxu1  ;;  %v8696_v50 = vpop.f32.mrb[49].mxu0 }
 0x920   :  { %v8675_v56 = vadd.f32 %v8674_v47, %v8673_v9  ;;  %v8697_v24 = vadd.f32 %v8696_v50, %v8695_v35  ;;  %v8676_v4 = vpop.f32.mrb[42].mxu1  ;;  %v8698_v1 = vpop.f32.mrb[50].mxu0 }
 0x921   :  { %v8677_v59 = vpop.f32.mrb[43].mxu1  ;;  %v8699_v25 = vpop.f32.mrb[51].mxu0 }
 0x922   :  { %v3833_v28 = vadd.f32 %v8675_v56, %v3792_v63  ;;  %v8678_v54 = vadd.f32 %v8677_v59, %v8676_v4  ;;  %v8700_v31 = vadd.f32 %v8699_v25, %v8698_v1 }
 0x924   :  { %v3874_v42 = vadd.f32 %v8697_v24, %v3833_v28  ;;  %v3836_v30 = vadd.f32 %v8678_v54, %v3795_v19 }
 0x926   :  { %v3877_v0 = vadd.f32 %v8700_v31, %v3836_v30  ;;  %v9416_v30 = vld [vmem:[%s10498_s7 + $0x4] ss:$12 sps:$4 sm:$0xff]  }
 0x927   :  { %4231 = vmatprep.subr.bf16.mxu1 %v9416_v30 }
 0x93e   :  { %v8717_v20 = vpop.f32.mrb[44].mxu1  ;;  %v8739_v57 = vpop.f32.mrb[52].mxu0 }
 0x93f   :  { %v8718_v34 = vpop.f32.mrb[45].mxu1  ;;  %v8740_v43 = vpop.f32.mrb[53].mxu0 }
 0x940   :  { %v8719_v23 = vadd.f32 %v8718_v34, %v8717_v20  ;;  %v8741_v61 = vadd.f32 %v8740_v43, %v8739_v57  ;;  %v8720_v52 = vpop.f32.mrb[46].mxu1  ;;  %v8742_v55 = vpop.f32.mrb[54].mxu0  ;;  %v9417_v20 = vld [vmem:[%s10498_s7 + $0x8] ss:$12 sps:$4 sm:$0xff]   ;;  %v9418_v34 = vld [vmem:[%s10498_s7 + $0x18] ss:$12 sps:$4 sm:$0xff]  }
 0x941   :  { %v8721_v38 = vpop.f32.mrb[47].mxu1  ;;  %v8743_v41 = vpop.f32.mrb[55].mxu0  ;;  %9106 = vmatpush3.bf16.msra.mxu0 %v9417_v20  ;;  %v9420_v57 = vld [vmem:[%s10498_s7 + $0x1c] ss:$12 sps:$4 sm:$0xff]   ;;  %v9421_v43 = vld [vmem:[%s10498_s7 + $0x20] ss:$12 sps:$4 sm:$0xff]  }
 0x942   :  { %v3915_v45 = vadd.f32 %v8719_v23, %v3874_v42  ;;  %v8722_v46 = vadd.f32 %v8721_v38, %v8720_v52  ;;  %v8744_v16 = vadd.f32 %v8743_v41, %v8742_v55  ;;  %9107 = vmatprep.subr.bf16.mxu0 %v9739_v14  ;;  %v9424_v23 = vld [vmem:[%s10498_s7 + $0x34] ss:$12 sps:$4 sm:$0xff]   ;;  %v9425_v52 = vld [vmem:[%s10498_s7 + $0x38] ss:$12 sps:$4 sm:$0xff]   ;;  %v9429_v41 = vld [vmem:[%s10498_s7 + $0x50] ss:$12 sps:$4 sm:$0xff]  }
 0x943   :  { %v9428_v55 = vld [vmem:[%s10498_s7 + $0x4c] ss:$12 sps:$4 sm:$0xff]   ;;  %v9426_v38 = vld [vmem:[%s10498_s7 + $0x48] ss:$12 sps:$4 sm:$0xff]  }
 0x944   :  { %v3956_v22 = vadd.f32 %v8741_v61, %v3915_v45  ;;  %v3918_v11 = vadd.f32 %v8722_v46, %v3877_v0  ;;  %v9414_v0 = vld [vmem:[%s10498_s7] ss:$12 sps:$4 sm:$0xff]   ;;  %v9422_v61 = vld [vmem:[%s10498_s7 + $0x30] ss:$12 sps:$4 sm:$0xff]  }
 0x945   :  { %4232 = vmatpush1.bf16.msra.mxu1 %v9414_v0  ;;  %9108 = vmatpush3.bf16.msra.mxu0 %v9421_v43  ;;  %v9432_v45 = vld [vmem:[%s10498_s7 + $0x64] ss:$12 sps:$4 sm:$0xff]   ;;  %v9430_v46 = vld [vmem:[%s10498_s7 + $0x60] ss:$12 sps:$4 sm:$0xff]  }
 0x946   :  { %v3959_v48 = vadd.f32 %v8744_v16, %v3918_v11  ;;  %4233 = vmatprep.subr.bf16.mxu1 %v9420_v57  ;;  %9109 = vmatprep.subr.bf16.mxu0 %v9739_v14  ;;  %v9433_v16 = vld [vmem:[%s10498_s7 + $0x68] ss:$12 sps:$4 sm:$0xff]  }
 0x947   :  { %v9436_v11 = vld [vmem:[%s10498_s7 + $0x7c] ss:$12 sps:$4 sm:$0xff]  }
 0x949   :  { %4234 = vmatpush1.bf16.msra.mxu1 %v9418_v34  ;;  %9110 = vmatpush3.bf16.msra.mxu0 %v9425_v52 }
 0x94a   :  { %4235 = vmatprep.subr.bf16.mxu1 %v9424_v23  ;;  %9111 = vmatprep.subr.bf16.mxu0 %v9739_v14 }
 0x94d   :  { %4236 = vmatpush1.bf16.msra.mxu1 %v9422_v61  ;;  %9112 = vmatpush3.bf16.msra.mxu0 %v9429_v41 }
 0x94e   :  { %4237 = vmatprep.subr.bf16.mxu1 %v9428_v55  ;;  %9113 = vmatprep.subr.bf16.mxu0 %v9739_v14 }
 0x951   :  { %4238 = vmatpush1.bf16.msra.mxu1 %v9426_v38  ;;  %9114 = vmatpush3.bf16.msra.mxu0 %v9433_v16 }
 0x952   :  { %4239 = vmatprep.subr.bf16.mxu1 %v9432_v45  ;;  %9115 = vmatprep.subr.bf16.mxu0 %v9739_v14 }
 0x955   :  { %4240 = vmatpush1.bf16.msra.mxu1 %v9430_v46 }
 0x956   :  { %4241 = vmatprep.subr.bf16.mxu1 %v9436_v11 }
 0x95e   :  { %v8761_v51 = vpop.f32.mrb[48].mxu1  ;;  %v8783_v40 = vpop.f32.mrb[56].mxu0 }
 0x95f   :  { %v8762_v37 = vpop.f32.mrb[49].mxu1  ;;  %v8784_v62 = vpop.f32.mrb[57].mxu0 }
 0x960   :  { %v8763_v60 = vadd.f32 %v8762_v37, %v8761_v51  ;;  %v8785_v27 = vadd.f32 %v8784_v62, %v8783_v40  ;;  %v8764_v6 = vpop.f32.mrb[50].mxu1  ;;  %v8786_v33 = vpop.f32.mrb[58].mxu0  ;;  %v9729_v51 = vld [vmem:[%s9838_s17] sm:$0xff]  }
 0x961   :  { %v8765_v26 = vpop.f32.mrb[51].mxu1  ;;  %v8787_v3 = vpop.f32.mrb[59].mxu0  ;;  %v9730_v40 = vld [vmem:[%s9914_s29] sm:$0x3f]   ;;  %s7986_s29 = sld [smem:[%s11162_s0 + %s9759_s12]]  }
 0x962   :  { %v3997_v7 = vadd.f32 %v8763_v60, %v3956_v22  ;;  %v8766_v63 = vadd.f32 %v8765_v26, %v8764_v6  ;;  %v8788_v21 = vadd.f32 %v8787_v3, %v8786_v33  ;;  %v9434_v22 = vld [vmem:[%s10498_s7 + $0x78] ss:$12 sps:$4 sm:$0xff]   ;;  %v8286_v3 = vld [vmem:[%s7985_s11] ss:$0 sm:$0xff]  ;;  %s8001_s11 = sld [smem:[%s11162_s0 + %s9773_s8]]  }
 0x963   :  { %4242 = vmatpush1.bf16.msra.mxu1 %v9434_v22 }
 0x964   :  { %v4038_v19 = vadd.f32 %v8785_v27, %v3997_v7  ;;  %v4000_v9 = vadd.f32 %v8766_v63, %v3959_v48  ;;  %v9437_v48 = vld [vmem:[%s10498_s7 + $0x80] ss:$12 sps:$4 sm:$0xff]   ;;  %9121 = vmatprep.subr.bf16.mxu1 %v9729_v51  ;;  %s8000_s7 = sld [smem:[%s11162_s0 + %s9772_s4]]  }
 0x965   :  { %9116 = vmatpush3.bf16.msra.mxu0 %v9437_v48 }
 0x966   :  { %v4041_v35 = vadd.f32 %v8788_v21, %v4000_v9  ;;  %v4044_v47 = vadd.f32 %v4038_v19, %v10188_v49  ;;  %9208 = vmatprep.subr.msk.bf16.mxu0 %vm1186_vm7, %v9730_v40 }
 0x967   :  { %v8287_v9 = vld [vmem:[%s7986_s29] ss:$0 sm:$0xff] }
 0x968   :  { %v4046_v50 = vsel %vm391_vm6, %v4044_v47, 0.0  ;;  %v4045_v56 = vadd.f32 %v4041_v35, %v10190_v58 }
 0x969   :  { %4047 = vadd.xlane.f32.xlu0 %v4046_v50 }
 0x96a   :  { %v4049_v24 = vsel %vm391_vm6, %v4045_v56, 0.0 }
 0x96b   :  { %4050 = vadd.xlane.f32.xlu1 %v4049_v24  ;;  %v9731_v24 = vld [vmem:[%s9838_s17 + $0x8] sm:$0xff]  }
 0x9f6   :  { %v4048_v4 = vpop.xlane.xlu0 %4047 }
 0x9f7   :  { %v4052_v1 = vmul.f32 0.010416667, %v4048_v4  ;;  %v9732_v4 = vld [vmem:[%s9838_s17 + $0x10] sm:$0xff]  }
 0x9f8   :  { %v4051_v59 = vpop.xlane.xlu1 %4050 }
 0x9f9   :  { %v10485_v25 = vsub.f32 %v4044_v47, %v4052_v1  ;;  %v4053_v28 = vmul.f32 0.010416667, %v4051_v59  ;;  %v9733_v1 = vld [vmem:[%s9838_s17 + $0x18] sm:$0xff]   ;;  %v9734_v59 = vld [vmem:[%s9838_s17 + $0x20] sm:$0xff]  }
 0x9fb   :  { %v10487_v54 = vsub.f32 %v4045_v56, %v4053_v28  ;;  %v4056_v31 = vmul.f32 %v10485_v25, %v10485_v25  ;;  %v9737_v28 = vld [vmem:[%s9838_s17 + $0x38] sm:$0xff]  }
 0x9fd   :  { %v4058_v49 = vsel %vm391_vm6, %v4056_v31, 0.0  ;;  %v4057_v58 = vmul.f32 %v10487_v54, %v10487_v54 }
 0x9fe   :  { %4059 = vadd.xlane.f32.xlu0 %v4058_v49 }
 0x9ff   :  { %v4061_v42 = vsel %vm391_vm6, %v4057_v58, 0.0 }
 0xa00   :  { %4062 = vadd.xlane.f32.xlu1 %v4061_v42 }
 0xa8b   :  { %v4060_v37 = vpop.xlane.xlu0 %4059 }
 0xa8c   :  { %v4064_v62 = vmul.f32 0.010416667, %v4060_v37 }
 0xa8d   :  { %v4063_v60 = vpop.xlane.xlu1 %4062 }
 0xa8e   :  { %v4066_v27 = vadd.f32 1e-05, %v4064_v62  ;;  %v4065_v6 = vmul.f32 0.010416667, %v4063_v60 }
 0xa90   :  { %9652 = vrsqrt.f32 %v4066_v27  ;;  %v4067_v33 = vadd.f32 1e-05, %v4065_v6 }
 0xa92   :  { %9654 = vrsqrt.f32 %v4067_v33 }
 0xa9a   :  { %v9653_v26 = vpop.eup %9652 }
 0xa9b   :  { %v4070_v7 = vmul.f32 %v9653_v26, %v10485_v25  ;;  %v9735_v25 = vld [vmem:[%s9838_s17 + $0x28] sm:$0xff]  }
 0xa9c   :  { %v9655_v63 = vpop.eup %9654 }
 0xa9d   :  { %v4079_v21 = vmul.f32 %v8286_v3, %v4070_v7  ;;  %v4071_v19 = vmul.f32 %v9655_v63, %v10487_v54  ;;  %v4115_v54 = vld [vmem:[%s10554_s19] sm:$0x7] }
 0xa9e   :  { %v4120_v31 = vrot.slane %v4115_v54, %v9867_v12  ;;  %v4124_v20 = vrot.slane %v4115_v54, %v9872_v17 }
 0xa9f   :  { %v4080_v35 = vmul.f32 %v8286_v3, %v4071_v19  ;;  %v10534_v47 = vadd.f32 %v8287_v9, %v4079_v21 }
 0xaa1   :  { %v10536_v50 = vadd.f32 %v8287_v9, %v4080_v35 }
 0xaa3   :  { %v4090_v56 = vpack.c.bf16 %v10536_v50, %v10534_v47 }
 0xaa5   :  { %8306 = vmatmul.mubr.msk.bf16.vlgmr.msra.gmra.mrb[52].mxu1 %vm391_vm6, %v4090_v56  ;;  %9118 = vmatmul.mubr.msk.bf16.vlgmr.msra.gmra.mrb[60].mxu0 %vm391_vm6, %v4090_v56 }
 0xaa6   :  { %9122 = vmatpush3.bf16.msra.mxu1 %v9729_v51  ;;  %9154 = vmatpush3.bf16.msra.mxu0 %v9919_v39  ;;  %v9736_v39 = vld [vmem:[%s9838_s17 + $0x30] sm:$0xff]   ;;  %s9761_s17 = smov 19  }
 0xaa7   :  { %9123 = vmatprep.subr.bf16.mxu1 %v9731_v24  ;;  %9171 = vmatprep.subr.bf16.mxu0 %v9739_v14  ;;  %s7989_s22 = sld [smem:[%s11162_s0 + %s9761_s17]]  }
 0xaaa   :  { %9124 = vmatpush3.bf16.msra.mxu1 %v9731_v24 }
 0xaab   :  { %9125 = vmatprep.subr.bf16.mxu1 %v9732_v4 }
 0xaae   :  { %9126 = vmatpush3.bf16.msra.mxu1 %v9732_v4 }
 0xaaf   :  { %9127 = vmatprep.subr.bf16.mxu1 %v9733_v1 }
 0xab2   :  { %9128 = vmatpush3.bf16.msra.mxu1 %v9733_v1 }
 0xab3   :  { %9129 = vmatprep.subr.bf16.mxu1 %v9734_v59 }
 0xab6   :  { %9130 = vmatpush3.bf16.msra.mxu1 %v9734_v59 }
 0xab7   :  { %9131 = vmatprep.subr.bf16.mxu1 %v9735_v25 }
 0xaba   :  { %9132 = vmatpush3.bf16.msra.mxu1 %v9735_v25 }
 0xabb   :  { %9133 = vmatprep.subr.bf16.mxu1 %v9736_v39 }
 0xabe   :  { %9134 = vmatpush3.bf16.msra.mxu1 %v9736_v39 }
 0xabf   :  { %9135 = vmatprep.subr.bf16.mxu1 %v9737_v28 }
 0xac2   :  { %9136 = vmatpush3.bf16.msra.mxu1 %v9737_v28 }
 0xb78   :  { %v4265_v49 = vpop.f32.mrb[52].mxu1  ;;  %v10558_v58 = vpop.f32.mrb[60].mxu0 }
 0xb79   :  { %v4266_v42 = vadd.f32 %v4265_v49, %v4120_v31  ;;  %v4267_v30 = vpop.f32.mrb[53].mxu1  ;;  %v9119_v0 = vpop.f32.mrb[61].mxu0 }
 0xb7a   :  { %v4269_v57 = vpop.f32.mrb[54].mxu1  ;;  %v10561_v34 = vpop.f32.mrb[62].mxu0  ;;  %v4268_v16 = vadd.f32 %v4267_v30, %v4124_v20 }
 0xb7b   :  { %v4317_v43 = vcombine.high %v4266_v42, %v4266_v42  ;;  %v4324_v23 = vrot.slane %v4266_v42, %v9875_v18  ;;  %v4270_v61 = vadd.f32 %v4269_v57, %v4120_v31  ;;  %v4271_v52 = vpop.f32.mrb[55].mxu1  ;;  %v9120_v55 = vpop.f32.mrb[63].mxu0 }
 0xb7c   :  { %v4272_v11 = vadd.f32 %v4271_v52, %v4124_v20 }
 0xb7d   :  { %v4331_v38 = vrot.slane %v4317_v43, %v9875_v18  ;;  %v4332_v41 = vcombine.high %v4324_v23, %v4324_v23  ;;  %v4340_v45 = vrot.slane %v4324_v23, %v9875_v18  ;;  %v4366_v46 = vcombine.high %v4270_v61, %v4270_v61 }
 0xb7e   :  { %v4373_v22 = vrot.slane %v4270_v61, %v9875_v18 }
 0xb7f   :  { %v4333_v48 = vcombine.high %v4331_v38, %v4331_v38  ;;  %v4347_v51 = vrot.slane %v4331_v38, %v9875_v18  ;;  %v4354_v40 = vrot.slane %v4332_v41, %v9875_v18  ;;  %v4362_v37 = vcombine.high %v4340_v45, %v4340_v45 }
 0xb80   :  { %v4418_v62 = vrot.slane %v4340_v45, %v9867_v12  ;;  %v4380_v60 = vrot.slane %v4366_v46, %v9875_v18  ;;  %v4381_v27 = vcombine.high %v4373_v22, %v4373_v22  ;;  %v4389_v6 = vrot.slane %v4373_v22, %v9875_v18 }
 0xb81   :  { %v4361_v33 = vrot.slane %v4333_v48, %v9875_v18  ;;  %v4363_v26 = vcombine.high %v4347_v51, %v4347_v51  ;;  %v4364_v3 = vcombine.high %v4354_v40, %v4354_v40  ;;  %v4426_v7 = vrot.slane %v4362_v37, %v9867_v12 }
 0xb82   :  { %v4382_v63 = vcombine.high %v4380_v60, %v4380_v60  ;;  %v4396_v21 = vrot.slane %v4380_v60, %v9875_v18  ;;  %v4403_v19 = vrot.slane %v4381_v27, %v9875_v18  ;;  %v4411_v9 = vcombine.high %v4389_v6, %v4389_v6 }
 0xb83   :  { %v4430_v35 = vrot.slane %v4364_v3, %v9867_v12  ;;  %v4450_v56 = vrot.slane %v4389_v6, %v9867_v12  ;;  %v4422_v24 = vrot.slane %v4354_v40, %v9867_v12  ;;  %v4495_v4 = vmul.f32 %v4418_v62, %v4268_v16 }
 0xb84   :  { %v4410_v1 = vrot.slane %v4382_v63, %v9875_v18  ;;  %v4412_v59 = vcombine.high %v4396_v21, %v4396_v21  ;;  %v4413_v25 = vcombine.high %v4403_v19, %v4403_v19  ;;  %v4497_v39 = vmul.f32 %v4426_v7, %v4268_v16 }
 0xb85   :  { %v4496_v28 = vmul.f32 %v4422_v24, %v4268_v16  ;;  %v4498_v54 = vmul.f32 %v4430_v35, %v4268_v16  ;;  %v4434_v31 = vrot.slane %v4347_v51, %v9867_v12  ;;  %v4438_v49 = vrot.slane %v4361_v33, %v9867_v12 }
 0xb86   :  { %v4365_v42 = vcombine.high %v4361_v33, %v4361_v33  ;;  %v4442_v30 = vrot.slane %v4363_v26, %v9867_v12  ;;  %v4454_v0 = vrot.slane %v4403_v19, %v9867_v12  ;;  %v4503_v20 = vmul.f32 %v4450_v56, %v4272_v11 }
 0xb87   :  { %v4511_v57 = vpack.c.bf16 %v4496_v28, %v4495_v4  ;;  %v4512_v43 = vpack.c.bf16 %v4498_v54, %v4497_v39  ;;  %v4499_v23 = vmul.f32 %v4434_v31, %v4268_v16  ;;  %v4500_v61 = vmul.f32 %v4438_v49, %v4268_v16 }
 0xb88   :  { %v4446_v18 = vrot.slane %v4365_v42, %v9867_v12  ;;  %v4501_v52 = vmul.f32 %v4442_v30, %v4268_v16  ;;  %v4504_v55 = vmul.f32 %v4454_v0, %v4272_v11  ;;  %v4458_v38 = vrot.slane %v4411_v9, %v9867_v12 }
 0xb89   :  { %9137 = vmatprep.mubr.bf16.mxu1 %v4511_v57  ;;  %v4513_v41 = vpack.c.bf16 %v4500_v61, %v4499_v23  ;;  %v4462_v45 = vrot.slane %v4413_v25, %v9867_v12  ;;  %v4466_v46 = vrot.slane %v4396_v21, %v9867_v12  ;;  %v4470_v22 = vrot.slane %v4410_v1, %v9867_v12 }
 0xb8a   :  { %9138 = vmatmul.mubr.bf16.vlgmr.msra.gmra.mrb[56].mxu1 %v4512_v43  ;;  %v4502_v48 = vmul.f32 %v4446_v18, %v4268_v16  ;;  %v4515_v51 = vpack.c.bf16 %v4504_v55, %v4503_v20  ;;  %v4505_v40 = vmul.f32 %v4458_v38, %v4272_v11  ;;  %v4414_v37 = vcombine.high %v4410_v1, %v4410_v1 }
 0xb8b   :  { %9141 = vmatprep.mubr.bf16.mxu1 %v4513_v41  ;;  %v4506_v62 = vmul.f32 %v4462_v45, %v4272_v11  ;;  %v4507_v60 = vmul.f32 %v4466_v46, %v4272_v11  ;;  %v4508_v27 = vmul.f32 %v4470_v22, %v4272_v11  ;;  %v4474_v6 = vrot.slane %v4412_v59, %v9867_v12 }
 0xb8c   :  { %v4514_v33 = vpack.c.bf16 %v4502_v48, %v4501_v52  ;;  %v4478_v26 = vrot.slane %v4414_v37, %v9867_v12 }
 0xb8d   :  { %v4516_v3 = vpack.c.bf16 %v4506_v62, %v4505_v40  ;;  %v4517_v7 = vpack.c.bf16 %v4508_v27, %v4507_v60  ;;  %v4509_v63 = vmul.f32 %v4474_v6, %v4272_v11 }
 0xb8e   :  { %v4510_v21 = vmul.f32 %v4478_v26, %v4272_v11 }
 0xb90   :  { %v4518_v19 = vpack.c.bf16 %v4510_v21, %v4509_v63 }
 0xb92   :  { %9142 = vmatmul.mubr.bf16.gmra.mrb[60].mxu1 %v4514_v33 }
 0xb93   :  { %9145 = vmatprep.mubr.bf16.mxu1 %v4515_v51 }
 0xb9a   :  { %9146 = vmatmul.mubr.bf16.gmra.mrb[64].mxu1 %v4516_v3 }
 0xb9b   :  { %9149 = vmatprep.mubr.bf16.mxu1 %v4517_v7 }
 0xba2   :  { %9150 = vmatmul.mubr.bf16.gmra.mrb[68].mxu1 %v4518_v19 }
 0xba3   :  { %6095 = vmatprep.mubr.bf16.mxu1 %v9743_v53 }
 0xc5d   :  { %v9139_v16 = vpop.f32.mrb[56].mxu1 }
 0xc5e   :  { %v4618_v9 = vmul.f32 0.35355338, %v9139_v16  ;;  %v4553_v35 = vpop.f32.mrb[57].mxu1 }
 0xc5f   :  { %v4616_v56 = vmul.f32 0.35355338, %v4553_v35  ;;  %v9140_v24 = vpop.f32.mrb[58].mxu1 }
 0xc60   :  { %v4646_v4 = vsel %vm844_vm8, %v4618_v9, -inf  ;;  %v10593_v1 = vmul.f32 0.35355338, %v9140_v24  ;;  %v4556_v59 = vpop.f32.mrb[59].mxu1 }
 0xc61   :  { %v4647_v25 = vrot.slane %v4646_v4, 4  ;;  %v4632_v11 = vsel %vm844_vm8, %v4616_v56, -inf  ;;  %v10596_v39 = vmul.f32 0.35355338, %v4556_v59 }
 0xc62   :  { %v4633_v28 = vrot.slane %v4632_v11, 4  ;;  %v4653_v54 = vsel %vm844_vm8, %v10593_v1, -inf }
 0xc63   :  { %v4648_v31 = vmax.f32 %v4646_v4, %v4647_v25  ;;  %v4654_v49 = vrot.slane %v4653_v54, 4  ;;  %v4639_v42 = vsel %vm844_vm8, %v10596_v39, -inf }
 0xc64   :  { %v4634_v30 = vmax.f32 %v4632_v11, %v4633_v28  ;;  %v4640_v0 = vrot.slane %v4639_v42, 4 }
 0xc65   :  { %v4649_v20 = vrot.slane %v4648_v31, 2  ;;  %v4655_v57 = vmax.f32 %v4653_v54, %v4654_v49  ;;  %v9143_v43 = vpop.f32.mrb[60].mxu1 }
 0xc66   :  { %v4635_v23 = vrot.slane %v4634_v30, 2  ;;  %v4641_v61 = vmax.f32 %v4639_v42, %v4640_v0  ;;  %v10602_v18 = vmul.f32 0.35355338, %v9143_v43  ;;  %v4569_v52 = vpop.f32.mrb[61].mxu1 }
 0xc67   :  { %v4650_v55 = vmax.f32 %v4648_v31, %v4649_v20  ;;  %v4656_v38 = vrot.slane %v4655_v57, 2  ;;  %v10604_v41 = vmul.f32 0.35355338, %v4569_v52  ;;  %v9144_v45 = vpop.f32.mrb[62].mxu1 }
 0xc68   :  { %v4636_v46 = vmax.f32 %v4634_v30, %v4635_v23  ;;  %v4642_v22 = vrot.slane %v4641_v61, 2  ;;  %v4674_v48 = vsel %vm844_vm8, %v10602_v18, -inf  ;;  %v10608_v51 = vmul.f32 0.35355338, %v9144_v45  ;;  %v4572_v40 = vpop.f32.mrb[63].mxu1 }
 0xc69   :  { %v4651_v37 = vrot.slane %v4650_v55, 1  ;;  %v4657_v62 = vmax.f32 %v4655_v57, %v4656_v38  ;;  %v4675_v60 = vrot.slane %v4674_v48, 4  ;;  %v4660_v27 = vsel %vm844_vm8, %v10604_v41, -inf }
 0xc6a   :  { %v4637_v6 = vrot.slane %v4636_v46, 1  ;;  %v4643_v33 = vmax.f32 %v4641_v61, %v4642_v22  ;;  %v4661_v26 = vrot.slane %v4660_v27, 4  ;;  %v4681_v3 = vsel %vm844_vm8, %v10608_v51, -inf }
 0xc6b   :  { %v4652_v7 = vmax.f32 %v4650_v55, %v4651_v37  ;;  %v4658_v63 = vrot.slane %v4657_v62, 1  ;;  %v4676_v21 = vmax.f32 %v4674_v48, %v4675_v60  ;;  %v4682_v19 = vrot.slane %v4681_v3, 4 }
 0xc6c   :  { %v4638_v16 = vmax.f32 %v4636_v46, %v4637_v6  ;;  %v4644_v35 = vrot.slane %v4643_v33, 1  ;;  %v4662_v24 = vmax.f32 %v4660_v27, %v4661_v26  ;;  %v10614_v4 = vmul.f32 0.35355338, %v4572_v40 }
 0xc6d   :  { %v4746_v59 = vsub.f32 %v4618_v9, %v4652_v7  ;;  %v4659_v25 = vmax.f32 %v4657_v62, %v4658_v63  ;;  %v4677_v11 = vrot.slane %v4676_v21, 2  ;;  %v4683_v28 = vmax.f32 %v4681_v3, %v4682_v19  ;;  %v9147_v54 = vpop.f32.mrb[64].mxu1 }
 0xc6e   :  { %v4744_v31 = vsub.f32 %v4616_v56, %v4638_v16  ;;  %v4645_v49 = vmax.f32 %v4643_v33, %v4644_v35  ;;  %v4663_v42 = vrot.slane %v4662_v24, 2  ;;  %v4667_v30 = vsel %vm844_vm8, %v10614_v4, -inf  ;;  %v4585_v0 = vpop.f32.mrb[65].mxu1 }
 0xc6f   :  { %v4764_v20 = vmul.f32 1.442695, %v4746_v59  ;;  %v4747_v57 = vsub.f32 %v10593_v1, %v4659_v25  ;;  %v4678_v43 = vmax.f32 %v4676_v21, %v4677_v11  ;;  %v4684_v23 = vrot.slane %v4683_v28, 2  ;;  %v9148_v61 = vpop.f32.mrb[66].mxu1 }
 0xc70   :  { %v4760_v52 = vmul.f32 1.442695, %v4744_v31  ;;  %v4745_v9 = vsub.f32 %v10596_v39, %v4645_v49  ;;  %v4664_v55 = vmax.f32 %v4662_v24, %v4663_v42  ;;  %v4668_v38 = vrot.slane %v4667_v30, 4  ;;  %v4588_v45 = vpop.f32.mrb[67].mxu1 }
 0xc71   :  { %9656 = vpow2.f32 %v4764_v20  ;;  %v4766_v56 = vmul.f32 1.442695, %v4747_v57  ;;  %v4679_v46 = vrot.slane %v4678_v43, 1  ;;  %v4685_v22 = vmax.f32 %v4683_v28, %v4684_v23 }
 0xc72   :  { %9658 = vpow2.f32 %v4760_v52  ;;  %v4762_v48 = vmul.f32 1.442695, %v4745_v9  ;;  %v4665_v40 = vrot.slane %v4664_v55, 1  ;;  %v4669_v37 = vmax.f32 %v4667_v30, %v4668_v38 }
 0xc73   :  { %9660 = vpow2.f32 %v4766_v56  ;;  %v4680_v62 = vmax.f32 %v4678_v43, %v4679_v46  ;;  %v4686_v1 = vrot.slane %v4685_v22, 1  ;;  %v10620_v60 = vmul.f32 0.35355338, %v9147_v54 }
 0xc74   :  { %9662 = vpow2.f32 %v4762_v48  ;;  %v4666_v27 = vmax.f32 %v4664_v55, %v4665_v40  ;;  %v4670_v6 = vrot.slane %v4669_v37, 2  ;;  %v10622_v39 = vmul.f32 0.35355338, %v4585_v0 }
 0xc75   :  { %v4750_v33 = vsub.f32 %v10602_v18, %v4680_v62  ;;  %v4687_v26 = vmax.f32 %v4685_v22, %v4686_v1  ;;  %v4702_v3 = vsel %vm844_vm8, %v10620_v60, -inf  ;;  %v10627_v7 = vmul.f32 0.35355338, %v9148_v61  ;;  %v9151_v63 = vpop.f32.mrb[68].mxu1 }
 0xc76   :  { %v4748_v21 = vsub.f32 %v10604_v41, %v4666_v27  ;;  %v4671_v19 = vmax.f32 %v4669_v37, %v4670_v6  ;;  %v4703_v16 = vrot.slane %v4702_v3, 4  ;;  %v4688_v35 = vsel %vm844_vm8, %v10622_v39, -inf  ;;  %v10632_v24 = vpop.f32.mrb[69].mxu1 }
 0xc77   :  { %v4772_v59 = vmul.f32 1.442695, %v4750_v33  ;;  %v4751_v25 = vsub.f32 %v10608_v51, %v4687_v26  ;;  %v4689_v18 = vrot.slane %v4688_v35, 4  ;;  %v4709_v11 = vsel %vm844_vm8, %v10627_v7, -inf  ;;  %v10637_v28 = vpop.f32.mrb[70].mxu1 }
 0xc78   :  { %v4768_v54 = vmul.f32 1.442695, %v4748_v21  ;;  %v4672_v31 = vrot.slane %v4671_v19, 1  ;;  %v4704_v49 = vmax.f32 %v4702_v3, %v4703_v16  ;;  %v4710_v41 = vrot.slane %v4709_v11, 4  ;;  %v10639_v42 = vpop.f32.mrb[71].mxu1 }
 0xc79   :  { %9664 = vpow2.f32 %v4772_v59  ;;  %v4774_v30 = vmul.f32 1.442695, %v4751_v25  ;;  %v4690_v0 = vmax.f32 %v4688_v35, %v4689_v18  ;;  %v10641_v20 = vmul.f32 0.35355338, %v4588_v45 }
 0xc7a   :  { %9666 = vpow2.f32 %v4768_v54  ;;  %v4673_v57 = vmax.f32 %v4671_v19, %v4672_v31  ;;  %v4705_v51 = vrot.slane %v4704_v49, 2  ;;  %v4711_v43 = vmax.f32 %v4709_v11, %v4710_v41 }
 0xc7b   :  { %v10643_v23 = vpop.eup %9656  ;;  %9668 = vpow2.f32 %v4774_v30  ;;  %v4691_v61 = vrot.slane %v4690_v0, 2  ;;  %v4695_v52 = vsel %vm844_vm8, %v10641_v20, -inf  ;;  %v10647_v9 = vmul.f32 0.35355338, %v9151_v63 }
 0xc7c   :  { %v10649_v55 = vpop.eup %9658  ;;  %v4806_v38 = vsel %vm844_vm8, %v10643_v23, 0.0  ;;  %v4749_v45 = vsub.f32 %v10614_v4, %v4673_v57  ;;  %v4706_v56 = vmax.f32 %v4704_v49, %v4705_v51  ;;  %v4712_v46 = vrot.slane %v4711_v43, 2 }
 0xc7d   :  { %v10654_v22 = vpop.eup %9660  ;;  %v4807_v48 = vrot.slane %v4806_v38, 4  ;;  %v4792_v40 = vsel %vm844_vm8, %v10649_v55, 0.0  ;;  %v4692_v37 = vmax.f32 %v4690_v0, %v4691_v61  ;;  %v4696_v62 = vrot.slane %v4695_v52, 4 }
 0xc7e   :  { %v10658_v1 = vpop.eup %9662  ;;  %v4793_v27 = vrot.slane %v4792_v40, 4  ;;  %v4813_v6 = vsel %vm844_vm8, %v10654_v22, 0.0  ;;  %v4770_v33 = vmul.f32 1.442695, %v4749_v45  ;;  %v4707_v26 = vrot.slane %v4706_v56, 1 }
 0xc7f   :  { %v4808_v3 = vadd.f32 %v4807_v48, %v4806_v38  ;;  %v4814_v4 = vrot.slane %v4813_v6, 4  ;;  %v4799_v63 = vsel %vm844_vm8, %v10658_v1, 0.0  ;;  %v4693_v21 = vrot.slane %v4692_v37, 1 }
 0xc80   :  { %v4794_v19 = vadd.f32 %v4793_v27, %v4792_v40  ;;  %v4800_v16 = vrot.slane %v4799_v63, 4  ;;  %9670 = vpow2.f32 %v4770_v33  ;;  %v4708_v35 = vmax.f32 %v4706_v56, %v4707_v26 }
 0xc81   :  { %v4809_v59 = vrot.slane %v4808_v3, 2  ;;  %v4815_v25 = vadd.f32 %v4814_v4, %v4813_v6  ;;  %v4694_v18 = vmax.f32 %v4692_v37, %v4693_v21  ;;  %v4713_v11 = vmax.f32 %v4711_v43, %v4712_v46 }
 0xc82   :  { %v4795_v54 = vrot.slane %v4794_v19, 2  ;;  %v4801_v31 = vadd.f32 %v4800_v16, %v4799_v63  ;;  %v4754_v49 = vsub.f32 %v10620_v60, %v4708_v35  ;;  %v4697_v41 = vmax.f32 %v4695_v52, %v4696_v62 }
 0xc83   :  { %v10665_v30 = vpop.eup %9664  ;;  %v4810_v0 = vadd.f32 %v4809_v59, %v4808_v3  ;;  %v4816_v57 = vrot.slane %v4815_v25, 2  ;;  %v4752_v51 = vsub.f32 %v10622_v39, %v4694_v18  ;;  %v4714_v61 = vrot.slane %v4713_v11, 1 }
 0xc84   :  { %v10668_v38 = vpop.eup %9666  ;;  %v4796_v45 = vadd.f32 %v4795_v54, %v4794_v19  ;;  %v4802_v56 = vrot.slane %v4801_v31, 2  ;;  %v4834_v48 = vsel %vm844_vm8, %v10665_v30, 0.0  ;;  %v4780_v43 = vmul.f32 1.442695, %v4754_v49 }
 0xc85   :  { %v10672_v46 = vpop.eup %9668  ;;  %v4811_v40 = vrot.slane %v4810_v0, 1  ;;  %v4817_v60 = vadd.f32 %v4816_v57, %v4815_v25  ;;  %v4835_v52 = vrot.slane %v4834_v48, 4  ;;  %v4820_v37 = vsel %vm844_vm8, %v10668_v38, 0.0 }
 0xc86   :  { %v4797_v62 = vrot.slane %v4796_v45, 1  ;;  %v4803_v27 = vadd.f32 %v4802_v56, %v4801_v31  ;;  %v4821_v39 = vrot.slane %v4820_v37, 4  ;;  %v4841_v6 = vsel %vm844_vm8, %v10672_v46, 0.0 }
 0xc87   :  { %v4812_v33 = vadd.f32 %v4811_v40, %v4810_v0  ;;  %v4818_v26 = vrot.slane %v4817_v60, 1  ;;  %v4836_v3 = vadd.f32 %v4835_v52, %v4834_v48  ;;  %v4842_v4 = vrot.slane %v4841_v6, 4 }
 0xc88   :  { %v4798_v63 = vadd.f32 %v4797_v62, %v4796_v45  ;;  %v4804_v21 = vrot.slane %v4803_v27, 1  ;;  %v4822_v19 = vadd.f32 %v4821_v39, %v4820_v37  ;;  %9672 = vpow2.f32 %v4780_v43 }
 0xc89   :  { %9674 = vrcp.f32 %v4812_v33  ;;  %v4819_v16 = vadd.f32 %v4818_v26, %v4817_v60  ;;  %v4837_v35 = vrot.slane %v4836_v3, 2  ;;  %v4843_v59 = vadd.f32 %v4842_v4, %v4841_v6 }
 0xc8a   :  { %v10678_v25 = vpop.eup %9670  ;;  %9676 = vrcp.f32 %v4798_v63  ;;  %v4805_v18 = vadd.f32 %v4804_v21, %v4803_v27  ;;  %v4823_v54 = vrot.slane %v4822_v19, 2  ;;  %v4776_v31 = vmul.f32 1.442695, %v4752_v51 }
 0xc8b   :  { %9678 = vrcp.f32 %v4819_v16  ;;  %v4838_v49 = vadd.f32 %v4837_v35, %v4836_v3  ;;  %v4844_v0 = vrot.slane %v4843_v59, 2  ;;  %v4827_v57 = vsel %vm844_vm8, %v10678_v25, 0.0 }
 0xc8c   :  { %9680 = vrcp.f32 %v4805_v18  ;;  %v4824_v45 = vadd.f32 %v4823_v54, %v4822_v19  ;;  %v4828_v56 = vrot.slane %v4827_v57, 4  ;;  %v4715_v48 = vmax.f32 %v4713_v11, %v4714_v61 }
 0xc8d   :  { %v4839_v43 = vrot.slane %v4838_v49, 1  ;;  %v4845_v40 = vadd.f32 %v4844_v0, %v4843_v59  ;;  %9682 = vpow2.f32 %v4776_v31  ;;  %v4698_v60 = vrot.slane %v4697_v41, 2 }
 0xc8e   :  { %v4825_v52 = vrot.slane %v4824_v45, 1  ;;  %v4829_v37 = vadd.f32 %v4828_v56, %v4827_v57  ;;  %v4755_v62 = vsub.f32 %v10627_v7, %v4715_v48  ;;  %v4730_v51 = vsel %vm844_vm8, %v10647_v9, -inf }
 0xc8f   :  { %v4840_v27 = vadd.f32 %v4839_v43, %v4838_v49  ;;  %v4846_v39 = vrot.slane %v4845_v40, 1  ;;  %v4699_v6 = vmax.f32 %v4697_v41, %v4698_v60  ;;  %v4731_v33 = vrot.slane %v4730_v51, 4 }
 0xc90   :  { %v4826_v26 = vadd.f32 %v4825_v52, %v4824_v45  ;;  %v4830_v3 = vrot.slane %v4829_v37, 2  ;;  %v4782_v4 = vmul.f32 1.442695, %v4755_v62  ;;  %v10686_v11 = vmul.f32 0.35355338, %v10632_v24 }
 0xc91   :  { %9684 = vrcp.f32 %v4840_v27  ;;  %v4847_v61 = vadd.f32 %v4846_v39, %v4845_v40  ;;  %v4700_v63 = vrot.slane %v4699_v6, 1  ;;  %v4732_v21 = vmax.f32 %v4730_v51, %v4731_v33 }
 0xc92   :  { %v10688_v19 = vpop.eup %9672  ;;  %9686 = vrcp.f32 %v4826_v26  ;;  %v4831_v7 = vadd.f32 %v4830_v3, %v4829_v37  ;;  %v4716_v16 = vsel %vm844_vm8, %v10686_v11, -inf  ;;  %v10693_v41 = vmul.f32 0.35355338, %v10637_v28 }
 0xc93   :  { %v9675_v35 = vpop.eup %9674  ;;  %9688 = vrcp.f32 %v4847_v61  ;;  %v4862_v24 = vsel %vm844_vm8, %v10688_v19, 0.0  ;;  %v4701_v59 = vmax.f32 %v4699_v6, %v4700_v63  ;;  %v4733_v18 = vrot.slane %v4732_v21, 2 }
 0xc94   :  { %v9677_v54 = vpop.eup %9676  ;;  %v4832_v31 = vrot.slane %v4831_v7, 1  ;;  %v4863_v49 = vrot.slane %v4862_v24, 4  ;;  %9690 = vpow2.f32 %v4782_v4  ;;  %v4717_v0 = vrot.slane %v4716_v16, 4 }
 0xc95   :  { %v9679_v57 = vpop.eup %9678  ;;  %v4753_v45 = vsub.f32 %v10641_v20, %v4701_v59  ;;  %v4734_v56 = vmax.f32 %v4732_v21, %v4733_v18  ;;  %v4737_v28 = vsel %vm844_vm8, %v10693_v41, -inf  ;;  %v10701_v48 = vmul.f32 0.35355338, %v10639_v42 }
 0xc96   :  { %v9681_v43 = vpop.eup %9680  ;;  %v4833_v40 = vadd.f32 %v4832_v31, %v4831_v7  ;;  %v4864_v60 = vadd.f32 %v4863_v49, %v4862_v24  ;;  %v4718_v52 = vmax.f32 %v4716_v16, %v4717_v0  ;;  %v4738_v37 = vrot.slane %v4737_v28, 4 }
 0xc97   :  { %v10703_v62 = vpop.eup %9682  ;;  %v4778_v51 = vmul.f32 1.442695, %v4753_v45  ;;  %v4735_v27 = vrot.slane %v4734_v56, 1  ;;  %v4723_v39 = vsel %vm844_vm8, %v10701_v48, -inf  ;;  %v4920_v63 = vmul.f32 %v9677_v54, %v10649_v55 }
 0xc98   :  { %9692 = vrcp.f32 %v4833_v40  ;;  %v4865_v20 = vrot.slane %v4864_v60, 2  ;;  %v4848_v6 = vsel %vm844_vm8, %v10703_v62, 0.0  ;;  %v4719_v33 = vrot.slane %v4718_v52, 2 }
 0xc99   :  { %v4849_v42 = vrot.slane %v4848_v6, 4  ;;  %9694 = vpow2.f32 %v4778_v51  ;;  %v4736_v26 = vmax.f32 %v4734_v56, %v4735_v27  ;;  %v4739_v3 = vmax.f32 %v4737_v28, %v4738_v37 }
 0xc9a   :  { %v4720_v4 = vmax.f32 %v4718_v52, %v4719_v33  ;;  %v4724_v61 = vrot.slane %v4723_v39, 4  ;;  %v4921_v21 = vmul.f32 %v9681_v43, %v10658_v1  ;;  %v4866_v40 = vadd.f32 %v4865_v20, %v4864_v60 }
 0xc9b   :  { %v9685_v7 = vpop.eup %9684  ;;  %v4850_v16 = vadd.f32 %v4849_v42, %v4848_v6  ;;  %v4758_v24 = vsub.f32 %v10647_v9, %v4736_v26  ;;  %v4740_v59 = vrot.slane %v4739_v3, 2  ;;  %v4923_v28 = vmul.f32 %v9679_v57, %v10654_v22 }
 0xc9c   :  { %v9687_v18 = vpop.eup %9686  ;;  %v4721_v31 = vrot.slane %v4720_v4, 1  ;;  %v4725_v49 = vmax.f32 %v4723_v39, %v4724_v61  ;;  %v4936_v0 = vpack.c.bf16 %v4921_v21, %v4920_v63  ;;  %v4922_v1 = vmul.f32 %v9675_v35, %v10643_v23 }
 0xc9d   :  { %v9689_v45 = vpop.eup %9688  ;;  %v4788_v51 = vmul.f32 1.442695, %v4758_v24  ;;  %v4741_v56 = vmax.f32 %v4739_v3, %v4740_v59  ;;  %v4851_v9 = vrot.slane %v4850_v16, 2  ;;  %v4867_v20 = vrot.slane %v4866_v40, 1 }
 0xc9e   :  { %v10713_v52 = vpop.eup %9690  ;;  %v4722_v55 = vmax.f32 %v4720_v4, %v4721_v31  ;;  %v4726_v54 = vrot.slane %v4725_v49, 2  ;;  %9155 = vmatprep.mubr.msk.bf16.mxu0 %vm844_vm8, %v4936_v0  ;;  %v4937_v57 = vpack.c.bf16 %v4923_v28, %v4922_v1  ;;  %v4924_v6 = vmul.f32 %v9687_v18, %v10668_v38 }
 0xc9f   :  { %v4869_v43 = vsel %vm844_vm8, %v10713_v52, 0.0  ;;  %9696 = vpow2.f32 %v4788_v51  ;;  %v4742_v37 = vrot.slane %v4741_v56, 1  ;;  %v4927_v23 = vmul.f32 %v9689_v45, %v10672_v46 }
 0xca0   :  { %v4870_v27 = vrot.slane %v4869_v43, 4  ;;  %v4756_v60 = vsub.f32 %v10686_v11, %v4722_v55  ;;  %v4727_v39 = vmax.f32 %v4725_v49, %v4726_v54  ;;  %v4852_v4 = vadd.f32 %v4851_v9, %v4850_v16  ;;  %9156 = vmatmul.mubr.msk.bf16.vlgmr.msra.gmra.mrb[64].mxu0 %vm844_vm8, %v4937_v57 }
 0xca1   :  { %v4743_v22 = vmax.f32 %v4741_v56, %v4742_v37  ;;  %v4926_v63 = vmul.f32 %v9685_v7, %v10665_v30  ;;  %v4868_v59 = vadd.f32 %v4867_v20, %v4866_v40 }
 0xca2   :  { %v9693_v33 = vpop.eup %9692  ;;  %v4871_v42 = vadd.f32 %v4870_v27, %v4869_v43  ;;  %v4784_v26 = vmul.f32 1.442695, %v4756_v60  ;;  %v4728_v3 = vrot.slane %v4727_v39, 1  ;;  %v4853_v0 = vrot.slane %v4852_v4, 1 }
 0xca3   :  { %v10722_v35 = vpop.eup %9694  ;;  %v4759_v61 = vsub.f32 %v10693_v41, %v4743_v22  ;;  %v4925_v11 = vmul.f32 %v9693_v33, %v10678_v25  ;;  %v4939_v41 = vpack.c.bf16 %v4927_v23, %v4926_v63 }
 0xca4   :  { %v4872_v21 = vrot.slane %v4871_v42, 2  ;;  %v4855_v38 = vsel %vm844_vm8, %v10722_v35, 0.0  ;;  %9698 = vpow2.f32 %v4784_v26  ;;  %v4729_v24 = vmax.f32 %v4727_v39, %v4728_v3 }
 0xca5   :  { %v4856_v18 = vrot.slane %v4855_v38, 4  ;;  %v4790_v46 = vmul.f32 1.442695, %v4759_v61  ;;  %v4938_v31 = vpack.c.bf16 %v4925_v11, %v4924_v6  ;;  %v4854_v28 = vadd.f32 %v4853_v0, %v4852_v4 }
 0xca6   :  { %v4873_v49 = vadd.f32 %v4872_v21, %v4871_v42  ;;  %v4757_v16 = vsub.f32 %v10701_v48, %v4729_v24 }
 0xca7   :  { %v4857_v45 = vadd.f32 %v4856_v18, %v4855_v38  ;;  %9700 = vpow2.f32 %v4790_v46  ;;  %9159 = vmatprep.mubr.msk.bf16.mxu0 %vm844_vm8, %v4938_v31 }
 0xca8   :  { %v4874_v30 = vrot.slane %v4873_v49, 1  ;;  %v4786_v25 = vmul.f32 1.442695, %v4757_v16  ;;  %9702 = vrcp.f32 %v4868_v59  ;;  %9160 = vmatmul.mubr.msk.bf16.gmra.mrb[68].mxu0 %vm844_vm8, %v4939_v41 }
 0xca9   :  { %v10732_v7 = vpop.eup %9696  ;;  %v4858_v51 = vrot.slane %v4857_v45, 2 }
 0xcaa   :  { %v4875_v56 = vadd.f32 %v4874_v30, %v4873_v49  ;;  %v4890_v40 = vsel %vm844_vm8, %v10732_v7, 0.0  ;;  %9704 = vpow2.f32 %v4786_v25 }
 0xcab   :  { %v4859_v55 = vadd.f32 %v4858_v51, %v4857_v45  ;;  %v4891_v48 = vrot.slane %v4890_v40, 4 }
 0xcac   :  { %9706 = vrcp.f32 %v4875_v56 }
 0xcad   :  { %v4860_v54 = vrot.slane %v4859_v55, 1  ;;  %v4892_v1 = vadd.f32 %v4891_v48, %v4890_v40  ;;  %9708 = vrcp.f32 %v4854_v28 }
 0xcae   :  { %v9699_v9 = vpop.eup %9698 }
 0xcaf   :  { %v4861_v43 = vadd.f32 %v4860_v54, %v4859_v55  ;;  %v4893_v37 = vrot.slane %v4892_v1, 2  ;;  %v4876_v27 = vsel %vm844_vm8, %v9699_v9, 0.0 }
 0xcb0   :  { %v4877_v60 = vrot.slane %v4876_v27, 4 }
 0xcb1   :  { %v9701_v39 = vpop.eup %9700  ;;  %9710 = vrcp.f32 %v4861_v43  ;;  %v4894_v20 = vadd.f32 %v4893_v37, %v4892_v1 }
 0xcb2   :  { %v4878_v22 = vadd.f32 %v4877_v60, %v4876_v27  ;;  %v4897_v57 = vsel %vm844_vm8, %v9701_v39, 0.0  ;;  %v9703_v6 = vpop.eup %9702 }
 0xcb3   :  { %v4898_v33 = vrot.slane %v4897_v57, 4  ;;  %v4895_v3 = vrot.slane %v4894_v20, 1  ;;  %v4930_v38 = vmul.f32 %v9703_v6, %v10688_v19  ;;  %v9444_v6 = vld [vmem:[%s7989_s22 + $0x30] sm:$0xff]  }
 0xcb4   :  { %v9705_v42 = vpop.eup %9704  ;;  %v4879_v26 = vrot.slane %v4878_v22, 2 }
 0xcb5   :  { %v4899_v23 = vadd.f32 %v4898_v33, %v4897_v57  ;;  %v4883_v4 = vsel %vm844_vm8, %v9705_v42, 0.0  ;;  %v4896_v31 = vadd.f32 %v4895_v3, %v4894_v20  ;;  %v9438_v20 = vld [vmem:[%s7989_s22] sm:$0xff]   ;;  %v9443_v57 = vld [vmem:[%s7989_s22 + $0x28] sm:$0xff]   ;;  %v9445_v33 = vld [vmem:[%s7989_s22 + $0x38] sm:$0xff]  }
 0xcb6   :  { %v9707_v61 = vpop.eup %9706  ;;  %v4880_v11 = vadd.f32 %v4879_v26, %v4878_v22  ;;  %v4884_v63 = vrot.slane %v4883_v4, 4  ;;  %9172 = vmatpush3.bf16.msra.mxu0 %v9438_v20  ;;  %v9442_v22 = vld [vmem:[%s7989_s22 + $0x20] sm:$0xff]  }
 0xcb7   :  { %v4900_v21 = vrot.slane %v4899_v23, 2  ;;  %v4931_v24 = vmul.f32 %v9707_v61, %v10713_v52  ;;  %v9709_v46 = vpop.eup %9708  ;;  %9712 = vrcp.f32 %v4896_v31  ;;  %9173 = vmatprep.subr.bf16.mxu0 %v9739_v14 }
 0xcb8   :  { %v4881_v59 = vrot.slane %v4880_v11, 1  ;;  %v4885_v18 = vadd.f32 %v4884_v63, %v4883_v4  ;;  %v4928_v51 = vmul.f32 %v9709_v46, %v10703_v62 }
 0xcb9   :  { %v4901_v49 = vadd.f32 %v4900_v21, %v4899_v23  ;;  %v4941_v16 = vpack.c.bf16 %v4931_v24, %v4930_v38 }
 0xcba   :  { %v4886_v41 = vrot.slane %v4885_v18, 2  ;;  %v4882_v30 = vadd.f32 %v4881_v59, %v4880_v11 }
 0xcbb   :  { %v9711_v0 = vpop.eup %9710  ;;  %v4902_v45 = vrot.slane %v4901_v49, 1 }
 0xcbc   :  { %v4887_v25 = vadd.f32 %v4886_v41, %v4885_v18  ;;  %v4929_v56 = vmul.f32 %v9711_v0, %v10722_v35 }
 0xcbd   :  { %v4903_v40 = vadd.f32 %v4902_v45, %v4901_v49 }
 0xcbe   :  { %v4888_v19 = vrot.slane %v4887_v25, 1  ;;  %v4940_v28 = vpack.c.bf16 %v4929_v56, %v4928_v51 }
 0xcbf   :  { %9714 = vrcp.f32 %v4903_v40 }
 0xcc0   :  { %9716 = vrcp.f32 %v4882_v30  ;;  %v4889_v52 = vadd.f32 %v4888_v19, %v4887_v25  ;;  %9163 = vmatprep.mubr.msk.bf16.mxu0 %vm844_vm8, %v4940_v28 }
 0xcc1   :  { %9164 = vmatmul.mubr.msk.bf16.gmra.mrb[72].mxu0 %vm844_vm8, %v4941_v16  ;;  %v9713_v55 = vpop.eup %9712 }
 0xcc2   :  { %9718 = vrcp.f32 %v4889_v52  ;;  %v4934_v1 = vmul.f32 %v9713_v55, %v10732_v7  ;;  %v9439_v7 = vld [vmem:[%s7989_s22 + $0x8] sm:$0xff]  }
 0xcc3   :  { %9174 = vmatpush3.bf16.msra.mxu0 %v9439_v7 }
 0xcc4   :  { %9175 = vmatprep.subr.bf16.mxu0 %v9739_v14 }
 0xcc9   :  { %v9715_v48 = vpop.eup %9714 }
 0xcca   :  { %v9717_v54 = vpop.eup %9716  ;;  %v4935_v62 = vmul.f32 %v9715_v48, %v9701_v39  ;;  %v9441_v39 = vld [vmem:[%s7989_s22 + $0x18] sm:$0xff]  }
 0xccb   :  { %v4932_v37 = vmul.f32 %v9717_v54, %v9699_v9  ;;  %v9440_v9 = vld [vmem:[%s7989_s22 + $0x10] sm:$0xff]  }
 0xccc   :  { %v9719_v43 = vpop.eup %9718  ;;  %v4943_v35 = vpack.c.bf16 %v4935_v62, %v4934_v1  ;;  %9176 = vmatpush3.bf16.msra.mxu0 %v9440_v9 }
 0xccd   :  { %v4933_v27 = vmul.f32 %v9719_v43, %v9705_v42  ;;  %9177 = vmatprep.subr.bf16.mxu0 %v9739_v14  ;;  %v9738_v42 = vld [vmem:[%s10554_s19] sm:$0x7] }
 0xcce   :  { %v10763_v26 = vrot.slane %v9738_v42, %v10093_v10 }
 0xccf   :  { %v4942_v60 = vpack.c.bf16 %v4933_v27, %v4932_v37 }
 0xcd0   :  { %9178 = vmatpush3.bf16.msra.mxu0 %v9441_v39  ;;  %v4309_v3 = vadd.f32 %v10558_v58, %v10763_v26 }
 0xcd1   :  { %9167 = vmatprep.mubr.msk.bf16.mxu0 %vm844_vm8, %v4942_v60  ;;  %9179 = vmatprep.subr.bf16.mxu0 %v9739_v14 }
 0xcd2   :  { %9168 = vmatmul.mubr.msk.bf16.gmra.mrb[76].mxu0 %vm844_vm8, %v4943_v35 }
 0xcd3   :  { %9187 = vmatprep.mubr.msk.bf16.mxu0 %vm9741_vm1, %v9739_v14 }
 0xcd4   :  { %9180 = vmatpush3.bf16.msra.mxu0 %v9442_v22 }
 0xcd5   :  { %9181 = vmatprep.subr.bf16.mxu0 %v9739_v14 }
 0xcd8   :  { %9182 = vmatpush3.bf16.msra.mxu0 %v9443_v57 }
 0xcd9   :  { %9183 = vmatprep.subr.bf16.mxu0 %v9739_v14 }
 0xcdc   :  { %9184 = vmatpush3.bf16.msra.mxu0 %v9444_v6 }
 0xcdd   :  { %9185 = vmatprep.subr.bf16.mxu0 %v9739_v14 }
 0xce0   :  { %9186 = vmatpush3.bf16.msra.mxu0 %v9445_v33 }
 0xd73   :  { %v9157_v23 = vpop.f32.mrb[64].mxu0 }
 0xd74   :  { %v5067_v4 = vmul.f32 %v9157_v23, %v4309_v3  ;;  %v5002_v61 = vpop.f32.mrb[65].mxu0 }
 0xd75   :  { %v5065_v11 = vmul.f32 %v5002_v61, %v4309_v3  ;;  %v9158_v63 = vpop.f32.mrb[66].mxu0 }
 0xd76   :  { %v5093_v21 = vrot.slane %v5067_v4, 4  ;;  %v5068_v38 = vmul.f32 %v9158_v63, %v4309_v3  ;;  %v5005_v24 = vpop.f32.mrb[67].mxu0 }
 0xd77   :  { %v5081_v59 = vrot.slane %v5065_v11, 4  ;;  %v5066_v18 = vmul.f32 %v5005_v24, %v4309_v3 }
 0xd78   :  { %v5094_v46 = vadd.f32 %v5093_v21, %v5067_v4  ;;  %v5099_v31 = vrot.slane %v5068_v38, 4 }
 0xd79   :  { %v5082_v49 = vadd.f32 %v5081_v59, %v5065_v11  ;;  %v5087_v16 = vrot.slane %v5066_v18, 4 }
 0xd7a   :  { %v5095_v41 = vrot.slane %v5094_v46, 2  ;;  %v5100_v0 = vadd.f32 %v5099_v31, %v5068_v38 }
 0xd7b   :  { %v5083_v45 = vrot.slane %v5082_v49, 2  ;;  %v5088_v30 = vadd.f32 %v5087_v16, %v5066_v18  ;;  %v9161_v25 = vpop.f32.mrb[68].mxu0 }
 0xd7c   :  { %v5096_v58 = vadd.f32 %v5095_v41, %v5094_v46  ;;  %v5101_v51 = vrot.slane %v5100_v0, 2  ;;  %v5071_v56 = vmul.f32 %v9161_v25, %v4309_v3  ;;  %v5018_v40 = vpop.f32.mrb[69].mxu0 }
 0xd7d   :  { %v5084_v19 = vadd.f32 %v5083_v45, %v5082_v49  ;;  %v5089_v28 = vrot.slane %v5088_v30, 2  ;;  %v5069_v52 = vmul.f32 %v5018_v40, %v4309_v3  ;;  %v9162_v55 = vpop.f32.mrb[70].mxu0 }
 0xd7e   :  { %v5097_v48 = vrot.slane %v5096_v58, 1  ;;  %v5102_v54 = vadd.f32 %v5101_v51, %v5100_v0  ;;  %v5117_v1 = vrot.slane %v5071_v56, 4  ;;  %v5072_v62 = vmul.f32 %v9162_v55, %v4309_v3  ;;  %v5021_v43 = vpop.f32.mrb[71].mxu0 }
 0xd7f   :  { %v5085_v35 = vrot.slane %v5084_v19, 1  ;;  %v5090_v37 = vadd.f32 %v5089_v28, %v5088_v30  ;;  %v5105_v27 = vrot.slane %v5069_v52, 4  ;;  %v5070_v60 = vmul.f32 %v5021_v43, %v4309_v3 }
 0xd80   :  { %v5098_v20 = vadd.f32 %v5097_v48, %v5096_v58  ;;  %v5103_v7 = vrot.slane %v5102_v54, 1  ;;  %v5118_v9 = vadd.f32 %v5117_v1, %v5071_v56  ;;  %v5123_v39 = vrot.slane %v5072_v62, 4 }
 0xd81   :  { %v5086_v22 = vadd.f32 %v5085_v35, %v5084_v19  ;;  %v5091_v57 = vrot.slane %v5090_v37, 1  ;;  %v5106_v6 = vadd.f32 %v5105_v27, %v5069_v52  ;;  %v5111_v33 = vrot.slane %v5070_v60, 4 }
 0xd82   :  { %v5104_v42 = vadd.f32 %v5103_v7, %v5102_v54  ;;  %v5119_v23 = vrot.slane %v5118_v9, 2  ;;  %v5124_v4 = vadd.f32 %v5123_v39, %v5072_v62  ;;  %v5179_v38 = vpack.c.bf16 %v5098_v20, %v5098_v20 }
 0xd83   :  { %v5177_v61 = vpack.c.bf16 %v5086_v22, %v5086_v22  ;;  %v5092_v11 = vadd.f32 %v5091_v57, %v5090_v37  ;;  %v5107_v63 = vrot.slane %v5106_v6, 2  ;;  %v5112_v21 = vadd.f32 %v5111_v33, %v5070_v60 }
 0xd84   :  { %v5120_v24 = vadd.f32 %v5119_v23, %v5118_v9  ;;  %v5125_v59 = vrot.slane %v5124_v4, 2  ;;  %v5180_v18 = vpack.c.bf16 %v5104_v42, %v5104_v42  ;;  %v5234_v25 = vunpack.c.l.b16 %v5179_v38 }
 0xd85   :  { %v5178_v3 = vpack.c.bf16 %v5092_v11, %v5092_v11  ;;  %v5108_v46 = vadd.f32 %v5107_v63, %v5106_v6  ;;  %v5113_v31 = vrot.slane %v5112_v21, 2  ;;  %v5232_v41 = vunpack.c.l.b16 %v5177_v61 }
 0xd86   :  { %v5121_v49 = vrot.slane %v5120_v24, 1  ;;  %v5126_v16 = vadd.f32 %v5125_v59, %v5124_v4  ;;  %v5235_v56 = vunpack.c.l.b16 %v5180_v18  ;;  %v4312_v20 = vadd.f32 %v10561_v34, %v10763_v26 }
 0xd87   :  { %v5233_v0 = vunpack.c.l.b16 %v5178_v3  ;;  %v5109_v45 = vrot.slane %v5108_v46, 1  ;;  %v5114_v30 = vadd.f32 %v5113_v31, %v5112_v21 }
 0xd88   :  { %v5122_v58 = vadd.f32 %v5121_v49, %v5120_v24  ;;  %v5127_v51 = vrot.slane %v5126_v16, 1 }
 0xd89   :  { %v5248_v40 = vsel %vm1470_vm9, %v5233_v0, %v5232_v41  ;;  %v5110_v19 = vadd.f32 %v5109_v45, %v5108_v46  ;;  %v5115_v28 = vrot.slane %v5114_v30, 1 }
 0xd8a   :  { %v5249_v52 = vsel %vm1472_vm10, %v5234_v25, %v5248_v40  ;;  %v5128_v55 = vadd.f32 %v5127_v51, %v5126_v16  ;;  %v5183_v62 = vpack.c.bf16 %v5122_v58, %v5122_v58 }
 0xd8b   :  { %v5181_v48 = vpack.c.bf16 %v5110_v19, %v5110_v19  ;;  %v5250_v54 = vsel %vm1474_vm11, %v5235_v56, %v5249_v52  ;;  %v5116_v1 = vadd.f32 %v5115_v28, %v5114_v30 }
 0xd8c   :  { %v5184_v35 = vpack.c.bf16 %v5128_v55, %v5128_v55  ;;  %v5238_v7 = vunpack.c.l.b16 %v5183_v62 }
 0xd8d   :  { %v5236_v43 = vunpack.c.l.b16 %v5181_v48  ;;  %v5182_v37 = vpack.c.bf16 %v5116_v1, %v5116_v1 }
 0xd8e   :  { %v5239_v9 = vunpack.c.l.b16 %v5184_v35 }
 0xd8f   :  { %v5251_v27 = vsel %vm1476_vm12, %v5236_v43, %v5250_v54  ;;  %v5237_v60 = vunpack.c.l.b16 %v5182_v37 }
 0xd91   :  { %v5252_v39 = vsel %vm1478_vm13, %v5237_v60, %v5251_v27 }
 0xd92   :  { %v5253_v57 = vsel %vm1480_vm14, %v5238_v7, %v5252_v39 }
 0xd93   :  { %v10776_v4 = vsel %vm1482_vm15, %v5239_v9, %v5253_v57 }
 0xd94   :  { %v9165_v22 = vpop.f32.mrb[72].mxu0 }
 0xd95   :  { %v5075_v6 = vmul.f32 %v9165_v22, %v4312_v20  ;;  %v5034_v33 = vpop.f32.mrb[73].mxu0 }
 0xd96   :  { %v5073_v42 = vmul.f32 %v5034_v33, %v4312_v20  ;;  %v9166_v23 = vpop.f32.mrb[74].mxu0 }
 0xd97   :  { %v5141_v61 = vrot.slane %v5075_v6, 4  ;;  %v5076_v11 = vmul.f32 %v9166_v23, %v4312_v20  ;;  %v5037_v63 = vpop.f32.mrb[75].mxu0 }
 0xd98   :  { %v5129_v21 = vrot.slane %v5073_v42, 4  ;;  %v5074_v38 = vmul.f32 %v5037_v63, %v4312_v20 }
 0xd99   :  { %v5142_v34 = vadd.f32 %v5141_v61, %v5075_v6  ;;  %v5147_v26 = vrot.slane %v5076_v11, 4 }
 0xd9a   :  { %v5130_v24 = vadd.f32 %v5129_v21, %v5073_v42  ;;  %v5135_v59 = vrot.slane %v5074_v38, 4 }
 0xd9b   :  { %v5143_v18 = vrot.slane %v5142_v34, 2  ;;  %v5148_v3 = vadd.f32 %v5147_v26, %v5076_v11 }
 0xd9c   :  { %v5131_v46 = vrot.slane %v5130_v24, 2  ;;  %v5136_v31 = vadd.f32 %v5135_v59, %v5074_v38 }
 0xd9d   :  { %v5144_v49 = vadd.f32 %v5143_v18, %v5142_v34  ;;  %v5149_v16 = vrot.slane %v5148_v3, 2 }
 0xd9e   :  { %v5132_v41 = vadd.f32 %v5131_v46, %v5130_v24  ;;  %v5137_v0 = vrot.slane %v5136_v31, 2 }
 0xd9f   :  { %v5145_v45 = vrot.slane %v5144_v49, 1  ;;  %v5150_v30 = vadd.f32 %v5149_v16, %v5148_v3 }
 0xda0   :  { %v5133_v25 = vrot.slane %v5132_v41, 1  ;;  %v5138_v58 = vadd.f32 %v5137_v0, %v5136_v31 }
 0xda1   :  { %v5146_v51 = vadd.f32 %v5145_v45, %v5144_v49  ;;  %v5151_v56 = vrot.slane %v5150_v30, 1 }
 0xda2   :  { %v5134_v40 = vadd.f32 %v5133_v25, %v5132_v41  ;;  %v5139_v19 = vrot.slane %v5138_v58, 1 }
 0xda3   :  { %v5152_v28 = vadd.f32 %v5151_v56, %v5150_v30  ;;  %v5187_v48 = vpack.c.bf16 %v5146_v51, %v5146_v51 }
 0xda4   :  { %v5185_v52 = vpack.c.bf16 %v5134_v40, %v5134_v40  ;;  %v5140_v55 = vadd.f32 %v5139_v19, %v5138_v58 }
 0xda5   :  { %v9169_v54 = vpop.f32.mrb[76].mxu0  ;;  %v5188_v1 = vpack.c.bf16 %v5152_v28, %v5152_v28  ;;  %v5242_v57 = vunpack.c.l.b16 %v5187_v48 }
 0xda6   :  { %v5186_v62 = vpack.c.bf16 %v5140_v55, %v5140_v55  ;;  %v5079_v43 = vmul.f32 %v9169_v54, %v4312_v20  ;;  %v5050_v35 = vpop.f32.mrb[77].mxu0  ;;  %v5240_v60 = vunpack.c.l.b16 %v5185_v52 }
 0xda7   :  { %v5077_v37 = vmul.f32 %v5050_v35, %v4312_v20  ;;  %v9170_v27 = vpop.f32.mrb[78].mxu0  ;;  %v5243_v42 = vunpack.c.l.b16 %v5188_v1 }
 0xda8   :  { %v5241_v7 = vunpack.c.l.b16 %v5186_v62  ;;  %v5165_v9 = vrot.slane %v5079_v43, 4  ;;  %v5080_v39 = vmul.f32 %v9170_v27, %v4312_v20  ;;  %v5053_v22 = vpop.f32.mrb[79].mxu0 }
 0xda9   :  { %v5153_v6 = vrot.slane %v5077_v37, 4  ;;  %v5078_v33 = vmul.f32 %v5053_v22, %v4312_v20 }
 0xdaa   :  { %v5255_v23 = vsel %vm1470_vm9, %v5241_v7, %v5240_v60  ;;  %v5166_v61 = vadd.f32 %v5165_v9, %v5079_v43  ;;  %v5171_v11 = vrot.slane %v5080_v39, 4  ;;  %v8316_v60 = vld [vmem:[%s7990_s26] ss:$0 sm:$0xff] }
 0xdab   :  { %v5256_v63 = vsel %vm1472_vm10, %v5242_v57, %v5255_v23  ;;  %v5154_v21 = vadd.f32 %v5153_v6, %v5077_v37  ;;  %v5159_v38 = vrot.slane %v5078_v33, 4 }
 0xdac   :  { %v5167_v34 = vrot.slane %v5166_v61, 2  ;;  %v5257_v26 = vsel %vm1474_vm11, %v5243_v42, %v5256_v63  ;;  %v5172_v24 = vadd.f32 %v5171_v11, %v5080_v39  ;;  %v5416_v11 = vld [vmem:[%s10797_s1 + $0x80] sm:$0xff] }
 0xdad   :  { %v5155_v59 = vrot.slane %v5154_v21, 2  ;;  %v5160_v18 = vadd.f32 %v5159_v38, %v5078_v33 }
 0xdae   :  { %v5168_v3 = vadd.f32 %v5167_v34, %v5166_v61  ;;  %v5173_v46 = vrot.slane %v5172_v24, 2  ;;  %v5400_v61 = vld [vmem:[%s10797_s1] sm:$0xff] }
 0xdaf   :  { %v5156_v31 = vadd.f32 %v5155_v59, %v5154_v21  ;;  %v5161_v49 = vrot.slane %v5160_v18, 2 }
 0xdb0   :  { %v5169_v20 = vrot.slane %v5168_v3, 1  ;;  %v5174_v16 = vadd.f32 %v5173_v46, %v5172_v24 }
 0xdb1   :  { %v5157_v41 = vrot.slane %v5156_v31, 1  ;;  %v5162_v0 = vadd.f32 %v5161_v49, %v5160_v18 }
 0xdb2   :  { %v5170_v45 = vadd.f32 %v5169_v20, %v5168_v3  ;;  %v5175_v30 = vrot.slane %v5174_v16, 1 }
 0xdb3   :  { %v5158_v25 = vadd.f32 %v5157_v41, %v5156_v31  ;;  %v5163_v58 = vrot.slane %v5162_v0, 1  ;;  %v5401_v41 = vld [vmem:[%s10797_s1 + $0x8] sm:$0xff] }
 0xdb4   :  { %v5176_v51 = vadd.f32 %v5175_v30, %v5174_v16  ;;  %v5191_v19 = vpack.c.bf16 %v5170_v45, %v5170_v45 }
 0xdb5   :  { %v5189_v56 = vpack.c.bf16 %v5158_v25, %v5158_v25  ;;  %v5164_v40 = vadd.f32 %v5163_v58, %v5162_v0  ;;  %v5409_v0 = vld [vmem:[%s10797_s1 + $0x48] sm:$0xff] }
 0xdb6   :  { %v5192_v52 = vpack.c.bf16 %v5176_v51, %v5176_v51  ;;  %v5246_v1 = vunpack.c.l.b16 %v5191_v19  ;;  %v8330_v45 = vcombine.high %v5401_v41, %v5409_v0  ;;  %v8329_v30 = vcombine.low %v5401_v41, %v5409_v0  ;;  %v5417_v25 = vld [vmem:[%s10797_s1 + $0x88] sm:$0xff]  ;;  %v5440_v19 = vld [vmem:[%s10797_s1 + $0x140] sm:$0xff] }
 0xdb7   :  { %v5244_v28 = vunpack.c.l.b16 %v5189_v56  ;;  %v5190_v55 = vpack.c.bf16 %v5164_v40, %v5164_v40  ;;  %v5425_v58 = vld [vmem:[%s10797_s1 + $0xc8] sm:$0xff]  ;;  %v5432_v40 = vld [vmem:[%s10797_s1 + $0x100] sm:$0xff] }
 0xdb8   :  { %v5247_v62 = vunpack.c.l.b16 %v5192_v52  ;;  %6106 = vmatprep.subr.bf16.mxu0 %v8330_v45  ;;  %v8346_v51 = vcombine.high %v5417_v25, %v5425_v58  ;;  %v8345_v56 = vcombine.low %v5417_v25, %v5425_v58  ;;  %v8360_v52 = vcombine.high %v5432_v40, %v5440_v19 }
 0xdb9   :  { %v5258_v48 = vsel %vm1476_vm12, %v5244_v28, %v5257_v26  ;;  %v5245_v54 = vunpack.c.l.b16 %v5190_v55  ;;  %v5433_v28 = vld [vmem:[%s10797_s1 + $0x108] sm:$0xff] }
 0xdba   :  { %v5441_v55 = vld [vmem:[%s10797_s1 + $0x148] sm:$0xff] }
 0xdbb   :  { %v5259_v43 = vsel %vm1478_vm13, %v5245_v54, %v5258_v48  ;;  %v8359_v48 = vcombine.low %v5432_v40, %v5440_v19  ;;  %v8361_v54 = vcombine.low %v5433_v28, %v5441_v55 }
 0xdbc   :  { %v5260_v35 = vsel %vm1480_vm14, %v5246_v1, %v5259_v43  ;;  %v8362_v1 = vcombine.high %v5433_v28, %v5441_v55  ;;  %v5456_v43 = vld [vmem:[%s10797_s1 + $0x1c0] sm:$0xff] }
 0xdbd   :  { %v5261_v37 = vsel %vm1482_vm15, %v5247_v62, %v5260_v35  ;;  %v5448_v62 = vld [vmem:[%s10797_s1 + $0x180] sm:$0xff]  ;;  %v5449_v35 = vld [vmem:[%s10797_s1 + $0x188] sm:$0xff] }
 0xdbe   :  { %v5262_v27 = vpack.c.b16 %v5261_v37, %v10776_v4  ;;  %v8376_v37 = vcombine.high %v5448_v62, %v5456_v43  ;;  %v8326_v28 = vld [vmem:[%s7992_s13] ss:$0 sm:$0xff] }
 0xdc0   :  { %9188 = vmatmul.mubr.bf16.vlgmr.msra.gmra.mrb[80].mxu0 %v5262_v27  ;;  %v5457_v27 = vld [vmem:[%s10797_s1 + $0x1c8] sm:$0xff] }
 0xdc1   :  { %6138 = vmatprep.mubr.bf16.mxu0 %v9743_v53  ;;  %6107 = vmatpush1.bf16.msra.mxu0 %v8329_v30 }
 0xdc2   :  { %6108 = vmatprep.subr.bf16.mxu0 %v8346_v51  ;;  %v8325_v51 = vld [vmem:[%s7991_s9] ss:$0 sm:$0xff] }
 0xdc5   :  { %6109 = vmatpush1.bf16.msra.mxu0 %v8345_v56 }
 0xdc6   :  { %6110 = vmatprep.subr.bf16.mxu0 %v8362_v1  ;;  %v5419_v1 = vld [vmem:[%s10797_s1 + $0x98] sm:$0xff] }
 0xdc9   :  { %6111 = vmatpush1.bf16.msra.mxu0 %v8361_v54  ;;  %v5426_v54 = vld [vmem:[%s10797_s1 + $0xd0] sm:$0xff] }
 0xe93   :  { %v5346_v7 = vpop.f32.mrb[80].mxu0 }
 0xe94   :  { %v5347_v9 = vadd.f32 %v8316_v60, %v5346_v7  ;;  %v9189_v39 = vpop.f32.mrb[81].mxu0  ;;  %v8377_v7 = vcombine.low %v5449_v35, %v5457_v27 }
 0xe95   :  { %v5349_v22 = vpop.f32.mrb[82].mxu0  ;;  %v5464_v39 = vld [vmem:[%s10797_s1 + $0x200] sm:$0xff] }
 0xe96   :  { %v5350_v57 = vadd.f32 %v8316_v60, %v5349_v22  ;;  %v9190_v6 = vpop.f32.mrb[83].mxu0  ;;  %v5353_v33 = vadd.f32 %v5347_v9, %v10534_v47  ;;  %v5408_v47 = vld [vmem:[%s10797_s1 + $0x40] sm:$0xff]  ;;  %v8375_v60 = vcombine.low %v5448_v62, %v5456_v43  ;;  %v8378_v9 = vcombine.high %v5449_v35, %v5457_v27  ;;  %v5427_v62 = vld [vmem:[%s10797_s1 + $0xd8] sm:$0xff]  ;;  %v5434_v27 = vld [vmem:[%s10797_s1 + $0x110] sm:$0xff] }
 0xe97   :  { %v8327_v63 = vcombine.low %v5400_v61, %v5408_v47  ;;  %v8328_v21 = vcombine.high %v5400_v61, %v5408_v47  ;;  %v5472_v22 = vld [vmem:[%s10797_s1 + $0x240] sm:$0xff] }
 0xe98   :  { %v5355_v42 = vsel %vm391_vm6, %v5353_v33, 0.0  ;;  %v5354_v4 = vadd.f32 %v5350_v57, %v10536_v50  ;;  %v5424_v50 = vld [vmem:[%s10797_s1 + $0xc0] sm:$0xff]  ;;  %6112 = vmatprep.subr.bf16.mxu0 %v8378_v9  ;;  %v5465_v57 = vld [vmem:[%s10797_s1 + $0x208] sm:$0xff]  ;;  %v8392_v6 = vcombine.high %v5464_v39, %v5472_v22 }
 0xe99   :  { %5356 = vadd.xlane.f32.xlu0 %v5355_v42  ;;  %v8344_v38 = vcombine.high %v5416_v11, %v5424_v50  ;;  %6063 = vmatprep.subr.bf16.mxu1 %v8328_v21  ;;  %v8343_v34 = vcombine.low %v5416_v11, %v5424_v50  ;;  %v8391_v42 = vcombine.low %v5464_v39, %v5472_v22  ;;  %v5480_v61 = vld [vmem:[%s10797_s1 + $0x280] sm:$0xff]  ;;  %v5481_v11 = vld [vmem:[%s10797_s1 + $0x288] sm:$0xff] }
 0xe9a   :  { %v5358_v23 = vsel %vm391_vm6, %v5354_v4, 0.0  ;;  %6064 = vmatpush1.bf16.msra.mxu1 %v8327_v63  ;;  %6113 = vmatpush1.bf16.msra.mxu0 %v8377_v7  ;;  %v5488_v47 = vld [vmem:[%s10797_s1 + $0x2c0] sm:$0xff]  ;;  %v5489_v21 = vld [vmem:[%s10797_s1 + $0x2c8] sm:$0xff]  ;;  %v5443_v7 = vld [vmem:[%s10797_s1 + $0x158] sm:$0xff]  ;;  %v8350_v39 = vcombine.high %v5419_v1, %v5427_v62 }
 0xe9b   :  { %5359 = vadd.xlane.f32.xlu1 %v5358_v23  ;;  %6065 = vmatprep.subr.bf16.mxu1 %v8344_v38  ;;  %v8408_v63 = vcombine.high %v5480_v61, %v5488_v47  ;;  %v8407_v50 = vcombine.low %v5480_v61, %v5488_v47  ;;  %v8409_v38 = vcombine.low %v5481_v11, %v5489_v21 }
 0xe9e   :  { %6066 = vmatpush1.bf16.msra.mxu1 %v8343_v34  ;;  %v8410_v34 = vcombine.high %v5481_v11, %v5489_v21  ;;  %v5474_v21 = vld [vmem:[%s10797_s1 + $0x250] sm:$0xff] }
 0xe9f   :  { %6067 = vmatprep.subr.bf16.mxu1 %v8360_v52 }
 0xea2   :  { %6068 = vmatpush1.bf16.msra.mxu1 %v8359_v48  ;;  %v5418_v48 = vld [vmem:[%s10797_s1 + $0x90] sm:$0xff] }
 0xea3   :  { %6069 = vmatprep.subr.bf16.mxu1 %v8376_v37  ;;  %v8348_v9 = vcombine.high %v5418_v48, %v5426_v54  ;;  %v8347_v22 = vcombine.low %v5418_v48, %v5426_v54  ;;  %v5421_v48 = vld [vmem:[%s10797_s1 + $0xa8] sm:$0xff] }
 0xea4   :  { %v5429_v54 = vld [vmem:[%s10797_s1 + $0xe8] sm:$0xff] }
 0xea6   :  { %6070 = vmatpush1.bf16.msra.mxu1 %v8375_v60  ;;  %v5435_v60 = vld [vmem:[%s10797_s1 + $0x118] sm:$0xff] }
 0xea7   :  { %6071 = vmatprep.subr.bf16.mxu1 %v8392_v6  ;;  %v5450_v6 = vld [vmem:[%s10797_s1 + $0x190] sm:$0xff]  ;;  %v8366_v61 = vcombine.high %v5435_v60, %v5443_v7  ;;  %v8365_v11 = vcombine.low %v5435_v60, %v5443_v7  ;;  %v5444_v60 = vld [vmem:[%s10797_s1 + $0x160] sm:$0xff]  ;;  %v5437_v7 = vld [vmem:[%s10797_s1 + $0x128] sm:$0xff] }
 0xeaa   :  { %6072 = vmatpush1.bf16.msra.mxu1 %v8391_v42  ;;  %v5451_v42 = vld [vmem:[%s10797_s1 + $0x198] sm:$0xff] }
 0xeab   :  { %6073 = vmatprep.subr.bf16.mxu1 %v8408_v63  ;;  %v5466_v63 = vld [vmem:[%s10797_s1 + $0x210] sm:$0xff] }
 0xeae   :  { %6074 = vmatpush1.bf16.msra.mxu1 %v8407_v50  ;;  %v5467_v50 = vld [vmem:[%s10797_s1 + $0x218] sm:$0xff] }
 0xf26   :  { %v5357_v26 = vpop.xlane.xlu0 %5356 }
 0xf27   :  { %v5361_v24 = vmul.f32 0.010416667, %v5357_v26  ;;  %v5402_v26 = vld [vmem:[%s10797_s1 + $0x10] sm:$0xff] }
 0xf28   :  { %v5360_v59 = vpop.xlane.xlu1 %5359 }
 0xf29   :  { %v10803_v18 = vsub.f32 %v5353_v33, %v5361_v24  ;;  %v5362_v3 = vmul.f32 0.010416667, %v5360_v59  ;;  %v5473_v33 = vld [vmem:[%s10797_s1 + $0x248] sm:$0xff]  ;;  %v5410_v24 = vld [vmem:[%s10797_s1 + $0x50] sm:$0xff]  ;;  %v5403_v59 = vld [vmem:[%s10797_s1 + $0x18] sm:$0xff] }
 0xf2a   :  { %v8394_v23 = vcombine.high %v5465_v57, %v5473_v33 }
 0xf2b   :  { %v10805_v46 = vsub.f32 %v5354_v4, %v5362_v3  ;;  %v5365_v31 = vmul.f32 %v10803_v18, %v10803_v18  ;;  %v8393_v4 = vcombine.low %v5465_v57, %v5473_v33  ;;  %v8332_v3 = vcombine.high %v5402_v26, %v5410_v24  ;;  %v5458_v33 = vld [vmem:[%s10797_s1 + $0x1d0] sm:$0xff] }
 0xf2c   :  { %6114 = vmatprep.subr.bf16.mxu0 %v8394_v23  ;;  %v8349_v57 = vcombine.low %v5419_v1, %v5427_v62 }
 0xf2d   :  { %v5367_v49 = vsel %vm391_vm6, %v5365_v31, 0.0  ;;  %v5366_v20 = vmul.f32 %v10805_v46, %v10805_v46  ;;  %6115 = vmatpush1.bf16.msra.mxu0 %v8393_v4  ;;  %v5411_v31 = vld [vmem:[%s10797_s1 + $0x58] sm:$0xff]  ;;  %6149 = vmatprep.subr.bf16.mxu1 %v8332_v3  ;;  %v5482_v3 = vld [vmem:[%s10797_s1 + $0x290] sm:$0xff] }
 0xf2e   :  { %5368 = vadd.xlane.f32.xlu0 %v5367_v49  ;;  %6116 = vmatprep.subr.bf16.mxu0 %v8410_v34  ;;  %v8331_v49 = vcombine.low %v5402_v26, %v5410_v24  ;;  %v5459_v4 = vld [vmem:[%s10797_s1 + $0x1d8] sm:$0xff]  ;;  %v8380_v34 = vcombine.high %v5450_v6, %v5458_v33  ;;  %v8379_v24 = vcombine.low %v5450_v6, %v5458_v33  ;;  %v5452_v33 = vld [vmem:[%s10797_s1 + $0x1a0] sm:$0xff] }
 0xf2f   :  { %v5370_v16 = vsel %vm391_vm6, %v5366_v20, 0.0  ;;  %v8333_v20 = vcombine.low %v5403_v59, %v5411_v31  ;;  %v8382_v26 = vcombine.high %v5451_v42, %v5459_v4  ;;  %v8353_v6 = vcombine.low %v5421_v48, %v5429_v54 }
 0xf30   :  { %5371 = vadd.xlane.f32.xlu1 %v5370_v16  ;;  %v8334_v16 = vcombine.high %v5403_v59, %v5411_v31  ;;  %v8381_v59 = vcombine.low %v5451_v42, %v5459_v4  ;;  %v5490_v31 = vld [vmem:[%s10797_s1 + $0x2d0] sm:$0xff]  ;;  %v5460_v42 = vld [vmem:[%s10797_s1 + $0x1e0] sm:$0xff]  ;;  %v5453_v4 = vld [vmem:[%s10797_s1 + $0x1a8] sm:$0xff] }
 0xf31   :  { %6117 = vmatpush1.bf16.msra.mxu0 %v8409_v38  ;;  %v5475_v38 = vld [vmem:[%s10797_s1 + $0x258] sm:$0xff] }
 0xf32   :  { %6192 = vmatprep.subr.bf16.mxu0 %v8334_v16  ;;  %v8396_v16 = vcombine.high %v5466_v63, %v5474_v21 }
 0xfbb   :  { %v5369_v41 = vpop.xlane.xlu0 %5368 }
 0xfbc   :  { %v5373_v0 = vmul.f32 0.010416667, %v5369_v41  ;;  %v8398_v41 = vcombine.high %v5467_v50, %v5475_v38 }
 0xfbd   :  { %v5372_v45 = vpop.xlane.xlu1 %5371 }
 0xfbe   :  { %v5375_v30 = vadd.f32 1e-05, %v5373_v0  ;;  %v5374_v25 = vmul.f32 0.010416667, %v5372_v45  ;;  %v8395_v0 = vcombine.low %v5466_v63, %v5474_v21  ;;  %v8397_v45 = vcombine.low %v5467_v50, %v5475_v38  ;;  %v5468_v21 = vld [vmem:[%s10797_s1 + $0x220] sm:$0xff]  ;;  %v5469_v38 = vld [vmem:[%s10797_s1 + $0x228] sm:$0xff] }
 0xfbf   :  { %v5476_v50 = vld [vmem:[%s10797_s1 + $0x260] sm:$0xff] }
 0xfc0   :  { %9720 = vrsqrt.f32 %v5375_v30  ;;  %v5376_v58 = vadd.f32 1e-05, %v5374_v25  ;;  %v5404_v30 = vld [vmem:[%s10797_s1 + $0x20] sm:$0xff] }
 0xfc1   :  { %v5412_v25 = vld [vmem:[%s10797_s1 + $0x60] sm:$0xff] }
 0xfc2   :  { %9722 = vrsqrt.f32 %v5376_v58  ;;  %v5405_v58 = vld [vmem:[%s10797_s1 + $0x28] sm:$0xff]  ;;  %v8336_v1 = vcombine.high %v5404_v30, %v5412_v25 }
 0xfca   :  { %v9721_v56 = vpop.eup %9720 }
 0xfcb   :  { %v5379_v40 = vmul.f32 %v9721_v56, %v10803_v18  ;;  %v5442_v18 = vld [vmem:[%s10797_s1 + $0x150] sm:$0xff]  ;;  %v8412_v56 = vcombine.high %v5482_v3, %v5490_v31 }
 0xfcc   :  { %v9723_v19 = vpop.eup %9722  ;;  %v8364_v23 = vcombine.high %v5434_v27, %v5442_v18  ;;  %v8363_v47 = vcombine.low %v5434_v27, %v5442_v18  ;;  %v5436_v18 = vld [vmem:[%s10797_s1 + $0x120] sm:$0xff] }
 0xfcd   :  { %v5388_v52 = vmul.f32 %v8325_v51, %v5379_v40  ;;  %v5380_v55 = vmul.f32 %v9723_v19, %v10805_v46  ;;  %v8411_v19 = vcombine.low %v5482_v3, %v5490_v31  ;;  %v5484_v31 = vld [vmem:[%s10797_s1 + $0x2a0] sm:$0xff] }
 0xfcf   :  { %v5389_v43 = vmul.f32 %v8325_v51, %v5380_v55  ;;  %v10854_v35 = vadd.f32 %v8326_v28, %v5388_v52  ;;  %v5413_v51 = vld [vmem:[%s10797_s1 + $0x68] sm:$0xff]  ;;  %v5420_v52 = vld [vmem:[%s10797_s1 + $0xa0] sm:$0xff] }
 0xfd0   :  { %v5428_v55 = vld [vmem:[%s10797_s1 + $0xe0] sm:$0xff]  ;;  %v8338_v62 = vcombine.high %v5405_v58, %v5413_v51  ;;  %v8337_v27 = vcombine.low %v5405_v58, %v5413_v51  ;;  %v5414_v58 = vld [vmem:[%s10797_s1 + $0x70] sm:$0xff]  ;;  %v5407_v51 = vld [vmem:[%s10797_s1 + $0x38] sm:$0xff] }
 0xfd1   :  { %v10856_v37 = vadd.f32 %v8326_v28, %v5389_v43  ;;  %v8335_v43 = vcombine.low %v5404_v30, %v5412_v25  ;;  %v5406_v25 = vld [vmem:[%s10797_s1 + $0x30] sm:$0xff] }
 0xfd3   :  { %v10864_v46 = vpack.c.bf16 %v10856_v37, %v10854_v35 }
 0xfd5   :  { %8423 = vmatmul.mubr.msk.bf16.vlgmr.msra.gmra.mrb[72].mxu1 %vm391_vm6, %v10864_v46  ;;  %8424 = vmatmul.mubr.msk.bf16.vlgmr.msra.gmra.mrb[84].mxu0 %vm391_vm6, %v10864_v46 }
 0xfd6   :  { %6150 = vmatpush1.bf16.msra.mxu1 %v8331_v49  ;;  %6193 = vmatpush1.bf16.msra.mxu0 %v8333_v20  ;;  %v5483_v49 = vld [vmem:[%s10797_s1 + $0x298] sm:$0xff] }
 0xfd7   :  { %6151 = vmatprep.subr.bf16.mxu1 %v8348_v9  ;;  %6194 = vmatprep.subr.bf16.mxu0 %v8350_v39  ;;  %v5491_v20 = vld [vmem:[%s10797_s1 + $0x2d8] sm:$0xff]  ;;  %v5445_v9 = vld [vmem:[%s10797_s1 + $0x168] sm:$0xff]  ;;  %v8352_v39 = vcombine.high %v5420_v52, %v5428_v55 }
 0xfd8   :  { %6181 = vmatprep.mubr.bf16.mxu1 %v9743_v53  ;;  %6224 = vmatprep.mubr.bf16.mxu0 %v9743_v53  ;;  %v8414_v40 = vcombine.high %v5483_v49, %v5491_v20  ;;  %v8413_v28 = vcombine.low %v5483_v49, %v5491_v20  ;;  %v8369_v63 = vcombine.low %v5437_v7, %v5445_v9  ;;  %v5492_v49 = vld [vmem:[%s10797_s1 + $0x2e0] sm:$0xff]  ;;  %v5485_v20 = vld [vmem:[%s10797_s1 + $0x2a8] sm:$0xff] }
 0xfda   :  { %6152 = vmatpush1.bf16.msra.mxu1 %v8347_v22  ;;  %6195 = vmatpush1.bf16.msra.mxu0 %v8349_v57  ;;  %v8354_v22 = vcombine.high %v5421_v48, %v5429_v54  ;;  %v8351_v57 = vcombine.low %v5420_v52, %v5428_v55  ;;  %v5422_v55 = vld [vmem:[%s10797_s1 + $0xb0] sm:$0xff]  ;;  %v5423_v54 = vld [vmem:[%s10797_s1 + $0xb8] sm:$0xff] }
 0xfdb   :  { %6153 = vmatprep.subr.bf16.mxu1 %v8364_v23  ;;  %6196 = vmatprep.subr.bf16.mxu0 %v8366_v61  ;;  %v5461_v23 = vld [vmem:[%s10797_s1 + $0x1e8] sm:$0xff]  ;;  %v8368_v61 = vcombine.high %v5436_v18, %v5444_v60  ;;  %v5430_v48 = vld [vmem:[%s10797_s1 + $0xf0] sm:$0xff] }
 0xfdc   :  { %v8385_v3 = vcombine.low %v5453_v4, %v5461_v23 }
 0xfde   :  { %6154 = vmatpush1.bf16.msra.mxu1 %v8363_v47  ;;  %6197 = vmatpush1.bf16.msra.mxu0 %v8365_v11  ;;  %v8370_v47 = vcombine.high %v5437_v7, %v5445_v9  ;;  %v8367_v11 = vcombine.low %v5436_v18, %v5444_v60  ;;  %v8356_v60 = vcombine.high %v5422_v55, %v5430_v48  ;;  %v5438_v9 = vld [vmem:[%s10797_s1 + $0x130] sm:$0xff] }
 0xfdf   :  { %6155 = vmatprep.subr.bf16.mxu1 %v8380_v34  ;;  %6198 = vmatprep.subr.bf16.mxu0 %v8382_v26  ;;  %v5477_v34 = vld [vmem:[%s10797_s1 + $0x268] sm:$0xff]  ;;  %v8384_v26 = vcombine.high %v5452_v33, %v5460_v42 }
 0xfe0   :  { %v8401_v30 = vcombine.low %v5469_v38, %v5477_v34 }
 0xfe2   :  { %6156 = vmatpush1.bf16.msra.mxu1 %v8379_v24  ;;  %6199 = vmatpush1.bf16.msra.mxu0 %v8381_v59  ;;  %v8386_v24 = vcombine.high %v5453_v4, %v5461_v23  ;;  %v8383_v59 = vcombine.low %v5452_v33, %v5460_v42  ;;  %v5454_v23 = vld [vmem:[%s10797_s1 + $0x1b0] sm:$0xff] }
 0xfe3   :  { %6157 = vmatprep.subr.bf16.mxu1 %v8396_v16  ;;  %6200 = vmatprep.subr.bf16.mxu0 %v8398_v41  ;;  %v5493_v16 = vld [vmem:[%s10797_s1 + $0x2e8] sm:$0xff]  ;;  %v8400_v41 = vcombine.high %v5468_v21, %v5476_v50 }
 0xfe4   :  { %v8417_v52 = vcombine.low %v5485_v20, %v5493_v16 }
 0xfe6   :  { %6158 = vmatpush1.bf16.msra.mxu1 %v8395_v0  ;;  %6201 = vmatpush1.bf16.msra.mxu0 %v8397_v45  ;;  %v8402_v0 = vcombine.high %v5469_v38, %v5477_v34  ;;  %v8399_v45 = vcombine.low %v5468_v21, %v5476_v50  ;;  %v5470_v34 = vld [vmem:[%s10797_s1 + $0x230] sm:$0xff] }
 0xfe7   :  { %6159 = vmatprep.subr.bf16.mxu1 %v8412_v56  ;;  %6202 = vmatprep.subr.bf16.mxu0 %v8414_v40  ;;  %v5415_v56 = vld [vmem:[%s10797_s1 + $0x78] sm:$0xff]  ;;  %v8416_v40 = vcombine.high %v5484_v31, %v5492_v49 }
 0xfe8   :  { %v8341_v18 = vcombine.low %v5407_v51, %v5415_v56 }
 0xfea   :  { %6160 = vmatpush1.bf16.msra.mxu1 %v8411_v19  ;;  %6203 = vmatpush1.bf16.msra.mxu0 %v8413_v28  ;;  %v8418_v19 = vcombine.high %v5485_v20, %v5493_v16  ;;  %v8415_v28 = vcombine.low %v5484_v31, %v5492_v49  ;;  %v5486_v20 = vld [vmem:[%s10797_s1 + $0x2b0] sm:$0xff] }
 0xfeb   :  { %6235 = vmatprep.subr.bf16.mxu1 %v8336_v1  ;;  %6278 = vmatprep.subr.bf16.mxu0 %v8338_v62  ;;  %v5431_v1 = vld [vmem:[%s10797_s1 + $0xf8] sm:$0xff]  ;;  %v8340_v62 = vcombine.high %v5406_v25, %v5414_v58  ;;  %v5494_v16 = vld [vmem:[%s10797_s1 + $0x2f0] sm:$0xff] }
 0xfec   :  { %v8358_v7 = vcombine.high %v5423_v54, %v5431_v1  ;;  %v8357_v33 = vcombine.low %v5423_v54, %v5431_v1  ;;  %v9452_v54 = vld [vmem:[%s10840_s5 + $0x8] sm:$0xff]  }
 0xfed   :  { %8425 = vmatmul.mubr.msk.bf16.vlgmr.msra.gmra.mrb[76].mxu1 %vm391_vm6, %v10864_v46  ;;  %8426 = vmatmul.mubr.msk.bf16.vlgmr.msra.gmra.mrb[88].mxu0 %vm391_vm6, %v10864_v46  ;;  %v9453_v1 = vld [vmem:[%s10840_s5 + $0x88] sm:$0xff]  }
 0xfee   :  { %6236 = vmatpush1.bf16.msra.mxu1 %v8335_v43  ;;  %6279 = vmatpush1.bf16.msra.mxu0 %v8337_v27  ;;  %v8342_v43 = vcombine.high %v5407_v51, %v5415_v56  ;;  %v8339_v27 = vcombine.low %v5406_v25, %v5414_v58  ;;  %v8420_v25 = vcombine.high %v5486_v20, %v5494_v16 }
 0xfef   :  { %6237 = vmatprep.subr.bf16.mxu1 %v8352_v39  ;;  %6280 = vmatprep.subr.bf16.mxu0 %v8354_v22  ;;  %v5446_v39 = vld [vmem:[%s10797_s1 + $0x170] sm:$0xff]  ;;  %v5439_v22 = vld [vmem:[%s10797_s1 + $0x138] sm:$0xff]  ;;  %v8419_v51 = vcombine.low %v5486_v20, %v5494_v16 }
 0xff0   :  { %6267 = vmatprep.mubr.bf16.mxu1 %v9743_v53  ;;  %6310 = vmatprep.mubr.bf16.mxu0 %v9743_v53  ;;  %v8372_v42 = vcombine.high %v5438_v9, %v5446_v39 }
 0xff2   :  { %6238 = vmatpush1.bf16.msra.mxu1 %v8351_v57  ;;  %6281 = vmatpush1.bf16.msra.mxu0 %v8353_v6  ;;  %v5447_v57 = vld [vmem:[%s10797_s1 + $0x178] sm:$0xff]  ;;  %v8355_v6 = vcombine.low %v5422_v55, %v5430_v48  ;;  %v9450_v55 = vld [vmem:[%s10840_s5 + $0x48] sm:$0xff]  }
 0xff3   :  { %6239 = vmatprep.subr.bf16.mxu1 %v8368_v61  ;;  %6282 = vmatprep.subr.bf16.mxu0 %v8370_v47  ;;  %v8374_v4 = vcombine.high %v5439_v22, %v5447_v57  ;;  %v5462_v61 = vld [vmem:[%s10797_s1 + $0x1f0] sm:$0xff]  ;;  %v5455_v47 = vld [vmem:[%s10797_s1 + $0x1b8] sm:$0xff]  ;;  %v8373_v21 = vcombine.low %v5439_v22, %v5447_v57  ;;  %v9451_v48 = vld [vmem:[%s10840_s5 + $0xc8] sm:$0xff]  }
 0xff4   :  { %v8388_v50 = vcombine.high %v5454_v23, %v5462_v61  ;;  %v9463_v22 = vld [vmem:[%s10840_s5 + $0xe0] sm:$0xff]  }
 0xff5   :  { %v9464_v57 = vld [vmem:[%s10840_s5 + $0x20] sm:$0xff]  }
 0xff6   :  { %6240 = vmatpush1.bf16.msra.mxu1 %v8367_v11  ;;  %6283 = vmatpush1.bf16.msra.mxu0 %v8369_v63  ;;  %v5463_v11 = vld [vmem:[%s10797_s1 + $0x1f8] sm:$0xff]  ;;  %v8371_v63 = vcombine.low %v5438_v9, %v5446_v39  ;;  %v9462_v39 = vld [vmem:[%s10840_s5 + $0x60] sm:$0xff]  }
 0xff7   :  { %6241 = vmatprep.subr.bf16.mxu1 %v8384_v26  ;;  %6284 = vmatprep.subr.bf16.mxu0 %v8386_v24  ;;  %v8390_v38 = vcombine.high %v5455_v47, %v5463_v11  ;;  %v5478_v26 = vld [vmem:[%s10797_s1 + $0x270] sm:$0xff]  ;;  %v5471_v24 = vld [vmem:[%s10797_s1 + $0x238] sm:$0xff] }
 0xff8   :  { %v8404_v31 = vcombine.high %v5470_v34, %v5478_v26  ;;  %v9461_v9 = vld [vmem:[%s10840_s5 + $0x98] sm:$0xff]  }
 0xffa   :  { %6242 = vmatpush1.bf16.msra.mxu1 %v8383_v59  ;;  %6285 = vmatpush1.bf16.msra.mxu0 %v8385_v3  ;;  %v5479_v59 = vld [vmem:[%s10797_s1 + $0x278] sm:$0xff]  ;;  %v8387_v3 = vcombine.low %v5454_v23, %v5462_v61  ;;  %v9469_v23 = vld [vmem:[%s10840_s5 + $0xa8] sm:$0xff]   ;;  %v9470_v61 = vld [vmem:[%s10840_s5 + $0x70] sm:$0xff]  }
 0xffb   :  { %6243 = vmatprep.subr.bf16.mxu1 %v8400_v41  ;;  %6286 = vmatprep.subr.bf16.mxu0 %v8402_v0  ;;  %v8406_v49 = vcombine.high %v5471_v24, %v5479_v59  ;;  %v5487_v41 = vld [vmem:[%s10797_s1 + $0x2b8] sm:$0xff] }
 0xffc   :  { %v5495_v0 = vld [vmem:[%s10797_s1 + $0x2f8] sm:$0xff] }
 0xffd   :  { %v8422_v58 = vcombine.high %v5487_v41, %v5495_v0  ;;  %v8421_v56 = vcombine.low %v5487_v41, %v5495_v0 }
 0xffe   :  { %6244 = vmatpush1.bf16.msra.mxu1 %v8399_v45  ;;  %6287 = vmatpush1.bf16.msra.mxu0 %v8401_v30  ;;  %v8403_v45 = vcombine.low %v5470_v34, %v5478_v26  ;;  %v8405_v30 = vcombine.low %v5471_v24, %v5479_v59  ;;  %v9477_v34 = vld [vmem:[%s10840_s5 + $0xb8] sm:$0xff]   ;;  %v9478_v26 = vld [vmem:[%s10840_s5 + $0x140] sm:$0xff]  }
 0xfff   :  { %6245 = vmatprep.subr.bf16.mxu1 %v8416_v40  ;;  %6288 = vmatprep.subr.bf16.mxu0 %v8418_v19  ;;  %v9446_v40 = vld [vmem:[%s10840_s5 + $0x40] sm:$0xff]  }
0x1000   :  { %v9447_v19 = vld [vmem:[%s10840_s5 + $0xc0] sm:$0xff]  }
0x1001   :  { %v9479_v24 = vld [vmem:[%s10840_s5 + $0x1c0] sm:$0xff]  }
0x1002   :  { %6246 = vmatpush1.bf16.msra.mxu1 %v8415_v28  ;;  %6289 = vmatpush1.bf16.msra.mxu0 %v8417_v52  ;;  %v9448_v28 = vld [vmem:[%s10840_s5] sm:$0xff]  }
0x1003   :  { %6321 = vmatprep.subr.bf16.mxu1 %v8340_v62  ;;  %6364 = vmatprep.subr.bf16.mxu0 %v8342_v43  ;;  %v9449_v52 = vld [vmem:[%s10840_s5 + $0x80] sm:$0xff]   ;;  %v9454_v62 = vld [vmem:[%s10840_s5 + $0x50] sm:$0xff]  }
0x1004   :  { %v9455_v43 = vld [vmem:[%s10840_s5 + $0xd0] sm:$0xff]   ;;  %v10988_v59 = vld [vmem:[%s10985_s16] sm:$0xff] }
0x1005   :  { %8427 = vmatmul.mubr.msk.bf16.vlgmr.msra.gmra.mrb[80].mxu1 %vm391_vm6, %v10864_v46  ;;  %8428 = vmatmul.mubr.msk.bf16.vlgmr.msra.gmra.mrb[92].mxu0 %vm391_vm6, %v10864_v46 }
0x1006   :  { %6322 = vmatpush1.bf16.msra.mxu1 %v8339_v27  ;;  %6365 = vmatpush1.bf16.msra.mxu0 %v8341_v18  ;;  %v9456_v27 = vld [vmem:[%s10840_s5 + $0x10] sm:$0xff]  }
0x1007   :  { %6323 = vmatprep.subr.bf16.mxu1 %v8356_v60  ;;  %6366 = vmatprep.subr.bf16.mxu0 %v8358_v7  ;;  %v9457_v18 = vld [vmem:[%s10840_s5 + $0x90] sm:$0xff]   ;;  %v9459_v60 = vld [vmem:[%s10840_s5 + $0xd8] sm:$0xff]  }
0x1008   :  { %6353 = vmatprep.mubr.bf16.mxu1 %v9743_v53  ;;  %6396 = vmatprep.mubr.bf16.mxu0 %v9743_v53  ;;  %v8389_v53 = vcombine.low %v5455_v47, %v5463_v11  ;;  %v9460_v7 = vld [vmem:[%s10840_s5 + $0x18] sm:$0xff]   ;;  %v9471_v47 = vld [vmem:[%s10840_s5 + $0xf0] sm:$0xff]  }
0x1009   :  { %v9472_v11 = vld [vmem:[%s10840_s5 + $0x30] sm:$0xff]  }
0x100a   :  { %6324 = vmatpush1.bf16.msra.mxu1 %v8355_v6  ;;  %6367 = vmatpush1.bf16.msra.mxu0 %v8357_v33  ;;  %v9465_v6 = vld [vmem:[%s10840_s5 + $0xa0] sm:$0xff]   ;;  %v9466_v33 = vld [vmem:[%s10840_s5 + $0x68] sm:$0xff]  }
0x100b   :  { %6325 = vmatprep.subr.bf16.mxu1 %v8372_v42  ;;  %6368 = vmatprep.subr.bf16.mxu0 %v8374_v4  ;;  %v9467_v42 = vld [vmem:[%s10840_s5 + $0xe8] sm:$0xff]  }
0x100c   :  { %v9468_v4 = vld [vmem:[%s10840_s5 + $0x28] sm:$0xff]  }
0x100e   :  { %6326 = vmatpush1.bf16.msra.mxu1 %v8371_v63  ;;  %6369 = vmatpush1.bf16.msra.mxu0 %v8373_v21  ;;  %v9473_v63 = vld [vmem:[%s10840_s5 + $0xb0] sm:$0xff]   ;;  %v9474_v21 = vld [vmem:[%s10840_s5 + $0x78] sm:$0xff]  }
0x100f   :  { %6327 = vmatprep.subr.bf16.mxu1 %v8388_v50  ;;  %6370 = vmatprep.subr.bf16.mxu0 %v8390_v38  ;;  %v9475_v50 = vld [vmem:[%s10840_s5 + $0xf8] sm:$0xff]  }
0x1010   :  { %v9476_v38 = vld [vmem:[%s10840_s5 + $0x38] sm:$0xff]  }
0x1012   :  { %6328 = vmatpush1.bf16.msra.mxu1 %v8387_v3  ;;  %6371 = vmatpush1.bf16.msra.mxu0 %v8389_v53  ;;  %v5503_v3 = vrot.slane %v10988_v59, %v9867_v12  ;;  %v5511_v53 = vrot.slane %v10988_v59, %v10093_v10 }
0x1013   :  { %6329 = vmatprep.subr.bf16.mxu1 %v8404_v31  ;;  %6372 = vmatprep.subr.bf16.mxu0 %v8406_v49  ;;  %v5507_v31 = vrot.slane %v10988_v59, %v9872_v17  ;;  %v5515_v49 = vrot.slane %v10988_v59, %v10325_v13 }
0x1016   :  { %6330 = vmatpush1.bf16.msra.mxu1 %v8403_v45  ;;  %6373 = vmatpush1.bf16.msra.mxu0 %v8405_v30 }
0x1017   :  { %6331 = vmatprep.subr.bf16.mxu1 %v8420_v25  ;;  %6374 = vmatprep.subr.bf16.mxu0 %v8422_v58 }
0x101a   :  { %6332 = vmatpush1.bf16.msra.mxu1 %v8419_v51  ;;  %6375 = vmatpush1.bf16.msra.mxu0 %v8421_v56 }
0x101b   :  { %8830 = vmatprep.subr.bf16.mxu1 %v9446_v40  ;;  %8852 = vmatprep.subr.bf16.mxu0 %v9447_v19 }
0x101d   :  { %8429 = vmatmul.mubr.msk.bf16.vlgmr.msra.gmra.mrb[84].mxu1 %vm391_vm6, %v10864_v46  ;;  %8430 = vmatmul.mubr.msk.bf16.vlgmr.msra.gmra.mrb[96].mxu0 %vm391_vm6, %v10864_v46  ;;  %v9458_v46 = vld [vmem:[%s10840_s5 + $0x58] sm:$0xff]  }
0x101e   :  { %8831 = vmatpush3.bf16.msra.mxu1 %v9448_v28  ;;  %8853 = vmatpush3.bf16.msra.mxu0 %v9449_v52 }
0x101f   :  { %8832 = vmatprep.subr.bf16.mxu1 %v9450_v55  ;;  %8854 = vmatprep.subr.bf16.mxu0 %v9451_v48 }
0x1022   :  { %8833 = vmatpush3.bf16.msra.mxu1 %v9452_v54  ;;  %8855 = vmatpush3.bf16.msra.mxu0 %v9453_v1 }
0x1023   :  { %8834 = vmatprep.subr.bf16.mxu1 %v9454_v62  ;;  %8856 = vmatprep.subr.bf16.mxu0 %v9455_v43 }
0x1026   :  { %8835 = vmatpush3.bf16.msra.mxu1 %v9456_v27  ;;  %8857 = vmatpush3.bf16.msra.mxu0 %v9457_v18 }
0x1027   :  { %8836 = vmatprep.subr.bf16.mxu1 %v9458_v46  ;;  %8858 = vmatprep.subr.bf16.mxu0 %v9459_v60 }
0x102a   :  { %8837 = vmatpush3.bf16.msra.mxu1 %v9460_v7  ;;  %8859 = vmatpush3.bf16.msra.mxu0 %v9461_v9 }
0x102b   :  { %8838 = vmatprep.subr.bf16.mxu1 %v9462_v39  ;;  %8860 = vmatprep.subr.bf16.mxu0 %v9463_v22 }
0x102e   :  { %8839 = vmatpush3.bf16.msra.mxu1 %v9464_v57  ;;  %8861 = vmatpush3.bf16.msra.mxu0 %v9465_v6  ;;  %v9480_v57 = vld [vmem:[%s10840_s5 + $0x100] sm:$0xff]  }
0x102f   :  { %8840 = vmatprep.subr.bf16.mxu1 %v9466_v33  ;;  %8862 = vmatprep.subr.bf16.mxu0 %v9467_v42  ;;  %v9481_v6 = vld [vmem:[%s10840_s5 + $0x180] sm:$0xff]   ;;  %v9482_v33 = vld [vmem:[%s10840_s5 + $0x148] sm:$0xff]  }
0x1030   :  { %v9483_v42 = vld [vmem:[%s10840_s5 + $0x1c8] sm:$0xff]  }
0x1032   :  { %8841 = vmatpush3.bf16.msra.mxu1 %v9468_v4  ;;  %8863 = vmatpush3.bf16.msra.mxu0 %v9469_v23  ;;  %v9484_v4 = vld [vmem:[%s10840_s5 + $0x108] sm:$0xff]  }
0x1033   :  { %8842 = vmatprep.subr.bf16.mxu1 %v9470_v61  ;;  %8864 = vmatprep.subr.bf16.mxu0 %v9471_v47  ;;  %v9485_v23 = vld [vmem:[%s10840_s5 + $0x188] sm:$0xff]   ;;  %v9486_v61 = vld [vmem:[%s10840_s5 + $0x150] sm:$0xff]  }
0x1034   :  { %v9487_v47 = vld [vmem:[%s10840_s5 + $0x1d0] sm:$0xff]  }
0x1036   :  { %8843 = vmatpush3.bf16.msra.mxu1 %v9472_v11  ;;  %8865 = vmatpush3.bf16.msra.mxu0 %v9473_v63  ;;  %v9488_v11 = vld [vmem:[%s10840_s5 + $0x110] sm:$0xff]  }
0x1037   :  { %8844 = vmatprep.subr.bf16.mxu1 %v9474_v21  ;;  %8866 = vmatprep.subr.bf16.mxu0 %v9475_v50  ;;  %v9489_v63 = vld [vmem:[%s10840_s5 + $0x190] sm:$0xff]   ;;  %v9490_v21 = vld [vmem:[%s10840_s5 + $0x158] sm:$0xff]  }
0x1038   :  { %v9491_v50 = vld [vmem:[%s10840_s5 + $0x1d8] sm:$0xff]  }
0x103a   :  { %8845 = vmatpush3.bf16.msra.mxu1 %v9476_v38  ;;  %8867 = vmatpush3.bf16.msra.mxu0 %v9477_v34  ;;  %v9492_v38 = vld [vmem:[%s10840_s5 + $0x118] sm:$0xff]  }
0x103b   :  { %8874 = vmatprep.subr.bf16.mxu1 %v9478_v26  ;;  %8896 = vmatprep.subr.bf16.mxu0 %v9479_v24  ;;  %v9493_v34 = vld [vmem:[%s10840_s5 + $0x198] sm:$0xff]   ;;  %v5519_v26 = vrot.slane %v10988_v59, %v10348_v29  ;;  %v5527_v24 = vrot.slane %v10988_v59, %v10351_v32 }
0x10a8   :  { %v6097_v20 = vpop.f32.mrb[72].mxu1  ;;  %v6140_v16 = vpop.f32.mrb[84].mxu0 }
0x10a9   :  { %v6098_v41 = vadd.f32 %v6097_v20, %v5503_v3  ;;  %v6141_v0 = vadd.f32 %v6140_v16, %v5511_v53  ;;  %v6099_v45 = vpop.f32.mrb[73].mxu1  ;;  %v6142_v30 = vpop.f32.mrb[85].mxu0 }
0x10aa   :  { %v6100_v25 = vadd.f32 %v6099_v45, %v5507_v31  ;;  %v6143_v58 = vadd.f32 %v6142_v30, %v5515_v49  ;;  %v6101_v51 = vpop.f32.mrb[74].mxu1  ;;  %v6144_v56 = vpop.f32.mrb[86].mxu0 }
0x10ab   :  { %v6102_v40 = vadd.f32 %v6101_v51, %v5503_v3  ;;  %v6145_v19 = vadd.f32 %v6144_v56, %v5511_v53  ;;  %v6103_v28 = vpop.f32.mrb[75].mxu1  ;;  %v6146_v52 = vpop.f32.mrb[87].mxu0  ;;  %v6407_v54 = vmax.f32 %v6098_v41, 0.0  ;;  %v6409_v1 = vmax.f32 %v6141_v0, 0.0  ;;  %v9494_v3 = vld [vmem:[%s10840_s5 + $0x160] sm:$0xff]   ;;  %v9498_v51 = vld [vmem:[%s10840_s5 + $0x168] sm:$0xff]  }
0x10ac   :  { %v6104_v55 = vadd.f32 %v6103_v28, %v5507_v31  ;;  %v6147_v48 = vadd.f32 %v6146_v52, %v5515_v49  ;;  %v6408_v27 = vmax.f32 %v6100_v25, 0.0  ;;  %v6410_v18 = vmax.f32 %v6143_v58, 0.0  ;;  %v9495_v53 = vld [vmem:[%s10840_s5 + $0x1e0] sm:$0xff]   ;;  %v9499_v56 = vld [vmem:[%s10840_s5 + $0x1e8] sm:$0xff]  }
0x10ad   :  { %v6423_v62 = vmax.f32 %v6102_v40, 0.0  ;;  %v6425_v43 = vmax.f32 %v6145_v19, 0.0  ;;  %v5523_v31 = vrot.slane %v10988_v59, %v10354_v2  ;;  %v5531_v49 = vrot.slane %v10988_v59, %v10357_v15  ;;  %v9496_v41 = vld [vmem:[%s10840_s5 + $0x120] sm:$0xff]  }
0x10ae   :  { %v6424_v46 = vmax.f32 %v6104_v55, 0.0  ;;  %v6426_v60 = vmax.f32 %v6147_v48, 0.0  ;;  %v9497_v0 = vld [vmem:[%s10840_s5 + $0x1a0] sm:$0xff]  }
0x10af   :  { %v6439_v7 = vpack.c.bf16 %v6423_v62, %v6407_v54  ;;  %v6441_v9 = vpack.c.bf16 %v6425_v43, %v6409_v1  ;;  %v9500_v43 = vld [vmem:[%s10840_s5 + $0x128] sm:$0xff]  }
0x10b0   :  { %v6440_v39 = vpack.c.bf16 %v6424_v46, %v6408_v27  ;;  %v6442_v22 = vpack.c.bf16 %v6426_v60, %v6410_v18  ;;  %v9501_v27 = vld [vmem:[%s10840_s5 + $0x1a8] sm:$0xff]  }
0x10b2   :  { %7518 = vmatprep.mubr.bf16.mxu1 %v6440_v39  ;;  %7559 = vmatprep.mubr.bf16.mxu0 %v6442_v22  ;;  %v9503_v39 = vld [vmem:[%s10840_s5 + $0x1f0] sm:$0xff]  }
0x10b3   :  { %7519 = vmatmul.mubr.bf16.vlgmr.msra.gmra.mrb[88].mxu1 %v6439_v7  ;;  %7560 = vmatmul.mubr.bf16.vlgmr.msra.gmra.mrb[100].mxu0 %v6441_v9  ;;  %v9502_v9 = vld [vmem:[%s10840_s5 + $0x170] sm:$0xff]  }
0x10b4   :  { %8875 = vmatpush3.bf16.msra.mxu1 %v9480_v57  ;;  %8897 = vmatpush3.bf16.msra.mxu0 %v9481_v6 }
0x10b5   :  { %8876 = vmatprep.subr.bf16.mxu1 %v9482_v33  ;;  %8898 = vmatprep.subr.bf16.mxu0 %v9483_v42 }
0x10b8   :  { %8877 = vmatpush3.bf16.msra.mxu1 %v9484_v4  ;;  %8899 = vmatpush3.bf16.msra.mxu0 %v9485_v23 }
0x10b9   :  { %8878 = vmatprep.subr.bf16.mxu1 %v9486_v61  ;;  %8900 = vmatprep.subr.bf16.mxu0 %v9487_v47  ;;  %v9504_v47 = vld [vmem:[%s10840_s5 + $0x130] sm:$0xff]  }
0x10bc   :  { %8879 = vmatpush3.bf16.msra.mxu1 %v9488_v11  ;;  %8901 = vmatpush3.bf16.msra.mxu0 %v9489_v63  ;;  %v9505_v11 = vld [vmem:[%s10840_s5 + $0x1b0] sm:$0xff]   ;;  %v9506_v63 = vld [vmem:[%s10840_s5 + $0x178] sm:$0xff]  }
0x10bd   :  { %8880 = vmatprep.subr.bf16.mxu1 %v9490_v21  ;;  %8902 = vmatprep.subr.bf16.mxu0 %v9491_v50  ;;  %v9507_v21 = vld [vmem:[%s10840_s5 + $0x1f8] sm:$0xff]  }
0x10be   :  { %v9508_v50 = vld [vmem:[%s10840_s5 + $0x138] sm:$0xff]  }
0x10c0   :  { %v6183_v20 = vpop.f32.mrb[76].mxu1  ;;  %v6226_v16 = vpop.f32.mrb[88].mxu0  ;;  %8881 = vmatpush3.bf16.msra.mxu1 %v9492_v38  ;;  %8903 = vmatpush3.bf16.msra.mxu0 %v9493_v34  ;;  %v9509_v38 = vld [vmem:[%s10840_s5 + $0x1b8] sm:$0xff]   ;;  %v9510_v34 = vld [vmem:[%s10840_s5 + $0x240] sm:$0xff]  }
0x10c1   :  { %v6184_v45 = vadd.f32 %v6183_v20, %v5519_v26  ;;  %v6227_v30 = vadd.f32 %v6226_v16, %v5527_v24  ;;  %v6185_v25 = vpop.f32.mrb[77].mxu1  ;;  %v6228_v58 = vpop.f32.mrb[89].mxu0  ;;  %8882 = vmatprep.subr.bf16.mxu1 %v9494_v3  ;;  %8904 = vmatprep.subr.bf16.mxu0 %v9495_v53  ;;  %v9513_v3 = vld [vmem:[%s10840_s5 + $0x280] sm:$0xff]   ;;  %v9514_v53 = vld [vmem:[%s10840_s5 + $0x248] sm:$0xff]  }
0x10c2   :  { %v6186_v40 = vadd.f32 %v6185_v25, %v5523_v31  ;;  %v6229_v19 = vadd.f32 %v6228_v58, %v5531_v49  ;;  %v6187_v28 = vpop.f32.mrb[78].mxu1  ;;  %v6230_v59 = vpop.f32.mrb[90].mxu0  ;;  %v9516_v20 = vld [vmem:[%s10840_s5 + $0x208] sm:$0xff]  }
0x10c3   :  { %v6188_v52 = vadd.f32 %v6187_v28, %v5519_v26  ;;  %v6231_v55 = vadd.f32 %v6230_v59, %v5527_v24  ;;  %v6189_v48 = vpop.f32.mrb[79].mxu1  ;;  %v6232_v54 = vpop.f32.mrb[91].mxu0  ;;  %v6411_v18 = vmax.f32 %v6184_v45, 0.0  ;;  %v6413_v46 = vmax.f32 %v6227_v30, 0.0  ;;  %v9511_v26 = vld [vmem:[%s10840_s5 + $0x2c0] sm:$0xff]   ;;  %v9517_v16 = vld [vmem:[%s10840_s5 + $0x288] sm:$0xff]  }
0x10c4   :  { %v6190_v1 = vadd.f32 %v6189_v48, %v5523_v31  ;;  %v6233_v62 = vadd.f32 %v6232_v54, %v5531_v49  ;;  %8883 = vmatpush3.bf16.msra.mxu1 %v9496_v41  ;;  %8905 = vmatpush3.bf16.msra.mxu0 %v9497_v0  ;;  %v6412_v22 = vmax.f32 %v6186_v40, 0.0  ;;  %v6414_v57 = vmax.f32 %v6229_v19, 0.0  ;;  %v9512_v24 = vld [vmem:[%s10840_s5 + $0x200] sm:$0xff]   ;;  %v9515_v31 = vld [vmem:[%s10840_s5 + $0x2c8] sm:$0xff]   ;;  %v9518_v45 = vld [vmem:[%s10840_s5 + $0x250] sm:$0xff]  }
0x10c5   :  { %v6427_v60 = vmax.f32 %v6188_v52, 0.0  ;;  %v6429_v7 = vmax.f32 %v6231_v55, 0.0  ;;  %8884 = vmatprep.subr.bf16.mxu1 %v9498_v51  ;;  %8906 = vmatprep.subr.bf16.mxu0 %v9499_v56  ;;  %v11043_v49 = vld [vmem:[%s10985_s16 + $0x8] sm:$0xff]  ;;  %v9519_v30 = vld [vmem:[%s10840_s5 + $0x2d0] sm:$0xff]   ;;  %v9522_v52 = vld [vmem:[%s10840_s5 + $0x258] sm:$0xff]  }
0x10c6   :  { %v6428_v6 = vmax.f32 %v6190_v1, 0.0  ;;  %v6430_v33 = vmax.f32 %v6233_v62, 0.0  ;;  %v5535_v41 = vrot.slane %v11043_v49, %v9867_v12  ;;  %v5543_v0 = vrot.slane %v11043_v49, %v10093_v10  ;;  %v9520_v40 = vld [vmem:[%s10840_s5 + $0x210] sm:$0xff]   ;;  %v9523_v55 = vld [vmem:[%s10840_s5 + $0x2d8] sm:$0xff]  }
0x10c7   :  { %v6443_v42 = vpack.c.bf16 %v6427_v60, %v6411_v18  ;;  %v6445_v4 = vpack.c.bf16 %v6429_v7, %v6413_v46  ;;  %v5539_v25 = vrot.slane %v11043_v49, %v9872_v17  ;;  %v5547_v58 = vrot.slane %v11043_v49, %v10325_v13  ;;  %v9521_v19 = vld [vmem:[%s10840_s5 + $0x290] sm:$0xff]   ;;  %v9524_v60 = vld [vmem:[%s10840_s5 + $0x218] sm:$0xff]  }
0x10c8   :  { %v6444_v23 = vpack.c.bf16 %v6428_v6, %v6412_v22  ;;  %v6446_v61 = vpack.c.bf16 %v6430_v33, %v6414_v57  ;;  %8885 = vmatpush3.bf16.msra.mxu1 %v9500_v43  ;;  %8907 = vmatpush3.bf16.msra.mxu0 %v9501_v27  ;;  %v9525_v7 = vld [vmem:[%s10840_s5 + $0x298] sm:$0xff]   ;;  %v9526_v6 = vld [vmem:[%s10840_s5 + $0x260] sm:$0xff]  }
0x10c9   :  { %8886 = vmatprep.subr.bf16.mxu1 %v9502_v9  ;;  %8908 = vmatprep.subr.bf16.mxu0 %v9503_v39  ;;  %v9527_v33 = vld [vmem:[%s10840_s5 + $0x2e0] sm:$0xff]  }
0x10ca   :  { %7600 = vmatprep.mubr.bf16.mxu1 %v6444_v23  ;;  %7641 = vmatprep.mubr.bf16.mxu0 %v6446_v61 }
0x10cc   :  { %8887 = vmatpush3.bf16.msra.mxu1 %v9504_v47  ;;  %8909 = vmatpush3.bf16.msra.mxu0 %v9505_v11 }
0x10cd   :  { %8888 = vmatprep.subr.bf16.mxu1 %v9506_v63  ;;  %8910 = vmatprep.subr.bf16.mxu0 %v9507_v21 }
0x10d0   :  { %8889 = vmatpush3.bf16.msra.mxu1 %v9508_v50  ;;  %8911 = vmatpush3.bf16.msra.mxu0 %v9509_v38  ;;  %v9528_v50 = vld [vmem:[%s10840_s5 + $0x220] sm:$0xff]  }
0x10d1   :  { %8918 = vmatprep.subr.bf16.mxu1 %v9510_v34  ;;  %8940 = vmatprep.subr.bf16.mxu0 %v9511_v26  ;;  %v9529_v38 = vld [vmem:[%s10840_s5 + $0x2a0] sm:$0xff]   ;;  %v9530_v34 = vld [vmem:[%s10840_s5 + $0x268] sm:$0xff]  }
0x10d2   :  { %v9531_v26 = vld [vmem:[%s10840_s5 + $0x2e8] sm:$0xff]  }
0x10d3   :  { %7601 = vmatmul.mubr.bf16.vlgmr.msra.gmra.mrb[92].mxu1 %v6443_v42  ;;  %7642 = vmatmul.mubr.bf16.vlgmr.msra.gmra.mrb[104].mxu0 %v6445_v4 }
0x10d4   :  { %8919 = vmatpush3.bf16.msra.mxu1 %v9512_v24  ;;  %8941 = vmatpush3.bf16.msra.mxu0 %v9513_v3  ;;  %v9532_v24 = vld [vmem:[%s10840_s5 + $0x228] sm:$0xff]  }
0x10d5   :  { %8920 = vmatprep.subr.bf16.mxu1 %v9514_v53  ;;  %8942 = vmatprep.subr.bf16.mxu0 %v9515_v31  ;;  %v9533_v3 = vld [vmem:[%s10840_s5 + $0x2a8] sm:$0xff]   ;;  %v9534_v53 = vld [vmem:[%s10840_s5 + $0x270] sm:$0xff]  }
0x10d6   :  { %v9535_v31 = vld [vmem:[%s10840_s5 + $0x2f0] sm:$0xff]  }
0x10d8   :  { %v6269_v51 = vpop.f32.mrb[80].mxu1  ;;  %v6312_v56 = vpop.f32.mrb[92].mxu0  ;;  %8921 = vmatpush3.bf16.msra.mxu1 %v9516_v20  ;;  %8943 = vmatpush3.bf16.msra.mxu0 %v9517_v16  ;;  %v9536_v20 = vld [vmem:[%s10840_s5 + $0x230] sm:$0xff]  }
0x10d9   :  { %v6270_v12 = vadd.f32 %v6269_v51, %v5535_v41  ;;  %v6313_v28 = vadd.f32 %v6312_v56, %v5543_v0  ;;  %v6271_v59 = vpop.f32.mrb[81].mxu1  ;;  %v6314_v10 = vpop.f32.mrb[93].mxu0  ;;  %8922 = vmatprep.subr.bf16.mxu1 %v9518_v45  ;;  %8944 = vmatprep.subr.bf16.mxu0 %v9519_v30  ;;  %v9537_v16 = vld [vmem:[%s10840_s5 + $0x2b0] sm:$0xff]   ;;  %v9540_v45 = vld [vmem:[%s10840_s5 + $0x238] sm:$0xff]   ;;  %v9542_v51 = vld [vmem:[%s10840_s5 + $0x340] sm:$0xff]  }
0x10da   :  { %v6272_v17 = vadd.f32 %v6271_v59, %v5539_v25  ;;  %v6315_v48 = vadd.f32 %v6314_v10, %v5547_v58  ;;  %v6273_v54 = vpop.f32.mrb[82].mxu1  ;;  %v6316_v13 = vpop.f32.mrb[94].mxu0  ;;  %v9541_v30 = vld [vmem:[%s10840_s5 + $0x2b8] sm:$0xff]   ;;  %v9543_v56 = vld [vmem:[%s10840_s5 + $0x3c0] sm:$0xff]  }
0x10db   :  { %v6274_v1 = vadd.f32 %v6273_v54, %v5535_v41  ;;  %v6317_v62 = vadd.f32 %v6316_v13, %v5543_v0  ;;  %v6275_v43 = vpop.f32.mrb[83].mxu1  ;;  %v6318_v27 = vpop.f32.mrb[95].mxu0  ;;  %v6415_v9 = vmax.f32 %v6270_v12, 0.0  ;;  %v6417_v39 = vmax.f32 %v6313_v28, 0.0  ;;  %v9538_v41 = vld [vmem:[%s10840_s5 + $0x278] sm:$0xff]   ;;  %v9544_v59 = vld [vmem:[%s10840_s5 + $0x300] sm:$0xff]  }
0x10dc   :  { %v6276_v18 = vadd.f32 %v6275_v43, %v5539_v25  ;;  %v6319_v46 = vadd.f32 %v6318_v27, %v5547_v58  ;;  %8923 = vmatpush3.bf16.msra.mxu1 %v9520_v40  ;;  %8945 = vmatpush3.bf16.msra.mxu0 %v9521_v19  ;;  %v6416_v42 = vmax.f32 %v6272_v17, 0.0  ;;  %v6418_v4 = vmax.f32 %v6315_v48, 0.0  ;;  %v9539_v0 = vld [vmem:[%s10840_s5 + $0x2f8] sm:$0xff]   ;;  %v9545_v10 = vld [vmem:[%s10840_s5 + $0x380] sm:$0xff]   ;;  %v9546_v17 = vld [vmem:[%s10840_s5 + $0x348] sm:$0xff]  }
0x10dd   :  { %v6431_v22 = vmax.f32 %v6274_v1, 0.0  ;;  %v6433_v57 = vmax.f32 %v6317_v62, 0.0  ;;  %8924 = vmatprep.subr.bf16.mxu1 %v9522_v52  ;;  %8946 = vmatprep.subr.bf16.mxu0 %v9523_v55  ;;  %v5551_v25 = vrot.slane %v11043_v49, %v10348_v29  ;;  %v5559_v58 = vrot.slane %v11043_v49, %v10351_v32  ;;  %v9547_v48 = vld [vmem:[%s10840_s5 + $0x3c8] sm:$0xff]  }
0x10de   :  { %v6432_v23 = vmax.f32 %v6276_v18, 0.0  ;;  %v6434_v61 = vmax.f32 %v6319_v46, 0.0  ;;  %v5555_v40 = vrot.slane %v11043_v49, %v10354_v2  ;;  %v5563_v19 = vrot.slane %v11043_v49, %v10357_v15  ;;  %v9548_v46 = vld [vmem:[%s10840_s5 + $0x308] sm:$0xff]  }
0x10df   :  { %v11065_v47 = vpack.c.bf16 %v6431_v22, %v6415_v9  ;;  %v11067_v11 = vpack.c.bf16 %v6433_v57, %v6417_v39  ;;  %v9550_v57 = vld [vmem:[%s10840_s5 + $0x350] sm:$0xff]  }
0x10e0   :  { %v6448_v63 = vpack.c.bf16 %v6432_v23, %v6416_v42  ;;  %v6450_v21 = vpack.c.bf16 %v6434_v61, %v6418_v4  ;;  %8925 = vmatpush3.bf16.msra.mxu1 %v9524_v60  ;;  %8947 = vmatpush3.bf16.msra.mxu0 %v9525_v7  ;;  %v9549_v60 = vld [vmem:[%s10840_s5 + $0x388] sm:$0xff]  }
0x10e1   :  { %8926 = vmatprep.subr.bf16.mxu1 %v9526_v6  ;;  %8948 = vmatprep.subr.bf16.mxu0 %v9527_v33  ;;  %v9551_v6 = vld [vmem:[%s10840_s5 + $0x3d0] sm:$0xff]  }
0x10e2   :  { %7682 = vmatprep.mubr.bf16.mxu1 %v6448_v63  ;;  %7723 = vmatprep.mubr.bf16.mxu0 %v6450_v21  ;;  %v9552_v21 = vld [vmem:[%s10840_s5 + $0x310] sm:$0xff]  }
0x10e4   :  { %8927 = vmatpush3.bf16.msra.mxu1 %v9528_v50  ;;  %8949 = vmatpush3.bf16.msra.mxu0 %v9529_v38  ;;  %v9553_v50 = vld [vmem:[%s10840_s5 + $0x390] sm:$0xff]   ;;  %v9554_v38 = vld [vmem:[%s10840_s5 + $0x358] sm:$0xff]  }
0x10e5   :  { %8928 = vmatprep.subr.bf16.mxu1 %v9530_v34  ;;  %8950 = vmatprep.subr.bf16.mxu0 %v9531_v26  ;;  %v9555_v34 = vld [vmem:[%s10840_s5 + $0x3d8] sm:$0xff]  }
0x10e6   :  { %v9556_v26 = vld [vmem:[%s10840_s5 + $0x318] sm:$0xff]  }
0x10e8   :  { %8929 = vmatpush3.bf16.msra.mxu1 %v9532_v24  ;;  %8951 = vmatpush3.bf16.msra.mxu0 %v9533_v3  ;;  %v9557_v24 = vld [vmem:[%s10840_s5 + $0x398] sm:$0xff]   ;;  %v9558_v3 = vld [vmem:[%s10840_s5 + $0x360] sm:$0xff]  }
0x10e9   :  { %8930 = vmatprep.subr.bf16.mxu1 %v9534_v53  ;;  %8952 = vmatprep.subr.bf16.mxu0 %v9535_v31  ;;  %v9559_v53 = vld [vmem:[%s10840_s5 + $0x3e0] sm:$0xff]  }
0x10ea   :  { %v9560_v31 = vld [vmem:[%s10840_s5 + $0x320] sm:$0xff]  }
0x10ec   :  { %8931 = vmatpush3.bf16.msra.mxu1 %v9536_v20  ;;  %8953 = vmatpush3.bf16.msra.mxu0 %v9537_v16  ;;  %v9561_v20 = vld [vmem:[%s10840_s5 + $0x3a0] sm:$0xff]   ;;  %v9562_v16 = vld [vmem:[%s10840_s5 + $0x368] sm:$0xff]  }
0x10ed   :  { %8932 = vmatprep.subr.bf16.mxu1 %v9538_v41  ;;  %8954 = vmatprep.subr.bf16.mxu0 %v9539_v0  ;;  %v9563_v41 = vld [vmem:[%s10840_s5 + $0x3e8] sm:$0xff]  }
0x10ee   :  { %v9564_v0 = vld [vmem:[%s10840_s5 + $0x328] sm:$0xff]  }
0x10f0   :  { %v6355_v12 = vpop.f32.mrb[84].mxu1  ;;  %v6398_v28 = vpop.f32.mrb[96].mxu0  ;;  %8933 = vmatpush3.bf16.msra.mxu1 %v9540_v45  ;;  %8955 = vmatpush3.bf16.msra.mxu0 %v9541_v30  ;;  %v9565_v45 = vld [vmem:[%s10840_s5 + $0x3a8] sm:$0xff]   ;;  %v9566_v30 = vld [vmem:[%s10840_s5 + $0x370] sm:$0xff]  }
0x10f1   :  { %v6356_v29 = vadd.f32 %v6355_v12, %v5551_v25  ;;  %v6399_v52 = vadd.f32 %v6398_v28, %v5559_v58  ;;  %v6357_v55 = vpop.f32.mrb[85].mxu1  ;;  %v6400_v32 = vpop.f32.mrb[97].mxu0  ;;  %8962 = vmatprep.subr.bf16.mxu1 %v9542_v51  ;;  %8984 = vmatprep.subr.bf16.mxu0 %v9543_v56  ;;  %v9569_v51 = vld [vmem:[%s10840_s5 + $0x3b0] sm:$0xff]   ;;  %v9570_v56 = vld [vmem:[%s10840_s5 + $0x378] sm:$0xff]  }
0x10f2   :  { %v6358_v2 = vadd.f32 %v6357_v55, %v5555_v40  ;;  %v6401_v54 = vadd.f32 %v6400_v32, %v5563_v19  ;;  %v6359_v13 = vpop.f32.mrb[86].mxu1  ;;  %v6402_v15 = vpop.f32.mrb[98].mxu0  ;;  %v9573_v12 = vld [vmem:[%s10840_s5 + $0x3b8] sm:$0xff]  }
0x10f3   :  { %v6360_v49 = vadd.f32 %v6359_v13, %v5551_v25  ;;  %v6403_v1 = vadd.f32 %v6402_v15, %v5559_v58  ;;  %v6361_v62 = vpop.f32.mrb[87].mxu1  ;;  %v6404_v43 = vpop.f32.mrb[99].mxu0  ;;  %7683 = vmatmul.mubr.bf16.vlgmr.msra.gmra.mrb[96].mxu1 %v11065_v47  ;;  %7724 = vmatmul.mubr.bf16.vlgmr.msra.gmra.mrb[108].mxu0 %v11067_v11  ;;  %v6419_v7 = vmax.f32 %v6356_v29, 0.0  ;;  %v6421_v9 = vmax.f32 %v6399_v52, 0.0  ;;  %v9567_v25 = vld [vmem:[%s10840_s5 + $0x3f0] sm:$0xff]  }
0x10f4   :  { %v6362_v27 = vadd.f32 %v6361_v62, %v5555_v40  ;;  %v6405_v18 = vadd.f32 %v6404_v43, %v5563_v19  ;;  %8963 = vmatpush3.bf16.msra.mxu1 %v9544_v59  ;;  %8985 = vmatpush3.bf16.msra.mxu0 %v9545_v10  ;;  %v6420_v33 = vmax.f32 %v6358_v2, 0.0  ;;  %v6422_v42 = vmax.f32 %v6401_v54, 0.0  ;;  %v9568_v58 = vld [vmem:[%s10840_s5 + $0x330] sm:$0xff]   ;;  %v9571_v40 = vld [vmem:[%s10840_s5 + $0x3f8] sm:$0xff]   ;;  %v8431_v10 = vld [vmem:[%s7996_s20] ss:$0 sm:$0xff] }
0x10f5   :  { %v6435_v39 = vmax.f32 %v6360_v49, 0.0  ;;  %v6437_v22 = vmax.f32 %v6403_v1, 0.0  ;;  %8964 = vmatprep.subr.bf16.mxu1 %v9546_v17  ;;  %8986 = vmatprep.subr.bf16.mxu0 %v9547_v48  ;;  %v9572_v19 = vld [vmem:[%s10840_s5 + $0x338] sm:$0xff]  }
0x10f6   :  { %v6436_v4 = vmax.f32 %v6362_v27, 0.0  ;;  %v6438_v23 = vmax.f32 %v6405_v18, 0.0 }
0x10f7   :  { %v6451_v61 = vpack.c.bf16 %v6435_v39, %v6419_v7  ;;  %v6453_v47 = vpack.c.bf16 %v6437_v22, %v6421_v9 }
0x10f8   :  { %v6452_v11 = vpack.c.bf16 %v6436_v4, %v6420_v33  ;;  %v6454_v63 = vpack.c.bf16 %v6438_v23, %v6422_v42  ;;  %8965 = vmatpush3.bf16.msra.mxu1 %v9548_v46  ;;  %8987 = vmatpush3.bf16.msra.mxu0 %v9549_v60 }
0x10f9   :  { %8966 = vmatprep.subr.bf16.mxu1 %v9550_v57  ;;  %8988 = vmatprep.subr.bf16.mxu0 %v9551_v6 }
0x10fa   :  { %7764 = vmatprep.mubr.bf16.mxu1 %v6452_v11  ;;  %7805 = vmatprep.mubr.bf16.mxu0 %v6454_v63 }
0x10fc   :  { %8967 = vmatpush3.bf16.msra.mxu1 %v9552_v21  ;;  %8989 = vmatpush3.bf16.msra.mxu0 %v9553_v50 }
0x10fd   :  { %8968 = vmatprep.subr.bf16.mxu1 %v9554_v38  ;;  %8990 = vmatprep.subr.bf16.mxu0 %v9555_v34 }
0x1100   :  { %8969 = vmatpush3.bf16.msra.mxu1 %v9556_v26  ;;  %8991 = vmatpush3.bf16.msra.mxu0 %v9557_v24 }
0x1101   :  { %8970 = vmatprep.subr.bf16.mxu1 %v9558_v3  ;;  %8992 = vmatprep.subr.bf16.mxu0 %v9559_v53 }
0x1104   :  { %8971 = vmatpush3.bf16.msra.mxu1 %v9560_v31  ;;  %8993 = vmatpush3.bf16.msra.mxu0 %v9561_v20 }
0x1105   :  { %8972 = vmatprep.subr.bf16.mxu1 %v9562_v16  ;;  %8994 = vmatprep.subr.bf16.mxu0 %v9563_v41 }
0x1108   :  { %8973 = vmatpush3.bf16.msra.mxu1 %v9564_v0  ;;  %8995 = vmatpush3.bf16.msra.mxu0 %v9565_v45 }
0x1109   :  { %8974 = vmatprep.subr.bf16.mxu1 %v9566_v30  ;;  %8996 = vmatprep.subr.bf16.mxu0 %v9567_v25 }
0x110c   :  { %8975 = vmatpush3.bf16.msra.mxu1 %v9568_v58  ;;  %8997 = vmatpush3.bf16.msra.mxu0 %v9569_v51 }
0x110d   :  { %8976 = vmatprep.subr.bf16.mxu1 %v9570_v56  ;;  %8998 = vmatprep.subr.bf16.mxu0 %v9571_v40 }
0x1110   :  { %8977 = vmatpush3.bf16.msra.mxu1 %v9572_v19  ;;  %8999 = vmatpush3.bf16.msra.mxu0 %v9573_v12 }
0x1111   :  { %9191 = vmatprep.subr.bf16.mxu1 %v9739_v14 }
0x1113   :  { %7765 = vmatmul.mubr.bf16.vlgmr.msra.gmra.mrb[100].mxu1 %v6451_v61  ;;  %7806 = vmatmul.mubr.bf16.vlgmr.msra.gmra.mrb[112].mxu0 %v6453_v47 }
0x1114   :  { %9203 = vmatprep.mubr.msk.bf16.mxu1 %vm9741_vm1, %v9739_v14 }
0x1186   :  { %v8846_v28 = vpop.f32.mrb[88].mxu1  ;;  %v8868_v59 = vpop.f32.mrb[100].mxu0 }
0x1187   :  { %v8847_v29 = vpop.f32.mrb[89].mxu1  ;;  %v8869_v52 = vpop.f32.mrb[101].mxu0 }
0x1188   :  { %v8848_v55 = vadd.f32 %v8847_v29, %v8846_v28  ;;  %v8870_v32 = vadd.f32 %v8869_v52, %v8868_v59  ;;  %v8849_v17 = vpop.f32.mrb[90].mxu1  ;;  %v8871_v48 = vpop.f32.mrb[102].mxu0 }
0x1189   :  { %v8850_v2 = vpop.f32.mrb[91].mxu1  ;;  %v8872_v54 = vpop.f32.mrb[103].mxu0 }
0x118a   :  { %v7521_v13 = vadd.f32 %v8848_v55, %v8431_v10  ;;  %v8851_v15 = vadd.f32 %v8850_v2, %v8849_v17  ;;  %v8873_v49 = vadd.f32 %v8872_v54, %v8871_v48 }
0x118c   :  { %v7562_v1 = vadd.f32 %v8870_v32, %v7521_v13  ;;  %v7524_v62 = vadd.f32 %v8851_v15, %v8431_v10 }
0x118e   :  { %v7565_v43 = vadd.f32 %v8873_v49, %v7524_v62 }
0x11a6   :  { %v8890_v27 = vpop.f32.mrb[92].mxu1  ;;  %v8912_v18 = vpop.f32.mrb[104].mxu0 }
0x11a7   :  { %v8891_v46 = vpop.f32.mrb[93].mxu1  ;;  %v8913_v60 = vpop.f32.mrb[105].mxu0 }
0x11a8   :  { %v8892_v7 = vadd.f32 %v8891_v46, %v8890_v27  ;;  %v8914_v9 = vadd.f32 %v8913_v60, %v8912_v18  ;;  %v8893_v39 = vpop.f32.mrb[94].mxu1  ;;  %v8915_v22 = vpop.f32.mrb[106].mxu0 }
0x11a9   :  { %v8894_v57 = vpop.f32.mrb[95].mxu1  ;;  %v8916_v6 = vpop.f32.mrb[107].mxu0 }
0x11aa   :  { %v7603_v33 = vadd.f32 %v8892_v7, %v7562_v1  ;;  %v8895_v42 = vadd.f32 %v8894_v57, %v8893_v39  ;;  %v8917_v4 = vadd.f32 %v8916_v6, %v8915_v22  ;;  %v9575_v7 = vld [vmem:[%s7999_s24 + $0x8] sm:$0xff]   ;;  %v9577_v39 = vld [vmem:[%s7999_s24 + $0x18] sm:$0xff]   ;;  %v9578_v22 = vld [vmem:[%s7999_s24 + $0x20] sm:$0xff]  }
0x11ab   :  { %v9579_v57 = vld [vmem:[%s7999_s24 + $0x28] sm:$0xff]  }
0x11ac   :  { %v7644_v23 = vadd.f32 %v8914_v9, %v7603_v33  ;;  %v7606_v61 = vadd.f32 %v8895_v42, %v7565_v43  ;;  %v9576_v9 = vld [vmem:[%s7999_s24 + $0x10] sm:$0xff]  }
0x11ae   :  { %v7647_v47 = vadd.f32 %v8917_v4, %v7606_v61 }
0x11c6   :  { %v8934_v11 = vpop.f32.mrb[96].mxu1  ;;  %v8956_v63 = vpop.f32.mrb[108].mxu0 }
0x11c7   :  { %v8935_v21 = vpop.f32.mrb[97].mxu1  ;;  %v8957_v50 = vpop.f32.mrb[109].mxu0 }
0x11c8   :  { %v8936_v38 = vadd.f32 %v8935_v21, %v8934_v11  ;;  %v8958_v34 = vadd.f32 %v8957_v50, %v8956_v63  ;;  %v8937_v26 = vpop.f32.mrb[98].mxu1  ;;  %v8959_v24 = vpop.f32.mrb[110].mxu0 }
0x11c9   :  { %v8938_v3 = vpop.f32.mrb[99].mxu1  ;;  %v8960_v53 = vpop.f32.mrb[111].mxu0 }
0x11ca   :  { %v7685_v31 = vadd.f32 %v8936_v38, %v7644_v23  ;;  %v8939_v20 = vadd.f32 %v8938_v3, %v8937_v26  ;;  %v8961_v16 = vadd.f32 %v8960_v53, %v8959_v24  ;;  %v8561_v38 = vld [vmem:[%s7998_s3] ss:$0 sm:$0xff] }
0x11cb   :  { %v8562_v53 = vld [vmem:[%s8000_s7] ss:$0 sm:$0xff] }
0x11cc   :  { %v7726_v41 = vadd.f32 %v8958_v34, %v7685_v31  ;;  %v7688_v0 = vadd.f32 %v8939_v20, %v7647_v47  ;;  %v8560_v47 = vld [vmem:[%s7997_s28] ss:$0 sm:$0xff] }
0x11ce   :  { %v7729_v45 = vadd.f32 %v8961_v16, %v7688_v0 }
0x11e6   :  { %v8978_v30 = vpop.f32.mrb[100].mxu1  ;;  %v9000_v25 = vpop.f32.mrb[112].mxu0 }
0x11e7   :  { %v8979_v58 = vpop.f32.mrb[101].mxu1  ;;  %v9001_v51 = vpop.f32.mrb[113].mxu0 }
0x11e8   :  { %v8980_v56 = vadd.f32 %v8979_v58, %v8978_v30  ;;  %v9002_v40 = vadd.f32 %v9001_v51, %v9000_v25  ;;  %v8981_v19 = vpop.f32.mrb[102].mxu1  ;;  %v9003_v12 = vpop.f32.mrb[114].mxu0 }
0x11e9   :  { %v8982_v28 = vpop.f32.mrb[103].mxu1  ;;  %v9004_v59 = vpop.f32.mrb[115].mxu0 }
0x11ea   :  { %v7767_v10 = vadd.f32 %v8980_v56, %v7726_v41  ;;  %v8983_v29 = vadd.f32 %v8982_v28, %v8981_v19  ;;  %v9005_v52 = vadd.f32 %v9004_v59, %v9003_v12 }
0x11ec   :  { %v7808_v55 = vadd.f32 %v9002_v40, %v7767_v10  ;;  %v7770_v32 = vadd.f32 %v8983_v29, %v7729_v45 }
0x11ee   :  { %v7811_v17 = vadd.f32 %v9005_v52, %v7770_v32  ;;  %v7814_v48 = vadd.f32 %v7808_v55, %v10854_v35 }
0x11f0   :  { %v7816_v2 = vsel %vm391_vm6, %v7814_v48, 0.0  ;;  %v7815_v54 = vadd.f32 %v7811_v17, %v10856_v37  ;;  %v9574_v37 = vld [vmem:[%s7999_s24] sm:$0xff]  }
0x11f1   :  { %7817 = vadd.xlane.f32.xlu0 %v7816_v2  ;;  %9192 = vmatpush3.bf16.msra.mxu1 %v9574_v37 }
0x11f2   :  { %v7819_v13 = vsel %vm391_vm6, %v7815_v54, 0.0  ;;  %9193 = vmatprep.subr.bf16.mxu1 %v9739_v14 }
0x11f3   :  { %7820 = vadd.xlane.f32.xlu1 %v7819_v13 }
0x11f5   :  { %9194 = vmatpush3.bf16.msra.mxu1 %v9575_v7 }
0x11f6   :  { %9195 = vmatprep.subr.bf16.mxu1 %v9739_v14 }
0x11f9   :  { %9196 = vmatpush3.bf16.msra.mxu1 %v9576_v9 }
0x11fa   :  { %9197 = vmatprep.subr.bf16.mxu1 %v9739_v14 }
0x11fd   :  { %9198 = vmatpush3.bf16.msra.mxu1 %v9577_v39 }
0x11fe   :  { %9199 = vmatprep.subr.bf16.mxu1 %v9739_v14 }
0x1201   :  { %9200 = vmatpush3.bf16.msra.mxu1 %v9578_v22 }
0x1202   :  { %9201 = vmatprep.subr.bf16.mxu1 %v9739_v14 }
0x1205   :  { %9202 = vmatpush3.bf16.msra.mxu1 %v9579_v57 }
0x127e   :  { %v7818_v15 = vpop.xlane.xlu0 %7817 }
0x127f   :  { %v7822_v49 = vmul.f32 0.010416667, %v7818_v15 }
0x1280   :  { %v7821_v1 = vpop.xlane.xlu1 %7820 }
0x1281   :  { %v7824_v62 = vsub.f32 %v7814_v48, %v7822_v49  ;;  %v7823_v43 = vmul.f32 0.010416667, %v7821_v1 }
0x1283   :  { %v7825_v27 = vsub.f32 %v7815_v54, %v7823_v43  ;;  %v7826_v18 = vmul.f32 %v7824_v62, %v7824_v62 }
0x1285   :  { %v7828_v46 = vsel %vm391_vm6, %v7826_v18, 0.0  ;;  %v7827_v60 = vmul.f32 %v7825_v27, %v7825_v27 }
0x1286   :  { %7829 = vadd.xlane.f32.xlu0 %v7828_v46 }
0x1287   :  { %v7831_v35 = vsel %vm391_vm6, %v7827_v60, 0.0 }
0x1288   :  { %7832 = vadd.xlane.f32.xlu1 %v7831_v35 }
0x1313   :  { %v7830_v6 = vpop.xlane.xlu0 %7829 }
0x1314   :  { %v7834_v33 = vmul.f32 0.010416667, %v7830_v6 }
0x1315   :  { %v7833_v42 = vpop.xlane.xlu1 %7832 }
0x1316   :  { %v7836_v4 = vadd.f32 1e-05, %v7834_v33  ;;  %v7835_v23 = vmul.f32 0.010416667, %v7833_v42 }
0x1318   :  { %9724 = vrsqrt.f32 %v7836_v4  ;;  %v7837_v61 = vadd.f32 1e-05, %v7835_v23 }
0x131a   :  { %9726 = vrsqrt.f32 %v7837_v61 }
0x1322   :  { %v9725_v14 = vpop.eup %9724 }
0x1323   :  { %v7840_v11 = vmul.f32 %v9725_v14, %v7824_v62 }
0x1324   :  { %v9727_v63 = vpop.eup %9726 }
0x1325   :  { %v7849_v21 = vmul.f32 %v8560_v47, %v7840_v11  ;;  %v7841_v50 = vmul.f32 %v9727_v63, %v7825_v27 }
0x1327   :  { %v7850_v34 = vmul.f32 %v8560_v47, %v7841_v50  ;;  %v7858_v26 = vadd.f32 %v8561_v38, %v7849_v21 }
0x1329   :  { %v7859_v24 = vadd.f32 %v8561_v38, %v7850_v34 }
0x132b   :  { %v7860_v3 = vpack.c.bf16 %v7859_v24, %v7858_v26 }
0x132d   :  { %9204 = vmatmul.mubr.msk.bf16.vlgmr.msra.gmra.mrb[104].mxu1 %vm391_vm6, %v7860_v3 }
0x1400   :  { %v7953_v31 = vpop.f32.mrb[104].mxu1 }
0x1401   :  { %v7954_v20 = vadd.f32 %v8562_v53, %v7953_v31  ;;  %v9205_v16 = vpop.f32.mrb[105].mxu1 }
0x1402   :  { %v7956_v41 = vpop.f32.mrb[106].mxu1 }
0x1403   :  { %v7960_v0 = vmul.f32 %v7954_v20, %v9813_v36  ;;  %v7957_v45 = vadd.f32 %v8562_v53, %v7956_v41  ;;  %v9206_v30 = vpop.f32.mrb[107].mxu1 }
0x1405   :  { %v7962_v25 = vadd.f32 %v7960_v0, %v9784_v5  ;;  %v7961_v58 = vmul.f32 %v7957_v45, %v9816_v44 }
0x1407   :  { %7965 = vst.msk [vmem:[%s8001_s11] sm:$0xff] %vm7964_vm0, %v7962_v25  ;;  %v7963_v51 = vadd.f32 %v7961_v58, %v9787_v8 }
0x1409   :  { %7966 = vst.msk [vmem:[%s8001_s11 + $0x8] sm:$0xff] %vm7964_vm0, %v7963_v51 }

</bundles_post_ra>
